<compile_context>
chip_gen: v7x
topology: tpu7x:2x2x1
jax: 0.10.0
libtpu: 0.0.40
codegen_flags: <defaults>
</compile_context>

<pallas_src>
import functools

import jax
import jax.numpy as jnp
from jax import lax
from jax.experimental import pallas as pl
from jax.experimental.pallas import tpu as pltpu


# ---------------------------------------------------------------------------
# Fused Pallas kernel: [Conv3x3 + folded-BN + ReLU] x num_blocks (+ residual)
# ---------------------------------------------------------------------------
def _c2f_fused_kernel(x_ref, w_ref, b_ref, o_ref, act_ref, *,
                      H, W, Cp, num_blocks, shortcut, pad):
    """One batch element per grid step.

    x_ref:   (1, H*W, Cp)            f32   input (channels zero-padded to Cp)
    w_ref:   (num_blocks*9, Cp, Cp)  bf16  folded conv*BN weights, tap-major
    b_ref:   (num_blocks, 1, Cp)     f32   folded bias
    o_ref:   (1, H*W, Cp)            f32
    act_ref: (H*W + 2*pad, Cp)       f32   VMEM scratch with zero halo rows
    """
    HW = H * W
    x = x_ref[0]                                          # (HW, Cp) f32

    # Column-position masks for the +/-1 width shifts (hoisted out of loops).
    col = lax.broadcasted_iota(jnp.int32, (HW, Cp), 0) % W
    mask_l = col >= 1          # tap dx==0 reads column w-1: invalid at w==0
    mask_r = col <= W - 2      # tap dx==2 reads column w+1: invalid at w==W-1

    # Zero only the halo rows (interior is overwritten every block).
    # Both slice starts are 8-aligned (pad % 8 == 0, HW % 8 == 0).
    act_ref[0:pad, :] = jnp.zeros((pad, Cp), jnp.float32)
    act_ref[pad + HW:pad + HW + pad, :] = jnp.zeros((pad, Cp), jnp.float32)

    y = x
    for blk in range(num_blocks):                         # static unroll (small)
        # Aligned interior store; halo rows remain zero across blocks.
        act_ref[pad:pad + HW, :] = y

        # Bias as accumulator init (folded-BN epilogue becomes just ReLU).
        acc = jnp.broadcast_to(b_ref[blk], (HW, Cp)).astype(jnp.float32)
        for t in range(9):                                # 9 taps of the 3x3 kernel
            dy, dx = t // 3, t % 3
            off = (dy - 1) * W + (dx - 1)                 # flat row shift of tap
            po = pad + off                                # static, >= 0
            patch = act_ref[po:po + HW, :]                # (HW, Cp) shifted load
            if dx == 0:
                patch = jnp.where(mask_l, patch, 0.0)
            elif dx == 2:
                patch = jnp.where(mask_r, patch, 0.0)
            acc = acc + jnp.dot(patch.astype(jnp.bfloat16), w_ref[blk * 9 + t],
                                preferred_element_type=jnp.float32)
        y = jnp.maximum(acc, 0.0)

    if shortcut:
        y = y + x                                         # residual, fused in-kernel
    o_ref[0] = y.astype(o_ref.dtype)


# ---------------------------------------------------------------------------
# Wrapper
# ---------------------------------------------------------------------------
@functools.partial(jax.jit, static_argnames=("shortcut",))
def c2f_forward(x_nchw, weights, biases, shortcut=True):
    """x_nchw: (N,C,H,W) f32. weights: (nb*9,Cp,Cp) bf16. biases: (nb,1,Cp) f32."""
    N, C, H, W = x_nchw.shape
    num_blocks = weights.shape[0] // 9
    Cp = weights.shape[-1]
    HW = H * W
    pad = ((W + 1 + 7) // 8) * 8          # >= W+1 halo rows, 8-aligned

    # NCHW -> NHWC, lane-pad channels to Cp, flatten spatial -> (N, H*W, Cp).
    x = jnp.transpose(x_nchw, (0, 2, 3, 1)).astype(jnp.float32)
    x = jnp.pad(x, ((0, 0), (0, 0), (0, 0), (0, Cp - C))).reshape(N, HW, Cp)

    kern = functools.partial(_c2f_fused_kernel, H=H, W=W, Cp=Cp,
                             num_blocks=num_blocks, shortcut=shortcut, pad=pad)
    out = pl.pallas_call(
        kern,
        out_shape=jax.ShapeDtypeStruct((N, HW, Cp), jnp.float32),
        grid=(N,),
        in_specs=[
            pl.BlockSpec((1, HW, Cp), lambda n: (n, 0, 0)),
            pl.BlockSpec((num_blocks * 9, Cp, Cp), lambda n: (0, 0, 0)),
            pl.BlockSpec((num_blocks, 1, Cp), lambda n: (0, 0, 0)),
        ],
        out_specs=pl.BlockSpec((1, HW, Cp), lambda n: (n, 0, 0)),
        scratch_shapes=[pltpu.VMEM((HW + 2 * pad, Cp), jnp.float32)],
        compiler_params=pltpu.CompilerParams(
            dimension_semantics=("parallel",),
            vmem_limit_bytes=32 * 1024 * 1024),
    )(x, weights, biases)

    out = out.reshape(N, H, W, Cp)[..., :C]
    return jnp.transpose(out, (0, 3, 1, 2))               # NHWC -> NCHW


def init_c2f_params(key, C, Cp, num_blocks):
    """Synthetic Conv2d(3x3)+BatchNorm2d params, BN folded (eval mode), padded to Cp."""
    eps = 1e-5
    ws, bs, raw = [], [], []
    for _ in range(num_blocks):
        key, kw, kb, kg, kbe, km, kv = jax.random.split(key, 7)
        w = 0.1 * jax.random.normal(kw, (3, 3, C, C), jnp.float32)      # HWIO
        conv_b = 0.1 * jax.random.normal(kb, (C,), jnp.float32)
        gamma = 1.0 + 0.1 * jax.random.normal(kg, (C,), jnp.float32)
        beta = 0.1 * jax.random.normal(kbe, (C,), jnp.float32)
        mean = 0.1 * jax.random.normal(km, (C,), jnp.float32)
        var = 1.0 + jnp.abs(jax.random.normal(kv, (C,), jnp.float32))
        scale = gamma / jnp.sqrt(var + eps)
        w_fold = w * scale                            # fold BN scale into weights
        b_fold = (conv_b - mean) * scale + beta       # fold conv bias through BN
        raw.append((w_fold, b_fold))
        w_pad = jnp.zeros((3, 3, Cp, Cp), jnp.float32).at[:, :, :C, :C].set(w_fold)
        b_pad = jnp.zeros((Cp,), jnp.float32).at[:C].set(b_fold)
        ws.append(w_pad.reshape(9, Cp, Cp))           # tap-major: t = dy*3 + dx
        bs.append(b_pad.reshape(1, Cp))
    weights = jnp.stack(ws).reshape(num_blocks * 9, Cp, Cp).astype(jnp.bfloat16)
    biases = jnp.stack(bs)                            # f32 epilogue
    return weights, biases, raw


def c2f_reference(x_nchw, raw_params, shortcut=True):
    """Pure-JAX reference (f32) of the same folded-BN forward pass."""
    x = jnp.transpose(x_nchw, (0, 2, 3, 1)).astype(jnp.float32)
    y = x
    for w, b in raw_params:
        y = lax.conv_general_dilated(y, w, (1, 1), "SAME",
                                     dimension_numbers=("NHWC", "HWIO", "NHWC"))
        y = jnp.maximum(y + b, 0.0)
    if shortcut:
        y = y + x
    return jnp.transpose(y, (0, 3, 1, 2))


# ---------------------------------------------------------------------------
# Main
# ---------------------------------------------------------------------------
if __name__ == "__main__":
    # Small shapes consistent with the module; shortcut requires Cin == Cout.
    N, C, H, W = 2, 4, 16, 16
    num_blocks = 2
    Cp = 128                       # lane-dense channel padding

    key = jax.random.PRNGKey(0)
    kx, kp = jax.random.split(key)
    x = jax.random.normal(kx, (N, C, H, W), jnp.float32)
    weights, biases, raw_params = init_c2f_params(kp, C, Cp, num_blocks)

    out = c2f_forward(x, weights, biases, shortcut=True)
    jax.block_until_ready(out)
    assert out.shape == (N, C, H, W)

    ref = c2f_reference(x, raw_params, shortcut=True)
    err = float(jnp.max(jnp.abs(out - ref)))
    assert jnp.allclose(out, ref, atol=5e-2, rtol=5e-2), err

    print("KERNEL_OK")
</pallas_src>

<mosaic_0001>
module attributes {stable_mosaic.version = 11 : i64} {
  func.func @_c2f_fused_kernel(%arg0: i32, %arg1: memref<1x256x128xf32, #tpu.memory_space<vmem>>, %arg2: memref<18x128x128xbf16, #tpu.memory_space<vmem>>, %arg3: memref<2x1x128xf32, #tpu.memory_space<vmem>>, %arg4: memref<1x256x128xf32, #tpu.memory_space<vmem>>, %arg5: memref<304x128xf32, #tpu.memory_space<vmem>>) attributes {dimension_semantics = [#tpu.dimension_semantics<parallel>], iteration_bounds = array<i64: 2>, scalar_prefetch = 0 : i64, scratch_operands = 1 : i64, tpu.core_type = #tpu.core_type<tc>, window_params = [{transform_indices = @transform_0, window_bounds = array<i64: 1, 256, 128>}, {pipeline_mode = #tpu.pipeline_mode<synchronous>, transform_indices = @transform_1, window_bounds = array<i64: 18, 128, 128>}, {pipeline_mode = #tpu.pipeline_mode<synchronous>, transform_indices = @transform_2, window_bounds = array<i64: 2, 1, 128>}, {transform_indices = @transform_3, window_bounds = array<i64: 1, 256, 128>}]} {
    %c0 = arith.constant 0 : index
    %c0_0 = arith.constant 0 : index
    %c0_1 = arith.constant 0 : index
    %0 = vector.load %arg1[%c0, %c0_0, %c0_1] : memref<1x256x128xf32, #tpu.memory_space<vmem>>, vector<1x256x128xf32>
    %1 = vector.shape_cast %0 : vector<1x256x128xf32> to vector<256x128xf32>
    %2 = tpu.iota {dimensions = array<i32: 0>} : vector<256x128xi32>
    %c16_i32 = arith.constant 16 : i32
    %c0_i32 = arith.constant 0 : i32
    %3 = arith.cmpi eq, %c16_i32, %c0_i32 : i32
    %c1_i32 = arith.constant 1 : i32
    %4 = arith.select %3, %c1_i32, %c16_i32 : i32
    %5 = vector.broadcast %4 : i32 to vector<256x128xi32>
    %6 = arith.remsi %2, %5 : vector<256x128xi32>
    %c0_i32_2 = arith.constant 0 : i32
    %7 = vector.broadcast %c0_i32_2 : i32 to vector<256x128xi32>
    %8 = arith.cmpi ne, %6, %7 : vector<256x128xi32>
    %c0_i32_3 = arith.constant 0 : i32
    %9 = vector.broadcast %c0_i32_3 : i32 to vector<256x128xi32>
    %10 = arith.cmpi slt, %6, %9 : vector<256x128xi32>
    %c0_i32_4 = arith.constant 0 : i32
    %11 = arith.cmpi slt, %4, %c0_i32_4 : i32
    %12 = vector.broadcast %11 : i1 to vector<256x128xi1>
    %13 = vector.broadcast %12 : vector<256x128xi1> to vector<256x128xi1>
    %14 = arith.xori %10, %13 : vector<256x128xi1>
    %15 = arith.andi %14, %8 : vector<256x128xi1>
    %16 = vector.broadcast %4 : i32 to vector<256x128xi32>
    %17 = arith.addi %6, %16 : vector<256x128xi32>
    %18 = arith.select %15, %17, %6 : vector<256x128xi1>, vector<256x128xi32>
    %c1_i32_5 = arith.constant 1 : i32
    %19 = vector.broadcast %c1_i32_5 : i32 to vector<256x128xi32>
    %20 = arith.cmpi sge, %18, %19 : vector<256x128xi32>
    %c14_i32 = arith.constant 14 : i32
    %21 = vector.broadcast %c14_i32 : i32 to vector<256x128xi32>
    %22 = arith.cmpi sle, %18, %21 : vector<256x128xi32>
    %cst = arith.constant 0.000000e+00 : f32
    %23 = vector.broadcast %cst : f32 to vector<24x128xf32>
    %c0_6 = arith.constant 0 : index
    %c0_7 = arith.constant 0 : index
    %24 = vector.load %arg5[%c0_6, %c0_7] : memref<304x128xf32, #tpu.memory_space<vmem>>, vector<24x128xf32>
    tpu.vector_store %arg5[%c0_6, %c0_7], %23 {strides = array<i32>} : memref<304x128xf32, #tpu.memory_space<vmem>>, vector<24x128xf32>,
    %cst_8 = arith.constant 0.000000e+00 : f32
    %25 = vector.broadcast %cst_8 : f32 to vector<24x128xf32>
    %c280 = arith.constant 280 : index
    %c0_9 = arith.constant 0 : index
    %26 = vector.load %arg5[%c280, %c0_9] : memref<304x128xf32, #tpu.memory_space<vmem>>, vector<24x128xf32>
    tpu.vector_store %arg5[%c280, %c0_9], %25 {strides = array<i32>} : memref<304x128xf32, #tpu.memory_space<vmem>>, vector<24x128xf32>,
    %c24 = arith.constant 24 : index
    %c0_10 = arith.constant 0 : index
    %27 = vector.load %arg5[%c24, %c0_10] : memref<304x128xf32, #tpu.memory_space<vmem>>, vector<256x128xf32>
    tpu.vector_store %arg5[%c24, %c0_10], %1 {strides = array<i32>} : memref<304x128xf32, #tpu.memory_space<vmem>>, vector<256x128xf32>,
    %c0_11 = arith.constant 0 : index
    %c0_12 = arith.constant 0 : index
    %c0_13 = arith.constant 0 : index
    %28 = vector.load %arg3[%c0_11, %c0_12, %c0_13] : memref<2x1x128xf32, #tpu.memory_space<vmem>>, vector<1x1x128xf32>
    %29 = vector.shape_cast %28 : vector<1x1x128xf32> to vector<1x128xf32>
    %30 = vector.shape_cast %29 : vector<1x128xf32> to vector<1x128xf32>
    %31 = vector.broadcast %30 : vector<1x128xf32> to vector<256x128xf32>
    %c7 = arith.constant 7 : index
    %c0_14 = arith.constant 0 : index
    %32 = vector.load %arg5[%c7, %c0_14] : memref<304x128xf32, #tpu.memory_space<vmem>>, vector<256x128xf32>
    %cst_15 = arith.constant 0.000000e+00 : f32
    %33 = vector.broadcast %cst_15 : f32 to vector<256x128xf32>
    %34 = arith.select %20, %32, %33 : vector<256x128xi1>, vector<256x128xf32>
    %35 = arith.truncf %34 : vector<256x128xf32> to vector<256x128xbf16>
    %c0_16 = arith.constant 0 : index
    %c0_17 = arith.constant 0 : index
    %c0_18 = arith.constant 0 : index
    %36 = vector.load %arg2[%c0_16, %c0_17, %c0_18] : memref<18x128x128xbf16, #tpu.memory_space<vmem>>, vector<1x128x128xbf16>
    %37 = vector.shape_cast %36 : vector<1x128x128xbf16> to vector<128x128xbf16>
    %cst_19 = arith.constant dense<0.000000e+00> : vector<256x128xf32>
    %38 = tpu.matmul %35, %37, %cst_19 {dimension_numbers = #tpu.dot_dimension_numbers<[1], [0], [0], [1], [0, 0, 1, 1], [], []>} : vector<256x128xbf16>, vector<128x128xbf16>, vector<256x128xf32> -> vector<256x128xf32>
    %39 = arith.addf %31, %38 : vector<256x128xf32>
    %c8 = arith.constant 8 : index
    %c0_20 = arith.constant 0 : index
    %40 = vector.load %arg5[%c8, %c0_20] : memref<304x128xf32, #tpu.memory_space<vmem>>, vector<256x128xf32>
    %41 = arith.truncf %40 : vector<256x128xf32> to vector<256x128xbf16>
    %c1 = arith.constant 1 : index
    %c0_21 = arith.constant 0 : index
    %c0_22 = arith.constant 0 : index
    %42 = vector.load %arg2[%c1, %c0_21, %c0_22] : memref<18x128x128xbf16, #tpu.memory_space<vmem>>, vector<1x128x128xbf16>
    %43 = vector.shape_cast %42 : vector<1x128x128xbf16> to vector<128x128xbf16>
    %cst_23 = arith.constant dense<0.000000e+00> : vector<256x128xf32>
    %44 = tpu.matmul %41, %43, %cst_23 {dimension_numbers = #tpu.dot_dimension_numbers<[1], [0], [0], [1], [0, 0, 1, 1], [], []>} : vector<256x128xbf16>, vector<128x128xbf16>, vector<256x128xf32> -> vector<256x128xf32>
    %45 = arith.addf %39, %44 : vector<256x128xf32>
    %c9 = arith.constant 9 : index
    %c0_24 = arith.constant 0 : index
    %46 = vector.load %arg5[%c9, %c0_24] : memref<304x128xf32, #tpu.memory_space<vmem>>, vector<256x128xf32>
    %cst_25 = arith.constant 0.000000e+00 : f32
    %47 = vector.broadcast %cst_25 : f32 to vector<256x128xf32>
    %48 = arith.select %22, %46, %47 : vector<256x128xi1>, vector<256x128xf32>
    %49 = arith.truncf %48 : vector<256x128xf32> to vector<256x128xbf16>
    %c2 = arith.constant 2 : index
    %c0_26 = arith.constant 0 : index
    %c0_27 = arith.constant 0 : index
    %50 = vector.load %arg2[%c2, %c0_26, %c0_27] : memref<18x128x128xbf16, #tpu.memory_space<vmem>>, vector<1x128x128xbf16>
    %51 = vector.shape_cast %50 : vector<1x128x128xbf16> to vector<128x128xbf16>
    %cst_28 = arith.constant dense<0.000000e+00> : vector<256x128xf32>
    %52 = tpu.matmul %49, %51, %cst_28 {dimension_numbers = #tpu.dot_dimension_numbers<[1], [0], [0], [1], [0, 0, 1, 1], [], []>} : vector<256x128xbf16>, vector<128x128xbf16>, vector<256x128xf32> -> vector<256x128xf32>
    %53 = arith.addf %45, %52 : vector<256x128xf32>
    %c23 = arith.constant 23 : index
    %c0_29 = arith.constant 0 : index
    %54 = vector.load %arg5[%c23, %c0_29] : memref<304x128xf32, #tpu.memory_space<vmem>>, vector<256x128xf32>
    %cst_30 = arith.constant 0.000000e+00 : f32
    %55 = vector.broadcast %cst_30 : f32 to vector<256x128xf32>
    %56 = arith.select %20, %54, %55 : vector<256x128xi1>, vector<256x128xf32>
    %57 = arith.truncf %56 : vector<256x128xf32> to vector<256x128xbf16>
    %c3 = arith.constant 3 : index
    %c0_31 = arith.constant 0 : index
    %c0_32 = arith.constant 0 : index
    %58 = vector.load %arg2[%c3, %c0_31, %c0_32] : memref<18x128x128xbf16, #tpu.memory_space<vmem>>, vector<1x128x128xbf16>
    %59 = vector.shape_cast %58 : vector<1x128x128xbf16> to vector<128x128xbf16>
    %cst_33 = arith.constant dense<0.000000e+00> : vector<256x128xf32>
    %60 = tpu.matmul %57, %59, %cst_33 {dimension_numbers = #tpu.dot_dimension_numbers<[1], [0], [0], [1], [0, 0, 1, 1], [], []>} : vector<256x128xbf16>, vector<128x128xbf16>, vector<256x128xf32> -> vector<256x128xf32>
    %61 = arith.addf %53, %60 : vector<256x128xf32>
    %c24_34 = arith.constant 24 : index
    %c0_35 = arith.constant 0 : index
    %62 = vector.load %arg5[%c24_34, %c0_35] : memref<304x128xf32, #tpu.memory_space<vmem>>, vector<256x128xf32>
    %63 = arith.truncf %62 : vector<256x128xf32> to vector<256x128xbf16>
    %c4 = arith.constant 4 : index
    %c0_36 = arith.constant 0 : index
    %c0_37 = arith.constant 0 : index
    %64 = vector.load %arg2[%c4, %c0_36, %c0_37] : memref<18x128x128xbf16, #tpu.memory_space<vmem>>, vector<1x128x128xbf16>
    %65 = vector.shape_cast %64 : vector<1x128x128xbf16> to vector<128x128xbf16>
    %cst_38 = arith.constant dense<0.000000e+00> : vector<256x128xf32>
    %66 = tpu.matmul %63, %65, %cst_38 {dimension_numbers = #tpu.dot_dimension_numbers<[1], [0], [0], [1], [0, 0, 1, 1], [], []>} : vector<256x128xbf16>, vector<128x128xbf16>, vector<256x128xf32> -> vector<256x128xf32>
    %67 = arith.addf %61, %66 : vector<256x128xf32>
    %c25 = arith.constant 25 : index
    %c0_39 = arith.constant 0 : index
    %68 = vector.load %arg5[%c25, %c0_39] : memref<304x128xf32, #tpu.memory_space<vmem>>, vector<256x128xf32>
    %cst_40 = arith.constant 0.000000e+00 : f32
    %69 = vector.broadcast %cst_40 : f32 to vector<256x128xf32>
    %70 = arith.select %22, %68, %69 : vector<256x128xi1>, vector<256x128xf32>
    %71 = arith.truncf %70 : vector<256x128xf32> to vector<256x128xbf16>
    %c5 = arith.constant 5 : index
    %c0_41 = arith.constant 0 : index
    %c0_42 = arith.constant 0 : index
    %72 = vector.load %arg2[%c5, %c0_41, %c0_42] : memref<18x128x128xbf16, #tpu.memory_space<vmem>>, vector<1x128x128xbf16>
    %73 = vector.shape_cast %72 : vector<1x128x128xbf16> to vector<128x128xbf16>
    %cst_43 = arith.constant dense<0.000000e+00> : vector<256x128xf32>
    %74 = tpu.matmul %71, %73, %cst_43 {dimension_numbers = #tpu.dot_dimension_numbers<[1], [0], [0], [1], [0, 0, 1, 1], [], []>} : vector<256x128xbf16>, vector<128x128xbf16>, vector<256x128xf32> -> vector<256x128xf32>
    %75 = arith.addf %67, %74 : vector<256x128xf32>
    %c39 = arith.constant 39 : index
    %c0_44 = arith.constant 0 : index
    %76 = vector.load %arg5[%c39, %c0_44] : memref<304x128xf32, #tpu.memory_space<vmem>>, vector<256x128xf32>
    %cst_45 = arith.constant 0.000000e+00 : f32
    %77 = vector.broadcast %cst_45 : f32 to vector<256x128xf32>
    %78 = arith.select %20, %76, %77 : vector<256x128xi1>, vector<256x128xf32>
    %79 = arith.truncf %78 : vector<256x128xf32> to vector<256x128xbf16>
    %c6 = arith.constant 6 : index
    %c0_46 = arith.constant 0 : index
    %c0_47 = arith.constant 0 : index
    %80 = vector.load %arg2[%c6, %c0_46, %c0_47] : memref<18x128x128xbf16, #tpu.memory_space<vmem>>, vector<1x128x128xbf16>
    %81 = vector.shape_cast %80 : vector<1x128x128xbf16> to vector<128x128xbf16>
    %cst_48 = arith.constant dense<0.000000e+00> : vector<256x128xf32>
    %82 = tpu.matmul %79, %81, %cst_48 {dimension_numbers = #tpu.dot_dimension_numbers<[1], [0], [0], [1], [0, 0, 1, 1], [], []>} : vector<256x128xbf16>, vector<128x128xbf16>, vector<256x128xf32> -> vector<256x128xf32>
    %83 = arith.addf %75, %82 : vector<256x128xf32>
    %c40 = arith.constant 40 : index
    %c0_49 = arith.constant 0 : index
    %84 = vector.load %arg5[%c40, %c0_49] : memref<304x128xf32, #tpu.memory_space<vmem>>, vector<256x128xf32>
    %85 = arith.truncf %84 : vector<256x128xf32> to vector<256x128xbf16>
    %c7_50 = arith.constant 7 : index
    %c0_51 = arith.constant 0 : index
    %c0_52 = arith.constant 0 : index
    %86 = vector.load %arg2[%c7_50, %c0_51, %c0_52] : memref<18x128x128xbf16, #tpu.memory_space<vmem>>, vector<1x128x128xbf16>
    %87 = vector.shape_cast %86 : vector<1x128x128xbf16> to vector<128x128xbf16>
    %cst_53 = arith.constant dense<0.000000e+00> : vector<256x128xf32>
    %88 = tpu.matmul %85, %87, %cst_53 {dimension_numbers = #tpu.dot_dimension_numbers<[1], [0], [0], [1], [0, 0, 1, 1], [], []>} : vector<256x128xbf16>, vector<128x128xbf16>, vector<256x128xf32> -> vector<256x128xf32>
    %89 = arith.addf %83, %88 : vector<256x128xf32>
    %c41 = arith.constant 41 : index
    %c0_54 = arith.constant 0 : index
    %90 = vector.load %arg5[%c41, %c0_54] : memref<304x128xf32, #tpu.memory_space<vmem>>, vector<256x128xf32>
    %cst_55 = arith.constant 0.000000e+00 : f32
    %91 = vector.broadcast %cst_55 : f32 to vector<256x128xf32>
    %92 = arith.select %22, %90, %91 : vector<256x128xi1>, vector<256x128xf32>
    %93 = arith.truncf %92 : vector<256x128xf32> to vector<256x128xbf16>
    %c8_56 = arith.constant 8 : index
    %c0_57 = arith.constant 0 : index
    %c0_58 = arith.constant 0 : index
    %94 = vector.load %arg2[%c8_56, %c0_57, %c0_58] : memref<18x128x128xbf16, #tpu.memory_space<vmem>>, vector<1x128x128xbf16>
    %95 = vector.shape_cast %94 : vector<1x128x128xbf16> to vector<128x128xbf16>
    %cst_59 = arith.constant dense<0.000000e+00> : vector<256x128xf32>
    %96 = tpu.matmul %93, %95, %cst_59 {dimension_numbers = #tpu.dot_dimension_numbers<[1], [0], [0], [1], [0, 0, 1, 1], [], []>} : vector<256x128xbf16>, vector<128x128xbf16>, vector<256x128xf32> -> vector<256x128xf32>
    %97 = arith.addf %89, %96 : vector<256x128xf32>
    %cst_60 = arith.constant 0.000000e+00 : f32
    %98 = vector.broadcast %cst_60 : f32 to vector<256x128xf32>
    %99 = arith.maximumf %97, %98 : vector<256x128xf32>
    %c24_61 = arith.constant 24 : index
    %c0_62 = arith.constant 0 : index
    %100 = vector.load %arg5[%c24_61, %c0_62] : memref<304x128xf32, #tpu.memory_space<vmem>>, vector<256x128xf32>
    tpu.vector_store %arg5[%c24_61, %c0_62], %99 {strides = array<i32>} : memref<304x128xf32, #tpu.memory_space<vmem>>, vector<256x128xf32>,
    %c1_63 = arith.constant 1 : index
    %c0_64 = arith.constant 0 : index
    %c0_65 = arith.constant 0 : index
    %101 = vector.load %arg3[%c1_63, %c0_64, %c0_65] : memref<2x1x128xf32, #tpu.memory_space<vmem>>, vector<1x1x128xf32>
    %102 = vector.shape_cast %101 : vector<1x1x128xf32> to vector<1x128xf32>
    %103 = vector.shape_cast %102 : vector<1x128xf32> to vector<1x128xf32>
    %104 = vector.broadcast %103 : vector<1x128xf32> to vector<256x128xf32>
    %c7_66 = arith.constant 7 : index
    %c0_67 = arith.constant 0 : index
    %105 = vector.load %arg5[%c7_66, %c0_67] : memref<304x128xf32, #tpu.memory_space<vmem>>, vector<256x128xf32>
    %cst_68 = arith.constant 0.000000e+00 : f32
    %106 = vector.broadcast %cst_68 : f32 to vector<256x128xf32>
    %107 = arith.select %20, %105, %106 : vector<256x128xi1>, vector<256x128xf32>
    %108 = arith.truncf %107 : vector<256x128xf32> to vector<256x128xbf16>
    %c9_69 = arith.constant 9 : index
    %c0_70 = arith.constant 0 : index
    %c0_71 = arith.constant 0 : index
    %109 = vector.load %arg2[%c9_69, %c0_70, %c0_71] : memref<18x128x128xbf16, #tpu.memory_space<vmem>>, vector<1x128x128xbf16>
    %110 = vector.shape_cast %109 : vector<1x128x128xbf16> to vector<128x128xbf16>
    %cst_72 = arith.constant dense<0.000000e+00> : vector<256x128xf32>
    %111 = tpu.matmul %108, %110, %cst_72 {dimension_numbers = #tpu.dot_dimension_numbers<[1], [0], [0], [1], [0, 0, 1, 1], [], []>} : vector<256x128xbf16>, vector<128x128xbf16>, vector<256x128xf32> -> vector<256x128xf32>
    %112 = arith.addf %104, %111 : vector<256x128xf32>
    %c8_73 = arith.constant 8 : index
    %c0_74 = arith.constant 0 : index
    %113 = vector.load %arg5[%c8_73, %c0_74] : memref<304x128xf32, #tpu.memory_space<vmem>>, vector<256x128xf32>
    %114 = arith.truncf %113 : vector<256x128xf32> to vector<256x128xbf16>
    %c10 = arith.constant 10 : index
    %c0_75 = arith.constant 0 : index
    %c0_76 = arith.constant 0 : index
    %115 = vector.load %arg2[%c10, %c0_75, %c0_76] : memref<18x128x128xbf16, #tpu.memory_space<vmem>>, vector<1x128x128xbf16>
    %116 = vector.shape_cast %115 : vector<1x128x128xbf16> to vector<128x128xbf16>
    %cst_77 = arith.constant dense<0.000000e+00> : vector<256x128xf32>
    %117 = tpu.matmul %114, %116, %cst_77 {dimension_numbers = #tpu.dot_dimension_numbers<[1], [0], [0], [1], [0, 0, 1, 1], [], []>} : vector<256x128xbf16>, vector<128x128xbf16>, vector<256x128xf32> -> vector<256x128xf32>
    %118 = arith.addf %112, %117 : vector<256x128xf32>
    %c9_78 = arith.constant 9 : index
    %c0_79 = arith.constant 0 : index
    %119 = vector.load %arg5[%c9_78, %c0_79] : memref<304x128xf32, #tpu.memory_space<vmem>>, vector<256x128xf32>
    %cst_80 = arith.constant 0.000000e+00 : f32
    %120 = vector.broadcast %cst_80 : f32 to vector<256x128xf32>
    %121 = arith.select %22, %119, %120 : vector<256x128xi1>, vector<256x128xf32>
    %122 = arith.truncf %121 : vector<256x128xf32> to vector<256x128xbf16>
    %c11 = arith.constant 11 : index
    %c0_81 = arith.constant 0 : index
    %c0_82 = arith.constant 0 : index
    %123 = vector.load %arg2[%c11, %c0_81, %c0_82] : memref<18x128x128xbf16, #tpu.memory_space<vmem>>, vector<1x128x128xbf16>
    %124 = vector.shape_cast %123 : vector<1x128x128xbf16> to vector<128x128xbf16>
    %cst_83 = arith.constant dense<0.000000e+00> : vector<256x128xf32>
    %125 = tpu.matmul %122, %124, %cst_83 {dimension_numbers = #tpu.dot_dimension_numbers<[1], [0], [0], [1], [0, 0, 1, 1], [], []>} : vector<256x128xbf16>, vector<128x128xbf16>, vector<256x128xf32> -> vector<256x128xf32>
    %126 = arith.addf %118, %125 : vector<256x128xf32>
    %c23_84 = arith.constant 23 : index
    %c0_85 = arith.constant 0 : index
    %127 = vector.load %arg5[%c23_84, %c0_85] : memref<304x128xf32, #tpu.memory_space<vmem>>, vector<256x128xf32>
    %cst_86 = arith.constant 0.000000e+00 : f32
    %128 = vector.broadcast %cst_86 : f32 to vector<256x128xf32>
    %129 = arith.select %20, %127, %128 : vector<256x128xi1>, vector<256x128xf32>
    %130 = arith.truncf %129 : vector<256x128xf32> to vector<256x128xbf16>
    %c12 = arith.constant 12 : index
    %c0_87 = arith.constant 0 : index
    %c0_88 = arith.constant 0 : index
    %131 = vector.load %arg2[%c12, %c0_87, %c0_88] : memref<18x128x128xbf16, #tpu.memory_space<vmem>>, vector<1x128x128xbf16>
    %132 = vector.shape_cast %131 : vector<1x128x128xbf16> to vector<128x128xbf16>
    %cst_89 = arith.constant dense<0.000000e+00> : vector<256x128xf32>
    %133 = tpu.matmul %130, %132, %cst_89 {dimension_numbers = #tpu.dot_dimension_numbers<[1], [0], [0], [1], [0, 0, 1, 1], [], []>} : vector<256x128xbf16>, vector<128x128xbf16>, vector<256x128xf32> -> vector<256x128xf32>
    %134 = arith.addf %126, %133 : vector<256x128xf32>
    %c24_90 = arith.constant 24 : index
    %c0_91 = arith.constant 0 : index
    %135 = vector.load %arg5[%c24_90, %c0_91] : memref<304x128xf32, #tpu.memory_space<vmem>>, vector<256x128xf32>
    %136 = arith.truncf %135 : vector<256x128xf32> to vector<256x128xbf16>
    %c13 = arith.constant 13 : index
    %c0_92 = arith.constant 0 : index
    %c0_93 = arith.constant 0 : index
    %137 = vector.load %arg2[%c13, %c0_92, %c0_93] : memref<18x128x128xbf16, #tpu.memory_space<vmem>>, vector<1x128x128xbf16>
    %138 = vector.shape_cast %137 : vector<1x128x128xbf16> to vector<128x128xbf16>
    %cst_94 = arith.constant dense<0.000000e+00> : vector<256x128xf32>
    %139 = tpu.matmul %136, %138, %cst_94 {dimension_numbers = #tpu.dot_dimension_numbers<[1], [0], [0], [1], [0, 0, 1, 1], [], []>} : vector<256x128xbf16>, vector<128x128xbf16>, vector<256x128xf32> -> vector<256x128xf32>
    %140 = arith.addf %134, %139 : vector<256x128xf32>
    %c25_95 = arith.constant 25 : index
    %c0_96 = arith.constant 0 : index
    %141 = vector.load %arg5[%c25_95, %c0_96] : memref<304x128xf32, #tpu.memory_space<vmem>>, vector<256x128xf32>
    %cst_97 = arith.constant 0.000000e+00 : f32
    %142 = vector.broadcast %cst_97 : f32 to vector<256x128xf32>
    %143 = arith.select %22, %141, %142 : vector<256x128xi1>, vector<256x128xf32>
    %144 = arith.truncf %143 : vector<256x128xf32> to vector<256x128xbf16>
    %c14 = arith.constant 14 : index
    %c0_98 = arith.constant 0 : index
    %c0_99 = arith.constant 0 : index
    %145 = vector.load %arg2[%c14, %c0_98, %c0_99] : memref<18x128x128xbf16, #tpu.memory_space<vmem>>, vector<1x128x128xbf16>
    %146 = vector.shape_cast %145 : vector<1x128x128xbf16> to vector<128x128xbf16>
    %cst_100 = arith.constant dense<0.000000e+00> : vector<256x128xf32>
    %147 = tpu.matmul %144, %146, %cst_100 {dimension_numbers = #tpu.dot_dimension_numbers<[1], [0], [0], [1], [0, 0, 1, 1], [], []>} : vector<256x128xbf16>, vector<128x128xbf16>, vector<256x128xf32> -> vector<256x128xf32>
    %148 = arith.addf %140, %147 : vector<256x128xf32>
    %c39_101 = arith.constant 39 : index
    %c0_102 = arith.constant 0 : index
    %149 = vector.load %arg5[%c39_101, %c0_102] : memref<304x128xf32, #tpu.memory_space<vmem>>, vector<256x128xf32>
    %cst_103 = arith.constant 0.000000e+00 : f32
    %150 = vector.broadcast %cst_103 : f32 to vector<256x128xf32>
    %151 = arith.select %20, %149, %150 : vector<256x128xi1>, vector<256x128xf32>
    %152 = arith.truncf %151 : vector<256x128xf32> to vector<256x128xbf16>
    %c15 = arith.constant 15 : index
    %c0_104 = arith.constant 0 : index
    %c0_105 = arith.constant 0 : index
    %153 = vector.load %arg2[%c15, %c0_104, %c0_105] : memref<18x128x128xbf16, #tpu.memory_space<vmem>>, vector<1x128x128xbf16>
    %154 = vector.shape_cast %153 : vector<1x128x128xbf16> to vector<128x128xbf16>
    %cst_106 = arith.constant dense<0.000000e+00> : vector<256x128xf32>
    %155 = tpu.matmul %152, %154, %cst_106 {dimension_numbers = #tpu.dot_dimension_numbers<[1], [0], [0], [1], [0, 0, 1, 1], [], []>} : vector<256x128xbf16>, vector<128x128xbf16>, vector<256x128xf32> -> vector<256x128xf32>
    %156 = arith.addf %148, %155 : vector<256x128xf32>
    %c40_107 = arith.constant 40 : index
    %c0_108 = arith.constant 0 : index
    %157 = vector.load %arg5[%c40_107, %c0_108] : memref<304x128xf32, #tpu.memory_space<vmem>>, vector<256x128xf32>
    %158 = arith.truncf %157 : vector<256x128xf32> to vector<256x128xbf16>
    %c16 = arith.constant 16 : index
    %c0_109 = arith.constant 0 : index
    %c0_110 = arith.constant 0 : index
    %159 = vector.load %arg2[%c16, %c0_109, %c0_110] : memref<18x128x128xbf16, #tpu.memory_space<vmem>>, vector<1x128x128xbf16>
    %160 = vector.shape_cast %159 : vector<1x128x128xbf16> to vector<128x128xbf16>
    %cst_111 = arith.constant dense<0.000000e+00> : vector<256x128xf32>
    %161 = tpu.matmul %158, %160, %cst_111 {dimension_numbers = #tpu.dot_dimension_numbers<[1], [0], [0], [1], [0, 0, 1, 1], [], []>} : vector<256x128xbf16>, vector<128x128xbf16>, vector<256x128xf32> -> vector<256x128xf32>
    %162 = arith.addf %156, %161 : vector<256x128xf32>
    %c41_112 = arith.constant 41 : index
    %c0_113 = arith.constant 0 : index
    %163 = vector.load %arg5[%c41_112, %c0_113] : memref<304x128xf32, #tpu.memory_space<vmem>>, vector<256x128xf32>
    %cst_114 = arith.constant 0.000000e+00 : f32
    %164 = vector.broadcast %cst_114 : f32 to vector<256x128xf32>
    %165 = arith.select %22, %163, %164 : vector<256x128xi1>, vector<256x128xf32>
    %166 = arith.truncf %165 : vector<256x128xf32> to vector<256x128xbf16>
    %c17 = arith.constant 17 : index
    %c0_115 = arith.constant 0 : index
    %c0_116 = arith.constant 0 : index
    %167 = vector.load %arg2[%c17, %c0_115, %c0_116] : memref<18x128x128xbf16, #tpu.memory_space<vmem>>, vector<1x128x128xbf16>
    %168 = vector.shape_cast %167 : vector<1x128x128xbf16> to vector<128x128xbf16>
    %cst_117 = arith.constant dense<0.000000e+00> : vector<256x128xf32>
    %169 = tpu.matmul %166, %168, %cst_117 {dimension_numbers = #tpu.dot_dimension_numbers<[1], [0], [0], [1], [0, 0, 1, 1], [], []>} : vector<256x128xbf16>, vector<128x128xbf16>, vector<256x128xf32> -> vector<256x128xf32>
    %170 = arith.addf %162, %169 : vector<256x128xf32>
    %cst_118 = arith.constant 0.000000e+00 : f32
    %171 = vector.broadcast %cst_118 : f32 to vector<256x128xf32>
    %172 = arith.maximumf %170, %171 : vector<256x128xf32>
    %173 = arith.addf %172, %1 : vector<256x128xf32>
    %c0_119 = arith.constant 0 : index
    %c0_120 = arith.constant 0 : index
    %c0_121 = arith.constant 0 : index
    %174 = vector.load %arg4[%c0_119, %c0_120, %c0_121] : memref<1x256x128xf32, #tpu.memory_space<vmem>>, vector<1x256x128xf32>
    %175 = vector.shape_cast %174 : vector<1x256x128xf32> to vector<256x128xf32>
    %176 = vector.shape_cast %173 : vector<256x128xf32> to vector<1x256x128xf32>
    tpu.vector_store %arg4[%c0_119, %c0_120, %c0_121], %176 {strides = array<i32>} : memref<1x256x128xf32, #tpu.memory_space<vmem>>, vector<1x256x128xf32>,
    return
  }
  func.func @transform_0(%arg0: i32) -> (i32, i32, i32) {
    %c0_i32 = arith.constant 0 : i32
    %c0_i32_0 = arith.constant 0 : i32
    %c0_i32_1 = arith.constant 0 : i32
    return %arg0, %c0_i32, %c0_i32_0 : i32, i32, i32
  }
  func.func @transform_1(%arg0: i32) -> (i32, i32, i32) {
    %c0_i32 = arith.constant 0 : i32
    %c0_i32_0 = arith.constant 0 : i32
    %c0_i32_1 = arith.constant 0 : i32
    %c0_i32_2 = arith.constant 0 : i32
    return %c0_i32, %c0_i32_0, %c0_i32_1 : i32, i32, i32
  }
  func.func @transform_2(%arg0: i32) -> (i32, i32, i32) {
    %c0_i32 = arith.constant 0 : i32
    %c0_i32_0 = arith.constant 0 : i32
    %c0_i32_1 = arith.constant 0 : i32
    %c0_i32_2 = arith.constant 0 : i32
    return %c0_i32, %c0_i32_0, %c0_i32_1 : i32, i32, i32
  }
  func.func @transform_3(%arg0: i32) -> (i32, i32, i32) {
    %c0_i32 = arith.constant 0 : i32
    %c0_i32_0 = arith.constant 0 : i32
    %c0_i32_1 = arith.constant 0 : i32
    return %arg0, %c0_i32, %c0_i32_0 : i32, i32, i32
  }
}

</mosaic_0001>

<bundles_post_ra>
// kernel: c2f_forward.1
= control target key start
LH: loop header
LB: loop body
LE: loop exit
PB: predicated region body
PF: predicated region fallthrough
CT: control target
= control target key end

     0   :  { %s9912_s12 = smov 0   ;;  %s11658_s0 = inlined_call_operand.vmem [shape: f32[2,256,128], index: 0, kind: input, shape index: {}]   ;;  %s11659_s1 = inlined_call_operand.vmem [shape: bf16[18,128,128], index: 1, kind: input, shape index: {}]   ;;  %s11660_s2 = inlined_call_operand.vmem [shape: f32[2,1,128], index: 2, kind: input, shape index: {}]   ;;  %s11661_s3 = inlined_call_operand.vmem [shape: f32[2,256,128], index: 3, kind: output, shape index: {}]  }
   0x1 LB: > { %s6844_s13 = sadd.s32 4294967295, %s9887_s12   ;;  %p6848_p0 = scmp.ge.s32.totalorder %s9887_s12, 1  ;;  %s9887_s12 = sphi %s9912_s12, %s13_s12  }
   0x2   : > { %p137_p1 = scmp.lt.s32.totalorder %s9887_s12, 3 }
   0x4   : > { %p138_p2 = pnand %p6848_p0, %p137_p1 }
   0x6   : > { %141 = sbr.rel (%p138_p2) target bundleno = 1577 (0x629), region = 32 }
   0xd   : > { %v9734_v0 = vld [vmem:[%s11659_s1] sm:$0xff]   ;;  %v204_v1 = vlaneseq  ;;  %v9735_v2 = vld [vmem:[%s11659_s1 + $0x8] sm:$0xff]   ;;  %v9889_v3 = vmov 0.0   ;;  %p161_p3 = scmp.lt.s32.totalorder %s6844_s13, 1  ;;  %v9736_v5 = vld [vmem:[%s11659_s1 + $0x10] sm:$0xff]   ;;  %vm9890_vm1 = vmmov 1  }
   0xe   : > { %685 = vst [vmem:[#allocation2] sm:$0xff] %v9889_v3  ;;  %686 = vst [vmem:[#allocation2 + $0x8] sm:$0xff] %v9889_v3  ;;  %8284 = vmatprep.subr.bf16.mxu0 %v9734_v0  ;;  %v9737_v7 = vld [vmem:[%s11659_s1 + $0x18] sm:$0xff]   ;;  %v11807_v10 = vmov 0  ;;  %v9738_v18 = vld [vmem:[%s11659_s1 + $0x20] sm:$0xff]   ;;  %v11831_v50 = vmov 0 }
   0xf   : > { %687 = vst [vmem:[#allocation2 + $0x10] sm:$0xff] %v9889_v3  ;;  %688 = vst [vmem:[#allocation2 + $0x118] sm:$0xff] %v9889_v3  ;;  %v9926_v4 = vshrl.u32 %v204_v1, 7  ;;  %8285 = vmatpush3.bf16.msra.mxu0 %v9734_v0  ;;  %s12088_s13 = smov (!%p161_p3, %s6844_s13), 1  ;;  %v9739_v23 = vld [vmem:[%s11659_s1 + $0x28] sm:$0xff]   ;;  %v9740_v26 = vld [vmem:[%s11659_s1 + $0x30] sm:$0xff]  }
  0x10   : > { %689 = vst [vmem:[#allocation2 + $0x120] sm:$0xff] %v9889_v3  ;;  %690 = vst [vmem:[#allocation2 + $0x128] sm:$0xff] %v9889_v3  ;;  %8286 = vmatprep.subr.bf16.mxu0 %v9735_v2  ;;  %s7850_s22 = sshll.u32 %s12088_s13, 8  ;;  %v9741_v32 = vld [vmem:[%s11659_s1 + $0x38] sm:$0xff]   ;;  %v9742_v43 = vld [vmem:[%s11659_s1 + $0x40] sm:$0xff]   ;;  %v11835_v55 = vmov 0 }
  0x11   : > { %v241_v6 = vand.u32 15, %v9926_v4  ;;  %s9948_s25 = scalar_lea.vmem %s11658_s0, %s7850_s22  ;;  %v207_v27 = vadd.s32 16, %v9926_v4  ;;  %v209_v30 = vadd.s32 32, %v9926_v4  ;;  %v211_v40 = vadd.s32 48, %v9926_v4  ;;  %v9743_v56 = vld [vmem:[%s11659_s1 + $0x48] sm:$0xff]   ;;  %v9744_v60 = vld [vmem:[%s11659_s1 + $0x50] sm:$0xff]   ;;  %s11560_s24 = scalar_lea.vmem %s11661_s3, %s7850_s22 }
  0x12   : > { %v9951_v12 = vld [vmem:[%s9948_s25] sm:$0xff]  ;;  %v9954_v13 = vld [vmem:[%s9948_s25 + $0x8] sm:$0xff]  ;;  %v9959_v14 = vld [vmem:[%s9948_s25 + $0x10] sm:$0xff]  ;;  %v213_v46 = vadd.s32 64, %v9926_v4  ;;  %v215_v0 = vadd.s32 80, %v9926_v4 }
  0x13   : > { %vm621_vm0 = vcmp.ge.s32.totalorder %v241_v6, 1  ;;  %8287 = vmatpush3.bf16.msra.mxu0 %v9735_v2  ;;  %11809 = vst [vmem:[#allocation3_spill] sm:$0xff] %v9951_v12  ;;  %11810 = vst [vmem:[#allocation4_spill] sm:$0xff] %v9954_v13  ;;  %v9964_v15 = vld [vmem:[%s9948_s25 + $0x18] sm:$0xff]  ;;  %v9968_v16 = vld [vmem:[%s9948_s25 + $0x20] sm:$0xff]  ;;  %v255_v33 = vand.u32 15, %v207_v27 }
  0x14   : > { %8288 = vmatprep.subr.bf16.mxu0 %v9736_v5  ;;  %vm9939_vm2 = vmpackc.low %vm9890_vm1, %vm621_vm0  ;;  %691 = vst [vmem:[#allocation2 + $0x18] sm:$0xff] %v9951_v12  ;;  %v9971_v17 = vld [vmem:[%s9948_s25 + $0x28] sm:$0xff]  ;;  %v9980_v19 = vld [vmem:[%s9948_s25 + $0x30] sm:$0xff]  ;;  %v269_v36 = vand.u32 15, %v209_v30  ;;  %v283_v52 = vand.u32 15, %v211_v40  ;;  %v297_v57 = vand.u32 15, %v213_v46 }
  0x15   : > { %v730_v8 = vld [vmem:[#allocation2 + $0x7] sm:$0xff]  ;;  %v11808_v10 = vsel %vm9939_vm2, 4294967295, %v11807_v10  ;;  %692 = vst [vmem:[#allocation2 + $0x20] sm:$0xff] %v9954_v13  ;;  %11811 = vst [vmem:[#allocation5_spill] sm:$0xff] %v9959_v14  ;;  %v9983_v20 = vld [vmem:[%s9948_s25 + $0x38] sm:$0xff]  ;;  %vm623_vm3 = vcmp.ge.s32.totalorder %v255_v33, 1 }
  0x16   : > { %v731_v9 = vld [vmem:[#allocation2 + $0xf] sm:$0xff]  ;;  %11812 = vst [vmem:[#allocation6_spill] sm:$0xff] %v9964_v15  ;;  %693 = vst [vmem:[#allocation2 + $0x28] sm:$0xff] %v9959_v14  ;;  %v9987_v21 = vld [vmem:[%s9948_s25 + $0x40] sm:$0xff]  ;;  %vm625_vm4 = vcmp.ge.s32.totalorder %v269_v36, 1  ;;  %vm627_vm7 = vcmp.ge.s32.totalorder %v283_v52, 1 }
  0x17   : > { %v6863_v11 = vpack.c.bf16 %v731_v9, %v730_v8  ;;  %8289 = vmatpush3.bf16.msra.mxu0 %v9736_v5  ;;  %11813 = vst [vmem:[#allocation7_spill] sm:$0xff] %v9968_v16  ;;  %11814 = vst [vmem:[#allocation8_spill] sm:$0xff] %v9971_v17  ;;  %v9991_v22 = vld [vmem:[%s9948_s25 + $0x48] sm:$0xff]  ;;  %v9999_v24 = vld [vmem:[%s9948_s25 + $0x50] sm:$0xff]  ;;  %vm629_vm8 = vcmp.ge.s32.totalorder %v297_v57, 1  ;;  %v217_v2 = vadd.s32 96, %v9926_v4 }
  0x18   : > { %8290 = vmatprep.subr.bf16.mxu0 %v9737_v7  ;;  %694 = vst [vmem:[#allocation2 + $0x30] sm:$0xff] %v9964_v15  ;;  %695 = vst [vmem:[#allocation2 + $0x38] sm:$0xff] %v9968_v16  ;;  %v10002_v25 = vld [vmem:[%s9948_s25 + $0x58] sm:$0xff]  ;;  %v10011_v28 = vld [vmem:[%s9948_s25 + $0x60] sm:$0xff]  ;;  %v221_v40 = vadd.s32 128, %v9926_v4 }
  0x19   : > { %8300 = vmatprep.mubr.msk.bf16.mxu0 %vm9939_vm2, %v6863_v11  ;;  %696 = vst [vmem:[#allocation2 + $0x40] sm:$0xff] %v9971_v17  ;;  %11815 = vst [vmem:[#allocation9_spill] sm:$0xff] %v9980_v19  ;;  %v10014_v29 = vld [vmem:[%s9948_s25 + $0x68] sm:$0xff]  ;;  %v10020_v31 = vld [vmem:[%s9948_s25 + $0x70] sm:$0xff]  ;;  %v11845_v11 = vmov 0 }
  0x1a   : > { %11816 = vst [vmem:[#allocation10_spill] sm:$0xff] %v9983_v20  ;;  %697 = vst [vmem:[#allocation2 + $0x48] sm:$0xff] %v9980_v19  ;;  %v10026_v34 = vld [vmem:[%s9948_s25 + $0x78] sm:$0xff]  ;;  %v10030_v35 = vld [vmem:[%s9948_s25 + $0x80] sm:$0xff]  ;;  %v353_v57 = vand.u32 15, %v221_v40  ;;  %v227_v40 = vadd.s32 176, %v9926_v4 }
  0x1b   : > { %11817 = vst [vmem:[#allocation11_spill] sm:$0xff] %v9987_v21  ;;  %8291 = vmatpush3.bf16.msra.mxu0 %v9737_v7  ;;  %698 = vst [vmem:[#allocation2 + $0x50] sm:$0xff] %v9983_v20  ;;  %v10034_v37 = vld [vmem:[%s9948_s25 + $0x88] sm:$0xff]  ;;  %v732_v38 = vld [vmem:[#allocation2 + $0x17] sm:$0xff]  ;;  %v11842_v7 = vmov 0 }
  0x1c   : > { %11818 = vst [vmem:[#allocation12_spill] sm:$0xff] %v9991_v22  ;;  %699 = vst [vmem:[#allocation2 + $0x58] sm:$0xff] %v9987_v21  ;;  %8292 = vmatprep.subr.bf16.mxu0 %v9738_v18  ;;  %v733_v39 = vld [vmem:[#allocation2 + $0x1f] sm:$0xff]  ;;  %v10040_v41 = vld [vmem:[%s9948_s25 + $0x90] sm:$0xff]  ;;  %vm637_vm0 = vcmp.ge.s32.totalorder %v353_v57, 1  ;;  %v229_v57 = vadd.s32 192, %v9926_v4 }
  0x1d   : > { %700 = vst [vmem:[#allocation2 + $0x60] sm:$0xff] %v9991_v22  ;;  %11819 = vst [vmem:[#allocation13_spill] sm:$0xff] %v9999_v24  ;;  %v10043_v42 = vld [vmem:[%s9948_s25 + $0x98] sm:$0xff]  ;;  %v734_v44 = vld [vmem:[#allocation2 + $0x27] sm:$0xff]  ;;  %v10057_v49 = vpack.c.bf16 %v733_v39, %v732_v38  ;;  %v219_v38 = vadd.s32 112, %v9926_v4 }
  0x1e   : > { %11820 = vst [vmem:[#allocation14_spill] sm:$0xff] %v10002_v25  ;;  %701 = vst [vmem:[#allocation2 + $0x68] sm:$0xff] %v9999_v24  ;;  %v10052_v47 = vld [vmem:[%s9948_s25 + $0xa0] sm:$0xff]  ;;  %v10055_v48 = vld [vmem:[%s9948_s25 + $0xa8] sm:$0xff] }
  0x1f   : > { %8293 = vmatpush3.bf16.msra.mxu0 %v9738_v18  ;;  %702 = vst [vmem:[#allocation2 + $0x70] sm:$0xff] %v10002_v25  ;;  %11821 = vst [vmem:[#allocation15_spill] sm:$0xff] %v10011_v28  ;;  %v735_v45 = vld [vmem:[#allocation2 + $0x2f] sm:$0xff]  ;;  %v10072_v54 = vld [vmem:[%s9948_s25 + $0xb8] sm:$0xff]  ;;  %v339_v52 = vand.u32 15, %v219_v38 }
  0x20   : > { %8294 = vmatprep.subr.bf16.mxu0 %v9739_v23  ;;  %11822 = vst [vmem:[#allocation16_spill] sm:$0xff] %v10014_v29  ;;  %703 = vst [vmem:[#allocation2 + $0x78] sm:$0xff] %v10011_v28  ;;  %v10066_v51 = vpack.c.bf16 %v735_v45, %v734_v44  ;;  %v10069_v53 = vld [vmem:[%s9948_s25 + $0xb0] sm:$0xff]  ;;  %v10085_v58 = vld [vmem:[%s9948_s25 + $0xc0] sm:$0xff]  ;;  %v11850_v45 = vmov 0 }
  0x21   : > { %704 = vst [vmem:[#allocation2 + $0x80] sm:$0xff] %v10014_v29  ;;  %11823 = vst [vmem:[#allocation17_spill] sm:$0xff] %v10020_v31  ;;  %v10088_v59 = vld [vmem:[%s9948_s25 + $0xc8] sm:$0xff]  ;;  %v736_v61 = vld [vmem:[#allocation2 + $0x37] sm:$0xff]  ;;  %vm635_vm15 = vcmp.ge.s32.totalorder %v339_v52, 1 }
  0x22   : > { %11824 = vst [vmem:[#allocation18_spill] sm:$0xff] %v10026_v34  ;;  %705 = vst [vmem:[#allocation2 + $0x88] sm:$0xff] %v10020_v31  ;;  %v737_v62 = vld [vmem:[#allocation2 + $0x3f] sm:$0xff]  ;;  %v738_v63 = vld [vmem:[#allocation2 + $0x47] sm:$0xff] }
  0x23   : > { %8295 = vmatpush3.bf16.msra.mxu0 %v9739_v23  ;;  %11825 = vst [vmem:[#allocation19_spill] sm:$0xff] %v10030_v35  ;;  %706 = vst [vmem:[#allocation2 + $0x90] sm:$0xff] %v10026_v34  ;;  %v739_v1 = vld [vmem:[#allocation2 + $0x4f] sm:$0xff]  ;;  %v10107_v5 = vld [vmem:[%s9948_s25 + $0xd8] sm:$0xff]  ;;  %v10119_v8 = vpack.c.bf16 %v737_v62, %v736_v61  ;;  %v311_v23 = vand.u32 15, %v215_v0  ;;  %v223_v0 = vadd.s32 144, %v9926_v4 }
  0x24   : > { %8296 = vmatprep.subr.bf16.mxu0 %v9740_v26  ;;  %11826 = vst [vmem:[#allocation20_spill] sm:$0xff] %v10034_v37  ;;  %707 = vst [vmem:[#allocation2 + $0x98] sm:$0xff] %v10030_v35  ;;  %v10104_v3 = vld [vmem:[%s9948_s25 + $0xd0] sm:$0xff]  ;;  %v10112_v6 = vld [vmem:[%s9948_s25 + $0xe0] sm:$0xff]  ;;  %v10130_v18 = vpack.c.bf16 %v739_v1, %v738_v63 }
  0x25   : > { %708 = vst [vmem:[#allocation2 + $0xa0] sm:$0xff] %v10034_v37  ;;  %11827 = vst [vmem:[#allocation21_spill] sm:$0xff] %v10040_v41  ;;  %v10122_v9 = vld [vmem:[%s9948_s25 + $0xe8] sm:$0xff]  ;;  %v9745_v27 = vld [vmem:[%s11659_s1 + $0x58] sm:$0xff]   ;;  %vm631_vm11 = vcmp.ge.s32.totalorder %v311_v23, 1 }
  0x26   : > { %11828 = vst [vmem:[#allocation22_spill] sm:$0xff] %v10043_v42  ;;  %709 = vst [vmem:[#allocation2 + $0xa8] sm:$0xff] %v10040_v41  ;;  %v740_v30 = vld [vmem:[#allocation2 + $0x57] sm:$0xff]  ;;  %v742_v33 = vld [vmem:[#allocation2 + $0x67] sm:$0xff] }
  0x27   : > { %8297 = vmatpush3.bf16.msra.mxu0 %v9740_v26  ;;  %710 = vst [vmem:[#allocation2 + $0xb0] sm:$0xff] %v10043_v42  ;;  %11829 = vst [vmem:[#allocation23_spill] sm:$0xff] %v10052_v47  ;;  %v325_v26 = vand.u32 15, %v217_v2  ;;  %v743_v36 = vld [vmem:[#allocation2 + $0x6f] sm:$0xff]  ;;  %v9746_v39 = vld [vmem:[%s11659_s1 + $0x60] sm:$0xff]   ;;  %v225_v2 = vadd.s32 160, %v9926_v4 }
  0x28   : > { %8298 = vmatprep.subr.bf16.mxu0 %v9741_v32  ;;  %11830 = vst [vmem:[#allocation24_spill] sm:$0xff] %v10055_v48  ;;  %711 = vst [vmem:[#allocation2 + $0xb8] sm:$0xff] %v10052_v47  ;;  %v10159_v46 = vpack.c.bf16 %v743_v36, %v742_v33  ;;  %v745_v61 = vld [vmem:[#allocation2 + $0x7f] sm:$0xff]  ;;  %v9748_v1 = vld [vmem:[%s11659_s1 + $0x70] sm:$0xff]  }
  0x29   : > { %712 = vst [vmem:[#allocation2 + $0xc0] sm:$0xff] %v10055_v48  ;;  %vm10062_vm5 = vmpackc.low %vm9890_vm1, %vm623_vm3  ;;  %vm633_vm12 = vcmp.ge.s32.totalorder %v325_v26, 1  ;;  %v746_v62 = vld [vmem:[#allocation2 + $0x87] sm:$0xff]  ;;  %v11853_v26 = vmov 0  ;;  %v9749_v33 = vld [vmem:[%s11659_s1 + $0x78] sm:$0xff]   ;;  %v381_v36 = vand.u32 15, %v225_v2 }
  0x2a   : > { %v11832_v50 = vsel %vm10062_vm5, 4294967295, %v11831_v50  ;;  %11833 = vst [vmem:[#allocation25_spill] sm:$0xff] %v10069_v53  ;;  %11834 = vst [vmem:[#allocation26_spill] sm:$0xff] %v10072_v54  ;;  %v747_v63 = vld [vmem:[#allocation2 + $0x8f] sm:$0xff]  ;;  %v409_v2 = vand.u32 15, %v229_v57 }
  0x2b   : > { %8299 = vmatpush3.bf16.msra.mxu0 %v9741_v32  ;;  %vm10075_vm6 = vmpackc.low %vm9890_vm1, %vm625_vm4  ;;  %713 = vst [vmem:[#allocation2 + $0xc8] sm:$0xff] %v10069_v53  ;;  %v741_v32 = vld [vmem:[#allocation2 + $0x5f] sm:$0xff]  ;;  %v748_v38 = vld [vmem:[#allocation2 + $0x97] sm:$0xff] }
  0x2c   : > { %8332 = vmatprep.subr.bf16.mxu0 %v9742_v43  ;;  %v11836_v55 = vsel %vm10075_vm6, 4294967295, %v11835_v55  ;;  %714 = vst [vmem:[#allocation2 + $0xd0] sm:$0xff] %v10072_v54  ;;  %11837 = vst [vmem:[#allocation27_spill] sm:$0xff] %v10085_v58  ;;  %v10152_v44 = vpack.c.bf16 %v741_v32, %v740_v30  ;;  %v11856_v30 = vmov 0  ;;  %v367_v32 = vand.u32 15, %v223_v0 }
  0x2d   : > { %11838 = vst [vmem:[#allocation28_spill] sm:$0xff] %v10088_v59  ;;  %715 = vst [vmem:[#allocation2 + $0xd8] sm:$0xff] %v10085_v58  ;;  %v750_v52 = vld [vmem:[#allocation2 + $0xa7] sm:$0xff]  ;;  %v395_v0 = vand.u32 15, %v227_v40  ;;  %v233_v40 = vadd.s32 224, %v9926_v4 }
  0x2e   : > { %8301 = vmatmul.mubr.msk.bf16.vlgmr.msra.gmra.mrb[0].mxu0 %vm10062_vm5, %v10057_v49  ;;  %716 = vst [vmem:[#allocation2 + $0xe0] sm:$0xff] %v10088_v59  ;;  %11839 = vst [vmem:[#allocation29_spill] sm:$0xff] %v10104_v3 }
  0x2f   : > { %8333 = vmatpush3.bf16.msra.mxu0 %v9742_v43  ;;  %8304 = vmatprep.mubr.msk.bf16.mxu0 %vm10075_vm6, %v10066_v51  ;;  %11840 = vst [vmem:[#allocation30_spill] sm:$0xff] %v10107_v5  ;;  %717 = vst [vmem:[#allocation2 + $0xe8] sm:$0xff] %v10104_v3  ;;  %v11847_v43 = vmov 0 }
  0x30   : > { %8334 = vmatprep.subr.bf16.mxu0 %v9743_v56  ;;  %718 = vst [vmem:[#allocation2 + $0xf0] sm:$0xff] %v10107_v5  ;;  %11841 = vst [vmem:[#allocation31_spill] sm:$0xff] %v10112_v6 }
  0x31   : > { %vm10115_vm9 = vmpackc.low %vm9890_vm1, %vm627_vm7  ;;  %11844 = vst [vmem:[#allocation32_spill] sm:$0xff] %v10122_v9  ;;  %vm639_vm7 = vcmp.ge.s32.totalorder %v367_v32, 1  ;;  %v752_v32 = vld [vmem:[#allocation2 + $0xb7] sm:$0xff] }
  0x32   : > { %v11843_v7 = vsel %vm10115_vm9, 4294967295, %v11842_v7  ;;  %719 = vst [vmem:[#allocation2 + $0xf8] sm:$0xff] %v10112_v6  ;;  %vm10126_vm10 = vmpackc.low %vm9890_vm1, %vm629_vm8  ;;  %vm641_vm8 = vcmp.ge.s32.totalorder %v381_v36, 1  ;;  %v753_v36 = vld [vmem:[#allocation2 + $0xbf] sm:$0xff] }
  0x33   : > { %8335 = vmatpush3.bf16.msra.mxu0 %v9743_v56  ;;  %v11846_v11 = vsel %vm10126_vm10, 4294967295, %v11845_v11  ;;  %720 = vst [vmem:[#allocation2 + $0x100] sm:$0xff] %v10122_v9  ;;  %vm10148_vm13 = vmpackc.low %vm9890_vm1, %vm631_vm11  ;;  %v9747_v56 = vld [vmem:[%s11659_s1 + $0x68] sm:$0xff]  }
  0x34   : > { %8336 = vmatprep.subr.bf16.mxu0 %v9744_v60  ;;  %v11848_v43 = vsel %vm10148_vm13, 4294967295, %v11847_v43  ;;  %vm10155_vm14 = vmpackc.low %vm9890_vm1, %vm633_vm12 }
  0x35   : > { %11849 = vst [vmem:[#allocation33_spill] sm:$0xff] %v11848_v43  ;;  %v11851_v45 = vsel %vm10155_vm14, 4294967295, %v11850_v45  ;;  %vm10178_vm3 = vmpackc.low %vm9890_vm1, %vm635_vm15  ;;  %vm643_vm15 = vcmp.ge.s32.totalorder %v395_v0, 1  ;;  %v11870_v0 = vmov 0 }
  0x36   : > { %8305 = vmatmul.mubr.msk.bf16.gmra.mrb[4].mxu0 %vm10115_vm9, %v10119_v8  ;;  %11852 = vst [vmem:[#allocation34_spill] sm:$0xff] %v11851_v45  ;;  %v11854_v26 = vsel %vm10178_vm3, 4294967295, %v11853_v26  ;;  %vm10185_vm4 = vmpackc.low %vm9890_vm1, %vm637_vm0  ;;  %vm645_vm0 = vcmp.ge.s32.totalorder %v409_v2, 1  ;;  %v756_v2 = vld [vmem:[#allocation2 + $0xd7] sm:$0xff] }
  0x37   : > { %8308 = vmatprep.mubr.msk.bf16.mxu0 %vm10126_vm10, %v10130_v18  ;;  %8337 = vmatpush3.bf16.msra.mxu0 %v9744_v60  ;;  %v744_v60 = vld [vmem:[#allocation2 + $0x77] sm:$0xff]  ;;  %11855 = vst [vmem:[#allocation35_spill] sm:$0xff] %v11854_v26  ;;  %v11857_v30 = vsel %vm10185_vm4, 4294967295, %v11856_v30  ;;  %vm10206_vm11 = vmpackc.low %vm9890_vm1, %vm639_vm7 }
  0x38   : > { %8338 = vmatprep.subr.bf16.mxu0 %v9745_v27  ;;  %v10175_v23 = vpack.c.bf16 %v745_v61, %v744_v60  ;;  %11858 = vst [vmem:[#allocation36_spill] sm:$0xff] %v11857_v30  ;;  %v9750_v60 = vld [vmem:[%s11659_s1 + $0x80] sm:$0xff]   ;;  %vm10213_vm12 = vmpackc.low %vm9890_vm1, %vm641_vm8 }
  0x39   : > { %vm10228_vm7 = vmpackc.low %vm9890_vm1, %vm643_vm15 }
  0x3a   : > { %vm10235_vm8 = vmpackc.low %vm9890_vm1, %vm645_vm0 }
  0x3b   : > { %8339 = vmatpush3.bf16.msra.mxu0 %v9745_v27  ;;  %v10182_v27 = vpack.c.bf16 %v747_v63, %v746_v62  ;;  %v11859_v62 = vmov 0  ;;  %v11871_v0 = vsel %vm10235_vm8, 4294967295, %v11870_v0 }
  0x3c   : > { %8340 = vmatprep.subr.bf16.mxu0 %v9746_v39  ;;  %v11860_v62 = vsel %vm10206_vm11, 4294967295, %v11859_v62  ;;  %11872 = vst [vmem:[#allocation42_spill] sm:$0xff] %v11871_v0  ;;  %v11876_v0 = vmov 0 }
  0x3d   : > { %11861 = vst [vmem:[#allocation37_spill] sm:$0xff] %v11860_v62  ;;  %v437_v62 = vand.u32 15, %v233_v40 }
  0x3e   : > { %8309 = vmatmul.mubr.msk.bf16.gmra.mrb[8].mxu0 %vm10148_vm13, %v10152_v44 }
  0x3f   : > { %8312 = vmatprep.mubr.msk.bf16.mxu0 %vm10155_vm14, %v10159_v46  ;;  %8341 = vmatpush3.bf16.msra.mxu0 %v9746_v39  ;;  %v749_v39 = vld [vmem:[#allocation2 + $0x9f] sm:$0xff]  ;;  %vm649_vm0 = vcmp.ge.s32.totalorder %v437_v62, 1  ;;  %v760_v62 = vld [vmem:[#allocation2 + $0xf7] sm:$0xff] }
  0x40   : > { %8342 = vmatprep.subr.bf16.mxu0 %v9747_v56  ;;  %v10203_v61 = vpack.c.bf16 %v749_v39, %v748_v38  ;;  %v754_v38 = vld [vmem:[#allocation2 + $0xc7] sm:$0xff]  ;;  %v755_v39 = vld [vmem:[#allocation2 + $0xcf] sm:$0xff] }
  0x41   : > { %v10232_v57 = vpack.c.bf16 %v755_v39, %v754_v38  ;;  %v235_v38 = vadd.s32 240, %v9926_v4  ;;  %v759_v39 = vld [vmem:[#allocation2 + $0xef] sm:$0xff] }
  0x43   : > { %8343 = vmatpush3.bf16.msra.mxu0 %v9747_v56  ;;  %v751_v56 = vld [vmem:[#allocation2 + $0xaf] sm:$0xff]  ;;  %11869 = vst [vmem:[#allocation41_spill] sm:$0xff] %v10232_v57 }
  0x44   : > { %8344 = vmatprep.subr.bf16.mxu0 %v9748_v1  ;;  %v10210_v63 = vpack.c.bf16 %v751_v56, %v750_v52  ;;  %v10225_v52 = vpack.c.bf16 %v753_v36, %v752_v32  ;;  %v11866_v56 = vmov 0  ;;  %v757_v32 = vld [vmem:[#allocation2 + $0xdf] sm:$0xff]  ;;  %v758_v36 = vld [vmem:[#allocation2 + $0xe7] sm:$0xff] }
  0x45   : > { %v11867_v56 = vsel %vm10228_vm7, 4294967295, %v11866_v56  ;;  %v10253_v40 = vpack.c.bf16 %v759_v39, %v758_v36  ;;  %v1100_v36 = vpack.c.bf16 %v9954_v13, %v9951_v12  ;;  %v9752_v39 = vld [vmem:[%s11659_s1 + $0x90] sm:$0xff]   ;;  %v11900_v13 = vmov 0 }
  0x46   : > { %8313 = vmatmul.mubr.msk.bf16.gmra.mrb[12].mxu0 %vm10178_vm3, %v10175_v23  ;;  %11862 = vst [vmem:[#allocation38_spill] sm:$0xff] %v10210_v63  ;;  %11868 = vst [vmem:[#allocation40_spill] sm:$0xff] %v11867_v56  ;;  %v202_v56 = vld [vmem:[%s9948_s25 + $0xf0] sm:$0xff] }
  0x47   : > { %8316 = vmatprep.mubr.msk.bf16.mxu0 %vm10185_vm4, %v10182_v27  ;;  %8345 = vmatpush3.bf16.msra.mxu0 %v9748_v1  ;;  %v11863_v1 = vmov 0  ;;  %721 = vst [vmem:[#allocation2 + $0x108] sm:$0xff] %v202_v56  ;;  %v9891_v56 = vmov 0.0|0.0  }
  0x48   : > { %8346 = vmatprep.subr.bf16.mxu0 %v9749_v33  ;;  %v11864_v1 = vsel %vm10213_vm12, 4294967295, %v11863_v1 }
  0x49   : > { %11865 = vst [vmem:[#allocation39_spill] sm:$0xff] %v11864_v1 }
  0x4b   : > { %8347 = vmatpush3.bf16.msra.mxu0 %v9749_v33  ;;  %v231_v33 = vadd.s32 208, %v9926_v4 }
  0x4c   : > { %8380 = vmatprep.subr.bf16.mxu0 %v9750_v60 }
  0x4d   : > { %v423_v1 = vand.u32 15, %v231_v33  ;;  %v11873_v33 = vmov 0 }
  0x4e   : > { %8317 = vmatmul.mubr.msk.bf16.gmra.mrb[16].mxu0 %vm10206_vm11, %v10203_v61 }
  0x4f   : > { %8320 = vmatprep.mubr.msk.bf16.mxu0 %vm10213_vm12, %v10210_v63  ;;  %vm647_vm15 = vcmp.ge.s32.totalorder %v423_v1, 1  ;;  %v10246_v63 = vpack.c.bf16 %v757_v32, %v756_v2  ;;  %v761_v1 = vld [vmem:[#allocation2 + $0xff] sm:$0xff]  ;;  %v11879_v32 = vmov 0 }
  0x50   : > { %vm10249_vm12 = vmpackc.low %vm9890_vm1, %vm647_vm15  ;;  %v10267_v2 = vpack.c.bf16 %v761_v1, %v760_v62  ;;  %v1102_v62 = vpack.c.bf16 %v9971_v17, %v9968_v16  ;;  %v9753_v1 = vld [vmem:[%s11659_s1 + $0x98] sm:$0xff]   ;;  %v11896_v17 = vmov 0  ;;  %v230_v16 = vadd.s32 200, %v9926_v4 }
  0x51   : > { %v11874_v33 = vsel %vm10249_vm12, 4294967295, %v11873_v33 }
  0x52   : > { %11875 = vst [vmem:[#allocation43_spill] sm:$0xff] %v11874_v33 }
  0x56   : > { %8321 = vmatmul.mubr.msk.bf16.gmra.mrb[20].mxu0 %vm10228_vm7, %v10225_v52  ;;  %vm10257_vm7 = vmpackc.low %vm9890_vm1, %vm649_vm0 }
  0x57   : > { %8324 = vmatprep.mubr.msk.bf16.mxu0 %vm10235_vm8, %v10232_v57  ;;  %v11877_v0 = vsel %vm10257_vm7, 4294967295, %v11876_v0  ;;  %v451_v57 = vand.u32 15, %v235_v38  ;;  %v1101_v38 = vpack.c.bf16 %v9964_v15, %v9959_v14 }
  0x58   : > { %11878 = vst [vmem:[#allocation44_spill] sm:$0xff] %v11877_v0 }
  0x59   : > { %vm651_vm15 = vcmp.ge.s32.totalorder %v451_v57, 1  ;;  %v9751_v57 = vld [vmem:[%s11659_s1 + $0x88] sm:$0xff]  }
  0x5a   : > { %vm10270_vm0 = vmpackc.low %vm9890_vm1, %vm651_vm15 }
  0x5b   : > { %v11880_v32 = vsel %vm10270_vm0, 4294967295, %v11879_v32 }
  0x5e   : > { %8325 = vmatmul.mubr.msk.bf16.gmra.mrb[24].mxu0 %vm10249_vm12, %v10246_v63 }
  0x5f   : > { %8328 = vmatprep.mubr.msk.bf16.mxu0 %vm10257_vm7, %v10253_v40 }
  0x66   : > { %8329 = vmatmul.mubr.msk.bf16.gmra.mrb[28].mxu0 %vm10270_vm0, %v10267_v2 }
  0x67   : > { %8348 = vmatprep.mubr.bf16.mxu0 %v9891_v56  ;;  %v1103_v56 = vpack.c.bf16 %v9983_v20, %v9980_v19 }
  0x6e   : > { %8349 = vmatmul.mubr.bf16.vlgmr.msra.gmra.mrb[0].mxu0 %v1100_v36  ;;  %v9754_v36 = vld [vmem:[%s11659_s1 + $0xa0] sm:$0xff]  }
  0x6f   : > { %8381 = vmatpush3.bf16.msra.mxu0 %v9750_v60  ;;  %8352 = vmatprep.mubr.bf16.mxu0 %v1101_v38  ;;  %v1104_v60 = vpack.c.bf16 %v9991_v22, %v9987_v21  ;;  %v9755_v38 = vld [vmem:[%s11659_s1 + $0xa8] sm:$0xff]   ;;  %v1107_v22 = vpack.c.bf16 %v10026_v34, %v10020_v31  ;;  %v222_v34 = vadd.s32 136, %v9926_v4  ;;  %v11892_v31 = vmov 0 }
  0x70   : > { %8382 = vmatprep.subr.bf16.mxu0 %v9751_v57  ;;  %v226_v21 = vadd.s32 168, %v9926_v4 }
  0x73   : > { %8383 = vmatpush3.bf16.msra.mxu0 %v9751_v57  ;;  %v1105_v57 = vpack.c.bf16 %v10002_v25, %v9999_v24 }
  0x74   : > { %8384 = vmatprep.subr.bf16.mxu0 %v9752_v39 }
  0x76   : > { %8353 = vmatmul.mubr.bf16.gmra.mrb[4].mxu0 %v1102_v62  ;;  %v9756_v62 = vld [vmem:[%s11659_s1 + $0xb0] sm:$0xff]  }
  0x77   : > { %8356 = vmatprep.mubr.bf16.mxu0 %v1103_v56  ;;  %8385 = vmatpush3.bf16.msra.mxu0 %v9752_v39  ;;  %v1106_v39 = vpack.c.bf16 %v10014_v29, %v10011_v28  ;;  %v9757_v56 = vld [vmem:[%s11659_s1 + $0xb8] sm:$0xff]  }
  0x78   : > { %8386 = vmatprep.subr.bf16.mxu0 %v9753_v1 }
  0x7b   : > { %8387 = vmatpush3.bf16.msra.mxu0 %v9753_v1  ;;  %v9758_v1 = vld [vmem:[%s11659_s1 + $0xc0] sm:$0xff]  }
  0x7c   : > { %8388 = vmatprep.subr.bf16.mxu0 %v9754_v36 }
  0x7e   : > { %8357 = vmatmul.mubr.bf16.gmra.mrb[8].mxu0 %v1104_v60  ;;  %v1109_v60 = vpack.c.bf16 %v10043_v42, %v10040_v41  ;;  %v11890_v41 = vmov 0 }
  0x7f   : > { %8360 = vmatprep.mubr.bf16.mxu0 %v1105_v57  ;;  %8389 = vmatpush3.bf16.msra.mxu0 %v9754_v36  ;;  %v1108_v36 = vpack.c.bf16 %v10034_v37, %v10030_v35  ;;  %v1110_v57 = vpack.c.bf16 %v10055_v48, %v10052_v47  ;;  %v1376_v47 = vld [vmem:[#allocation2 + $0x21] sm:$0xff]  ;;  %v1378_v37 = vld [vmem:[#allocation2 + $0x31] sm:$0xff]  ;;  %v11888_v35 = vmov 0 }
  0x80   : > { %8390 = vmatprep.subr.bf16.mxu0 %v9755_v38 }
  0x83   : > { %8391 = vmatpush3.bf16.msra.mxu0 %v9755_v38  ;;  %v206_v38 = vadd.s32 8, %v9926_v4 }
  0x84   : > { %8392 = vmatprep.subr.bf16.mxu0 %v9756_v62 }
  0x86   : > { %8361 = vmatmul.mubr.bf16.gmra.mrb[12].mxu0 %v1106_v39  ;;  %v10331_v39 = vpack.c.bf16 %v10088_v59, %v10085_v58  ;;  %v210_v59 = vadd.s32 40, %v9926_v4  ;;  %v10347_v58 = vpack.c.bf16 %v10122_v9, %v10112_v6  ;;  %v212_v9 = vadd.s32 56, %v9926_v4 }
  0x87   : > { %8364 = vmatprep.mubr.bf16.mxu0 %v1107_v22  ;;  %8393 = vmatpush3.bf16.msra.mxu0 %v9756_v62  ;;  %v10326_v22 = vpack.c.bf16 %v10072_v54, %v10069_v53  ;;  %v248_v62 = vand.u32 15, %v206_v38  ;;  %v1373_v38 = vld [vmem:[#allocation2 + $0x9] sm:$0xff]  ;;  %v214_v6 = vadd.s32 72, %v9926_v4 }
  0x88   : > { %8394 = vmatprep.subr.bf16.mxu0 %v9757_v56  ;;  %v276_v54 = vand.u32 15, %v210_v59  ;;  %v1377_v53 = vld [vmem:[#allocation2 + $0x29] sm:$0xff]  ;;  %v11884_v59 = vmov 0 }
  0x89   : > { %vm654_vm15 = vcmp.le.s32.totalorder %v248_v62, 14  ;;  %v1375_v62 = vld [vmem:[#allocation2 + $0x19] sm:$0xff] }
  0x8a   : > { %vm10350_vm0 = vmpackc.low %vm654_vm15, %vm9890_vm1  ;;  %vm658_vm12 = vcmp.le.s32.totalorder %v276_v54, 14  ;;  %v10359_v42 = vpack.c.bf16 %v1376_v47, %v1375_v62  ;;  %v9759_v54 = vld [vmem:[%s11659_s1 + $0xc8] sm:$0xff]   ;;  %v218_v62 = vadd.s32 104, %v9926_v4 }
  0x8b   : > { %8395 = vmatpush3.bf16.msra.mxu0 %v9757_v56  ;;  %v10335_v56 = vpack.c.bf16 %v10107_v5, %v10104_v3  ;;  %v11882_v5 = vmov 0  ;;  %vm10369_vm8 = vmpackc.low %vm658_vm12, %vm9890_vm1  ;;  %v1380_v47 = vld [vmem:[#allocation2 + $0x41] sm:$0xff] }
  0x8c   : > { %8428 = vmatprep.subr.bf16.mxu0 %v9758_v1  ;;  %v11883_v5 = vsel %vm10350_vm0, 4294967295, %v11882_v5 }
  0x8e   : > { %8365 = vmatmul.mubr.bf16.gmra.mrb[16].mxu0 %v1108_v36  ;;  %v208_v36 = vadd.s32 24, %v9926_v4 }
  0x8f   : > { %8368 = vmatprep.mubr.bf16.mxu0 %v1109_v60  ;;  %v10339_v60 = vld [vmem:[%s9948_s25 + $0xf8] sm:$0xff] }
  0x90   : > { %11881 = vst [vmem:[#allocation45_spill] sm:$0xff] %v10339_v60  ;;  %722 = vst [vmem:[#allocation2 + $0x110] sm:$0xff] %v10339_v60  ;;  %v262_v48 = vand.u32 15, %v208_v36  ;;  %v10366_v36 = vpack.c.bf16 %v1378_v37, %v1377_v53  ;;  %v1379_v37 = vld [vmem:[#allocation2 + $0x39] sm:$0xff]  ;;  %v1381_v53 = vld [vmem:[#allocation2 + $0x49] sm:$0xff] }
  0x92   : > { %vm656_vm7 = vcmp.le.s32.totalorder %v262_v48, 14  ;;  %v290_v48 = vand.u32 15, %v212_v9  ;;  %v1382_v9 = vld [vmem:[#allocation2 + $0x51] sm:$0xff] }
  0x93   : > { %vm10362_vm15 = vmpackc.low %vm656_vm7, %vm9890_vm1 }
  0x94   : > { %v11885_v59 = vsel %vm10362_vm15, 4294967295, %v11884_v59  ;;  %vm660_vm12 = vcmp.le.s32.totalorder %v290_v48, 14  ;;  %v10394_v48 = vpack.c.bf16 %v1382_v9, %v1381_v53  ;;  %v1385_v53 = vld [vmem:[#allocation2 + $0x69] sm:$0xff]  ;;  %v1386_v9 = vld [vmem:[#allocation2 + $0x71] sm:$0xff] }
  0x96   : > { %8369 = vmatmul.mubr.bf16.gmra.mrb[20].mxu0 %v1110_v57  ;;  %v1374_v57 = vld [vmem:[#allocation2 + $0x11] sm:$0xff] }
  0x97   : > { %8372 = vmatprep.mubr.bf16.mxu0 %v10326_v22  ;;  %v6959_v3 = vpack.c.bf16 %v1374_v57, %v1373_v38  ;;  %v304_v38 = vand.u32 15, %v214_v6  ;;  %v216_v57 = vadd.s32 88, %v9926_v4  ;;  %v9760_v6 = vld [vmem:[%s11659_s1 + $0xd0] sm:$0xff]  }
  0x99   : > { %vm662_vm7 = vcmp.le.s32.totalorder %v304_v38, 14  ;;  %v318_v29 = vand.u32 15, %v216_v57  ;;  %v9761_v38 = vld [vmem:[%s11659_s1 + $0xd8] sm:$0xff]   ;;  %v220_v57 = vadd.s32 120, %v9926_v4 }
  0x9b   : > { %v346_v25 = vand.u32 15, %v220_v57  ;;  %v224_v57 = vadd.s32 152, %v9926_v4 }
  0x9d   : > { %v374_v20 = vand.u32 15, %v224_v57  ;;  %v228_v57 = vadd.s32 184, %v9926_v4 }
  0x9e   : > { %8373 = vmatmul.mubr.bf16.gmra.mrb[24].mxu0 %v10331_v39 }
  0x9f   : > { %8376 = vmatprep.mubr.bf16.mxu0 %v10335_v56  ;;  %v402_v15 = vand.u32 15, %v228_v57  ;;  %v234_v57 = vadd.s32 232, %v9926_v4 }
  0xa6   : > { %8377 = vmatmul.mubr.bf16.gmra.mrb[28].mxu0 %v10347_v58 }
  0xa7   : > { %8396 = vmatprep.mubr.msk.bf16.mxu0 %vm10350_vm0, %v6959_v3  ;;  %v11886_v3 = vmov 0 }
  0xa8   : > { %v11887_v3 = vsel %vm10369_vm8, 4294967295, %v11886_v3 }
  0xae   : > { %8397 = vmatmul.mubr.msk.bf16.vlgmr.msra.gmra.mrb[0].mxu0 %vm10362_vm15, %v10359_v42  ;;  %vm10390_vm15 = vmpackc.low %vm660_vm12, %vm9890_vm1  ;;  %vm664_vm12 = vcmp.le.s32.totalorder %v318_v29, 14  ;;  %v10422_v29 = vpack.c.bf16 %v1386_v9, %v1385_v53  ;;  %v1389_v53 = vld [vmem:[#allocation2 + $0x89] sm:$0xff]  ;;  %v1390_v9 = vld [vmem:[#allocation2 + $0x91] sm:$0xff] }
  0xaf   : > { %8429 = vmatpush3.bf16.msra.mxu0 %v9758_v1  ;;  %8400 = vmatprep.mubr.msk.bf16.mxu0 %vm10369_vm8, %v10366_v36  ;;  %v10387_v1 = vpack.c.bf16 %v1380_v47, %v1379_v37  ;;  %v11889_v35 = vsel %vm10390_vm15, 4294967295, %v11888_v35  ;;  %vm10397_vm8 = vmpackc.low %vm662_vm7, %vm9890_vm1  ;;  %v332_v37 = vand.u32 15, %v218_v62  ;;  %v1384_v47 = vld [vmem:[#allocation2 + $0x61] sm:$0xff] }
  0xb0   : > { %8430 = vmatprep.subr.bf16.mxu0 %v9759_v54  ;;  %v11891_v41 = vsel %vm10397_vm8, 4294967295, %v11890_v41  ;;  %v9762_v62 = vld [vmem:[%s11659_s1 + $0xe0] sm:$0xff]  }
  0xb1   : > { %vm666_vm7 = vcmp.le.s32.totalorder %v332_v37, 14  ;;  %v9763_v37 = vld [vmem:[%s11659_s1 + $0xe8] sm:$0xff]  }
  0xb3   : > { %8431 = vmatpush3.bf16.msra.mxu0 %v9759_v54  ;;  %v1383_v54 = vld [vmem:[#allocation2 + $0x59] sm:$0xff] }
  0xb4   : > { %8432 = vmatprep.subr.bf16.mxu0 %v9760_v6  ;;  %v10415_v28 = vpack.c.bf16 %v1384_v47, %v1383_v54  ;;  %v360_v54 = vand.u32 15, %v222_v34  ;;  %v1388_v47 = vld [vmem:[#allocation2 + $0x81] sm:$0xff]  ;;  %v9764_v34 = vld [vmem:[%s11659_s1 + $0xf0] sm:$0xff]  }
  0xb6   : > { %8401 = vmatmul.mubr.msk.bf16.gmra.mrb[4].mxu0 %vm10390_vm15, %v10387_v1  ;;  %vm10425_vm15 = vmpackc.low %vm666_vm7, %vm9890_vm1  ;;  %vm670_vm7 = vcmp.le.s32.totalorder %v360_v54, 14  ;;  %v9765_v54 = vld [vmem:[%s11659_s1 + $0xf8] sm:$0xff]  }
  0xb7   : > { %8404 = vmatprep.mubr.msk.bf16.mxu0 %vm10397_vm8, %v10394_v48  ;;  %8433 = vmatpush3.bf16.msra.mxu0 %v9760_v6  ;;  %vm10418_vm8 = vmpackc.low %vm664_vm12, %vm9890_vm1  ;;  %v11894_v6 = vmov 0  ;;  %vm668_vm12 = vcmp.le.s32.totalorder %v346_v25, 14  ;;  %v10450_v25 = vpack.c.bf16 %v1390_v9, %v1389_v53  ;;  %v1393_v53 = vld [vmem:[#allocation2 + $0xa9] sm:$0xff]  ;;  %v1394_v9 = vld [vmem:[#allocation2 + $0xb1] sm:$0xff] }
  0xb8   : > { %8434 = vmatprep.subr.bf16.mxu0 %v9761_v38  ;;  %v11893_v31 = vsel %vm10418_vm8, 4294967295, %v11892_v31  ;;  %v11895_v6 = vsel %vm10425_vm15, 4294967295, %v11894_v6 }
  0xbb   : > { %8435 = vmatpush3.bf16.msra.mxu0 %v9761_v38  ;;  %v1387_v38 = vld [vmem:[#allocation2 + $0x79] sm:$0xff] }
  0xbc   : > { %8436 = vmatprep.subr.bf16.mxu0 %v9762_v62  ;;  %v10443_v24 = vpack.c.bf16 %v1388_v47, %v1387_v38  ;;  %v388_v38 = vand.u32 15, %v226_v21  ;;  %v1392_v47 = vld [vmem:[#allocation2 + $0xa1] sm:$0xff] }
  0xbd   : > { %v9766_v21 = vld [vmem:[%s11659_s1 + $0x100] sm:$0xff]  }
  0xbe   : > { %8405 = vmatmul.mubr.msk.bf16.gmra.mrb[8].mxu0 %vm10418_vm8, %v10415_v28  ;;  %vm10453_vm8 = vmpackc.low %vm670_vm7, %vm9890_vm1  ;;  %vm674_vm7 = vcmp.le.s32.totalorder %v388_v38, 14  ;;  %v416_v38 = vand.u32 15, %v230_v16  ;;  %v11907_v16 = vmov 0 }
  0xbf   : > { %8408 = vmatprep.mubr.msk.bf16.mxu0 %vm10425_vm15, %v10422_v29  ;;  %8437 = vmatpush3.bf16.msra.mxu0 %v9762_v62  ;;  %vm10446_vm15 = vmpackc.low %vm668_vm12, %vm9890_vm1  ;;  %v11898_v62 = vmov 0  ;;  %vm672_vm12 = vcmp.le.s32.totalorder %v374_v20, 14  ;;  %v10478_v20 = vpack.c.bf16 %v1394_v9, %v1393_v53  ;;  %v1398_v53 = vld [vmem:[#allocation2 + $0xd1] sm:$0xff]  ;;  %v232_v9 = vadd.s32 216, %v9926_v4 }
  0xc0   : > { %8438 = vmatprep.subr.bf16.mxu0 %v9763_v37  ;;  %v11897_v17 = vsel %vm10446_vm15, 4294967295, %v11896_v17  ;;  %v11899_v62 = vsel %vm10453_vm8, 4294967295, %v11898_v62 }
  0xc1   : > { %11903 = vst [vmem:[#allocation47_spill] sm:$0xff] %v10478_v20 }
  0xc3   : > { %8439 = vmatpush3.bf16.msra.mxu0 %v9763_v37  ;;  %v1391_v37 = vld [vmem:[#allocation2 + $0x99] sm:$0xff] }
  0xc4   : > { %8440 = vmatprep.subr.bf16.mxu0 %v9764_v34  ;;  %v10471_v19 = vpack.c.bf16 %v1392_v47, %v1391_v37  ;;  %v1395_v37 = vld [vmem:[#allocation2 + $0xb9] sm:$0xff]  ;;  %v1396_v47 = vld [vmem:[#allocation2 + $0xc1] sm:$0xff] }
  0xc5   : > { %v10493_v12 = vpack.c.bf16 %v1396_v47, %v1395_v37  ;;  %v1400_v37 = vld [vmem:[#allocation2 + $0xe1] sm:$0xff]  ;;  %v1401_v47 = vld [vmem:[#allocation2 + $0xe9] sm:$0xff] }
  0xc6   : > { %8409 = vmatmul.mubr.msk.bf16.gmra.mrb[12].mxu0 %vm10446_vm15, %v10443_v24  ;;  %vm10481_vm15 = vmpackc.low %vm674_vm7, %vm9890_vm1  ;;  %vm678_vm7 = vcmp.le.s32.totalorder %v416_v38, 14  ;;  %v1399_v38 = vld [vmem:[#allocation2 + $0xd9] sm:$0xff] }
  0xc7   : > { %8412 = vmatprep.mubr.msk.bf16.mxu0 %vm10453_vm8, %v10450_v25  ;;  %8441 = vmatpush3.bf16.msra.mxu0 %v9764_v34  ;;  %vm10474_vm8 = vmpackc.low %vm672_vm12, %vm9890_vm1  ;;  %v11904_v34 = vmov 0  ;;  %vm676_vm12 = vcmp.le.s32.totalorder %v402_v15, 14  ;;  %v430_v15 = vand.u32 15, %v232_v9  ;;  %v11912_v9 = vmov 0 }
  0xc8   : > { %8442 = vmatprep.subr.bf16.mxu0 %v9765_v54  ;;  %v11901_v13 = vsel %vm10474_vm8, 4294967295, %v11900_v13  ;;  %v11905_v34 = vsel %vm10481_vm15, 4294967295, %v11904_v34  ;;  %vm10496_vm0 = vmpackc.low %vm676_vm12, %vm9890_vm1 }
  0xc9   : > { %11902 = vst [vmem:[#allocation46_spill] sm:$0xff] %v11901_v13  ;;  %11906 = vst [vmem:[#allocation48_spill] sm:$0xff] %v11905_v34  ;;  %v11908_v16 = vsel %vm10496_vm0, 4294967295, %v11907_v16  ;;  %v11909_v34 = vmov 0  ;;  %v444_v13 = vand.u32 15, %v234_v57  ;;  %vm680_vm12 = vcmp.le.s32.totalorder %v430_v15, 14 }
  0xcb   : > { %8443 = vmatpush3.bf16.msra.mxu0 %v9765_v54  ;;  %v1397_v54 = vld [vmem:[#allocation2 + $0xc9] sm:$0xff] }
  0xcc   : > { %8476 = vmatprep.subr.bf16.mxu0 %v9766_v21  ;;  %v10500_v14 = vpack.c.bf16 %v1398_v53, %v1397_v54  ;;  %v1402_v54 = vld [vmem:[#allocation2 + $0xf1] sm:$0xff]  ;;  %v236_v53 = vadd.s32 248, %v9926_v4  ;;  %v1403_v4 = vld [vmem:[#allocation2 + $0xf9] sm:$0xff] }
  0xcd   : > { %v10521_v57 = vpack.c.bf16 %v1402_v54, %v1401_v47  ;;  %v9767_v47 = vld [vmem:[%s11659_s1 + $0x108] sm:$0xff]   ;;  %v9768_v54 = vld [vmem:[%s11659_s1 + $0x110] sm:$0xff]  }
  0xce   : > { %8413 = vmatmul.mubr.msk.bf16.gmra.mrb[16].mxu0 %vm10474_vm8, %v10471_v19  ;;  %vm10517_vm8 = vmpackc.low %vm680_vm12, %vm9890_vm1  ;;  %v458_v15 = vand.u32 15, %v236_v53  ;;  %v11920_v53 = vld [vmem:[#allocation39_spill] sm:$0xff] }
  0xcf   : > { %8416 = vmatprep.mubr.msk.bf16.mxu0 %vm10481_vm15, %v10478_v20  ;;  %vm10503_vm15 = vmpackc.low %vm678_vm7, %vm9890_vm1  ;;  %vm682_vm7 = vcmp.le.s32.totalorder %v444_v13, 14  ;;  %v10514_v20 = vpack.c.bf16 %v1400_v37, %v1399_v38  ;;  %v11913_v9 = vsel %vm10517_vm8, 4294967295, %v11912_v9  ;;  %v1404_v13 = vld [vmem:[#allocation2 + $0x101] sm:$0xff]  ;;  %v11916_v37 = vmov 0 }
  0xd0   : > { %v11910_v34 = vsel %vm10503_vm15, 4294967295, %v11909_v34  ;;  %vm684_vm12 = vcmp.le.s32.totalorder %v458_v15, 14  ;;  %v10534_v38 = vpack.c.bf16 %v1404_v13, %v1403_v4  ;;  %v11923_v15 = vld [vmem:[#allocation40_spill] sm:$0xff]  ;;  %v1741_v4 = vld [vmem:[#allocation2 + $0x107] sm:$0xff]  ;;  %v1742_v13 = vld [vmem:[#allocation2 + $0x10f] sm:$0xff] }
  0xd1   : > { %11911 = vst [vmem:[#allocation49_spill] sm:$0xff] %v11910_v34  ;;  %v11914_v34 = vmov 0 }
  0xd6   : > { %8417 = vmatmul.mubr.msk.bf16.gmra.mrb[20].mxu0 %vm10496_vm0, %v10493_v12  ;;  %vm10524_vm0 = vmpackc.low %vm682_vm7, %vm9890_vm1  ;;  %vm11924_vm7 = vnez %v11923_v15 }
  0xd7   : > { %8420 = vmatprep.mubr.msk.bf16.mxu0 %vm10503_vm15, %v10500_v14  ;;  %v11915_v34 = vsel %vm10524_vm0, 4294967295, %v11914_v34  ;;  %vm10537_vm15 = vmpackc.low %vm684_vm12, %vm9890_vm1  ;;  %vm11921_vm1 = vnez %v11920_v53 }
  0xd8   : > { %v11917_v37 = vsel %vm10537_vm15, 4294967295, %v11916_v37 }
  0xde   : > { %8421 = vmatmul.mubr.msk.bf16.gmra.mrb[24].mxu0 %vm10517_vm8, %v10514_v20 }
  0xdf   : > { %8424 = vmatprep.mubr.msk.bf16.mxu0 %vm10524_vm0, %v10521_v57 }
  0xe6   : > { %8425 = vmatmul.mubr.msk.bf16.gmra.mrb[28].mxu0 %vm10537_vm15, %v10534_v38 }
  0xe7   : > { %8444 = vmatprep.mubr.msk.bf16.mxu0 %vm9939_vm2, %v10057_v49  ;;  %v9769_v49 = vld [vmem:[%s11659_s1 + $0x118] sm:$0xff]  }
  0xee   : > { %8445 = vmatmul.mubr.msk.bf16.vlgmr.msra.gmra.mrb[0].mxu0 %vm10062_vm5, %v10066_v51  ;;  %v9770_v51 = vld [vmem:[%s11659_s1 + $0x120] sm:$0xff]  }
  0xef   : > { %8477 = vmatpush3.bf16.msra.mxu0 %v9766_v21  ;;  %8448 = vmatprep.mubr.msk.bf16.mxu0 %vm10075_vm6, %v10119_v8  ;;  %v9771_v8 = vld [vmem:[%s11659_s1 + $0x128] sm:$0xff]   ;;  %v11919_v21 = vld [vmem:[#allocation37_spill] sm:$0xff] }
  0xf0   : > { %8478 = vmatprep.subr.bf16.mxu0 %v9767_v47 }
  0xf3   : > { %8479 = vmatpush3.bf16.msra.mxu0 %v9767_v47  ;;  %v2049_v47 = vld [vmem:[#allocation2 + $0x18] sm:$0xff] }
  0xf4   : > { %8480 = vmatprep.subr.bf16.mxu0 %v9768_v54 }
  0xf6   : > { %8449 = vmatmul.mubr.msk.bf16.gmra.mrb[4].mxu0 %vm10115_vm9, %v10130_v18  ;;  %v9772_v18 = vld [vmem:[%s11659_s1 + $0x130] sm:$0xff]  }
  0xf7   : > { %8452 = vmatprep.mubr.msk.bf16.mxu0 %vm10126_vm10, %v10152_v44  ;;  %8481 = vmatpush3.bf16.msra.mxu0 %v9768_v54  ;;  %v9773_v44 = vld [vmem:[%s11659_s1 + $0x138] sm:$0xff]   ;;  %v10613_v54 = vpack.c.bf16 %v1742_v13, %v1741_v4  ;;  %v2058_v13 = vld [vmem:[#allocation2 + $0x60] sm:$0xff] }
  0xf8   : > { %8482 = vmatprep.subr.bf16.mxu0 %v9769_v49  ;;  %v2057_v4 = vld [vmem:[#allocation2 + $0x58] sm:$0xff] }
  0xfb   : > { %8483 = vmatpush3.bf16.msra.mxu0 %v9769_v49 }
  0xfc   : > { %8484 = vmatprep.subr.bf16.mxu0 %v9770_v51 }
  0xfe   : > { %8453 = vmatmul.mubr.msk.bf16.gmra.mrb[8].mxu0 %vm10148_vm13, %v10159_v46  ;;  %v9774_v46 = vld [vmem:[%s11659_s1 + $0x140] sm:$0xff]  }
  0xff   : > { %8456 = vmatprep.mubr.msk.bf16.mxu0 %vm10155_vm14, %v10175_v23  ;;  %8485 = vmatpush3.bf16.msra.mxu0 %v9770_v51  ;;  %v11918_v23 = vld [vmem:[#allocation38_spill] sm:$0xff]  ;;  %v2052_v51 = vld [vmem:[#allocation2 + $0x30] sm:$0xff] }
 0x100   : > { %8486 = vmatprep.subr.bf16.mxu0 %v9771_v8 }
 0x103   : > { %8487 = vmatpush3.bf16.msra.mxu0 %v9771_v8  ;;  %v2053_v8 = vld [vmem:[#allocation2 + $0x38] sm:$0xff] }
 0x104   : > { %8488 = vmatprep.subr.bf16.mxu0 %v9772_v18 }
 0x106   : > { %8457 = vmatmul.mubr.msk.bf16.gmra.mrb[12].mxu0 %vm10178_vm3, %v10182_v27  ;;  %v11922_v27 = vld [vmem:[#allocation41_spill] sm:$0xff]  ;;  %vm11928_vm3 = vnez %v11877_v0 }
 0x107   : > { %8460 = vmatprep.mubr.msk.bf16.mxu0 %vm10185_vm4, %v10203_v61  ;;  %8489 = vmatpush3.bf16.msra.mxu0 %v9772_v18  ;;  %v11925_v61 = vld [vmem:[#allocation42_spill] sm:$0xff]  ;;  %vm11927_vm4 = vnez %v11874_v33 }
 0x108   : > { %8490 = vmatprep.subr.bf16.mxu0 %v9773_v44  ;;  %vm11926_vm12 = vnez %v11925_v61 }
 0x10b   : > { %8491 = vmatpush3.bf16.msra.mxu0 %v9773_v44 }
 0x10c   : > { %8524 = vmatprep.subr.bf16.mxu0 %v9774_v46 }
 0x10e   : > { %8461 = vmatmul.mubr.msk.bf16.gmra.mrb[16].mxu0 %vm10206_vm11, %v11918_v23  ;;  %v2055_v23 = vld [vmem:[#allocation2 + $0x48] sm:$0xff] }
 0x10f   : > { %8464 = vmatprep.mubr.msk.bf16.mxu0 %vm11921_vm1, %v10225_v52  ;;  %v2050_v52 = vld [vmem:[#allocation2 + $0x20] sm:$0xff] }
 0x110   : > { %v2081_v49 = vpack.c.bf16 %v2050_v52, %v2049_v47  ;;  %v9776_v47 = vld [vmem:[%s11659_s1 + $0x150] sm:$0xff]  }
 0x116   : > { %8465 = vmatmul.mubr.msk.bf16.gmra.mrb[20].mxu0 %vm11924_vm7, %v11922_v27  ;;  %vm11929_vm7 = vnez %v11880_v32  ;;  %v2056_v27 = vld [vmem:[#allocation2 + $0x50] sm:$0xff] }
 0x117   : > { %8468 = vmatprep.mubr.msk.bf16.mxu0 %vm11926_vm12, %v10246_v63  ;;  %v2051_v63 = vld [vmem:[#allocation2 + $0x28] sm:$0xff]  ;;  %v10630_v52 = vpack.c.bf16 %v2056_v27, %v2055_v23 }
 0x118   : > { %v10618_v18 = vpack.c.bf16 %v2052_v51, %v2051_v63  ;;  %v2059_v63 = vld [vmem:[#allocation2 + $0x68] sm:$0xff]  ;;  %v2060_v51 = vld [vmem:[#allocation2 + $0x70] sm:$0xff] }
 0x119   : > { %11930 = vst [vmem:[#allocation38_spill] sm:$0xff] %v10630_v52  ;;  %v10642_v23 = vpack.c.bf16 %v2060_v51, %v2059_v63  ;;  %v9780_v63 = vld [vmem:[%s11659_s1 + $0x170] sm:$0xff]  }
 0x11b   : > { %11932 = vst [vmem:[#allocation50_spill] sm:$0xff] %v10642_v23 }
 0x11e   : > { %8469 = vmatmul.mubr.msk.bf16.gmra.mrb[24].mxu0 %vm11927_vm4, %v10253_v40  ;;  %v2054_v40 = vld [vmem:[#allocation2 + $0x40] sm:$0xff]  ;;  %vm11937_vm4 = vnez %v11887_v3 }
 0x11f   : > { %8472 = vmatprep.mubr.msk.bf16.mxu0 %vm11928_vm3, %v10267_v2  ;;  %v10620_v44 = vpack.c.bf16 %v2054_v40, %v2053_v8  ;;  %v9775_v2 = vld [vmem:[%s11659_s1 + $0x148] sm:$0xff]   ;;  %v2061_v8 = vld [vmem:[#allocation2 + $0x78] sm:$0xff]  ;;  %v2062_v40 = vld [vmem:[#allocation2 + $0x80] sm:$0xff]  ;;  %vm11936_vm3 = vnez %v11885_v59 }
 0x120   : > { %v10644_v27 = vpack.c.bf16 %v2062_v40, %v2061_v8  ;;  %v9781_v8 = vld [vmem:[%s11659_s1 + $0x178] sm:$0xff]   ;;  %v2067_v40 = vld [vmem:[#allocation2 + $0xa8] sm:$0xff] }
 0x122   : > { %11933 = vst [vmem:[#allocation51_spill] sm:$0xff] %v10644_v27 }
 0x126   : > { %8473 = vmatmul.mubr.msk.bf16.gmra.mrb[28].mxu0 %vm11929_vm7, %v10613_v54  ;;  %vm11935_vm7 = vnez %v11883_v5 }
 0x127   : > { %8492 = vmatprep.mubr.bf16.mxu0 %v2081_v49  ;;  %v10632_v49 = vpack.c.bf16 %v2058_v13, %v2057_v4  ;;  %v9779_v4 = vld [vmem:[%s11659_s1 + $0x168] sm:$0xff]  }
 0x128   : > { %v2063_v13 = vld [vmem:[#allocation2 + $0x88] sm:$0xff] }
 0x129   : > { %11931 = vst [vmem:[#allocation41_spill] sm:$0xff] %v10632_v49 }
 0x12e   : > { %8493 = vmatmul.mubr.bf16.vlgmr.msra.gmra.mrb[0].mxu0 %v10618_v18 }
 0x12f   : > { %8525 = vmatpush3.bf16.msra.mxu0 %v9774_v46  ;;  %8496 = vmatprep.mubr.bf16.mxu0 %v10620_v44  ;;  %v9777_v46 = vld [vmem:[%s11659_s1 + $0x158] sm:$0xff]  }
 0x130   : > { %8526 = vmatprep.subr.bf16.mxu0 %v9775_v2 }
 0x133   : > { %8527 = vmatpush3.bf16.msra.mxu0 %v9775_v2  ;;  %v9778_v2 = vld [vmem:[%s11659_s1 + $0x160] sm:$0xff]  }
 0x134   : > { %8528 = vmatprep.subr.bf16.mxu0 %v9776_v47 }
 0x136   : > { %8497 = vmatmul.mubr.bf16.gmra.mrb[4].mxu0 %v10630_v52  ;;  %v2066_v52 = vld [vmem:[#allocation2 + $0xa0] sm:$0xff] }
 0x137   : > { %8500 = vmatprep.mubr.bf16.mxu0 %v10632_v49  ;;  %8529 = vmatpush3.bf16.msra.mxu0 %v9776_v47  ;;  %v2064_v47 = vld [vmem:[#allocation2 + $0x90] sm:$0xff]  ;;  %v2065_v49 = vld [vmem:[#allocation2 + $0x98] sm:$0xff] }
 0x138   : > { %8530 = vmatprep.subr.bf16.mxu0 %v9777_v46  ;;  %v10656_v51 = vpack.c.bf16 %v2066_v52, %v2065_v49  ;;  %v9782_v52 = vld [vmem:[%s11659_s1 + $0x180] sm:$0xff]  }
 0x13b   : > { %8531 = vmatpush3.bf16.msra.mxu0 %v9777_v46  ;;  %v10654_v46 = vpack.c.bf16 %v2064_v47, %v2063_v13  ;;  %v10676_v13 = vld [vmem:[#allocation2 + $0x108] sm:$0xff] }
 0x13c   : > { %8532 = vmatprep.subr.bf16.mxu0 %v9778_v2  ;;  %11934 = vst [vmem:[#allocation52_spill] sm:$0xff] %v10676_v13  ;;  %v2693_v47 = vld [vmem:[#allocation2 + $0x27] sm:$0xff] }
 0x13e   : > { %8501 = vmatmul.mubr.bf16.gmra.mrb[8].mxu0 %v10642_v23  ;;  %v2070_v23 = vld [vmem:[#allocation2 + $0xc0] sm:$0xff] }
 0x13f   : > { %8504 = vmatprep.mubr.bf16.mxu0 %v10644_v27  ;;  %8533 = vmatpush3.bf16.msra.mxu0 %v9778_v2  ;;  %v2068_v2 = vld [vmem:[#allocation2 + $0xb0] sm:$0xff]  ;;  %v2069_v27 = vld [vmem:[#allocation2 + $0xb8] sm:$0xff] }
 0x140   : > { %8534 = vmatprep.subr.bf16.mxu0 %v9779_v4  ;;  %v10666_v49 = vpack.c.bf16 %v2068_v2, %v2067_v40  ;;  %v2698_v40 = vld [vmem:[#allocation2 + $0x4f] sm:$0xff] }
 0x143   : > { %8535 = vmatpush3.bf16.msra.mxu0 %v9779_v4  ;;  %v10668_v4 = vpack.c.bf16 %v2070_v23, %v2069_v27  ;;  %v2096_v23 = vpack.c.bf16 %v10339_v60, %v10676_v13  ;;  %v2386_v27 = vld [vmem:[#allocation2 + $0x111] sm:$0xff] }
 0x144   : > { %8536 = vmatprep.subr.bf16.mxu0 %v9780_v63 }
 0x146   : > { %8505 = vmatmul.mubr.bf16.gmra.mrb[12].mxu0 %v10654_v46 }
 0x147   : > { %8508 = vmatprep.mubr.bf16.mxu0 %v10656_v51  ;;  %8537 = vmatpush3.bf16.msra.mxu0 %v9780_v63 }
 0x148   : > { %8538 = vmatprep.subr.bf16.mxu0 %v9781_v8 }
 0x14b   : > { %8539 = vmatpush3.bf16.msra.mxu0 %v9781_v8 }
 0x14c   : > { %8572 = vmatprep.subr.bf16.mxu0 %v9782_v52 }
 0x14e   : > { %8509 = vmatmul.mubr.bf16.gmra.mrb[16].mxu0 %v10666_v49 }
 0x14f   : > { %8512 = vmatprep.mubr.bf16.mxu0 %v10668_v4 }
 0x156   : > { %8513 = vmatmul.mubr.bf16.gmra.mrb[20].mxu0 %v10326_v22  ;;  %v9783_v22 = vld [vmem:[%s11659_s1 + $0x188] sm:$0xff]  }
 0x157   : > { %8516 = vmatprep.mubr.bf16.mxu0 %v10331_v39  ;;  %v9786_v39 = vld [vmem:[%s11659_s1 + $0x1a0] sm:$0xff]  }
 0x15e   : > { %8517 = vmatmul.mubr.bf16.gmra.mrb[24].mxu0 %v10335_v56  ;;  %v9787_v56 = vld [vmem:[%s11659_s1 + $0x1a8] sm:$0xff]  }
 0x15f   : > { %8520 = vmatprep.mubr.bf16.mxu0 %v10347_v58  ;;  %v9784_v58 = vld [vmem:[%s11659_s1 + $0x190] sm:$0xff]  }
 0x166   : > { %8521 = vmatmul.mubr.bf16.gmra.mrb[28].mxu0 %v2096_v23  ;;  %v2699_v23 = vld [vmem:[#allocation2 + $0x57] sm:$0xff] }
 0x167   : > { %8540 = vmatprep.mubr.msk.bf16.mxu0 %vm11935_vm7, %v10359_v42  ;;  %v9785_v42 = vld [vmem:[%s11659_s1 + $0x198] sm:$0xff]   ;;  %vm11938_vm7 = vnez %v11889_v35 }
 0x16e   : > { %8541 = vmatmul.mubr.msk.bf16.vlgmr.msra.gmra.mrb[0].mxu0 %vm11936_vm3, %v10366_v36  ;;  %vm11939_vm3 = vnez %v11891_v41  ;;  %v9789_v36 = vld [vmem:[%s11659_s1 + $0x1b8] sm:$0xff]  }
 0x16f   : > { %8573 = vmatpush3.bf16.msra.mxu0 %v9782_v52  ;;  %8544 = vmatprep.mubr.msk.bf16.mxu0 %vm11937_vm4, %v10387_v1  ;;  %vm11940_vm4 = vnez %v11893_v31  ;;  %v11944_v1 = vld [vmem:[#allocation47_spill] sm:$0xff]  ;;  %v9791_v52 = vld [vmem:[%s11659_s1 + $0x1c8] sm:$0xff]  }
 0x170   : > { %8574 = vmatprep.subr.bf16.mxu0 %v9783_v22 }
 0x173   : > { %8575 = vmatpush3.bf16.msra.mxu0 %v9783_v22  ;;  %v2700_v22 = vld [vmem:[#allocation2 + $0x5f] sm:$0xff] }
 0x174   : > { %8576 = vmatprep.subr.bf16.mxu0 %v9784_v58 }
 0x176   : > { %8545 = vmatmul.mubr.msk.bf16.gmra.mrb[4].mxu0 %vm11938_vm7, %v10394_v48  ;;  %vm11941_vm7 = vnez %v11895_v6  ;;  %v11945_v48 = vld [vmem:[#allocation46_spill] sm:$0xff] }
 0x177   : > { %8548 = vmatprep.mubr.msk.bf16.mxu0 %vm11939_vm3, %v10415_v28  ;;  %8577 = vmatpush3.bf16.msra.mxu0 %v9784_v58  ;;  %v9788_v28 = vld [vmem:[%s11659_s1 + $0x1b0] sm:$0xff]   ;;  %vm11942_vm3 = vnez %v11897_v17  ;;  %v2701_v58 = vld [vmem:[#allocation2 + $0x67] sm:$0xff] }
 0x178   : > { %8578 = vmatprep.subr.bf16.mxu0 %v9785_v42 }
 0x17b   : > { %8579 = vmatpush3.bf16.msra.mxu0 %v9785_v42  ;;  %v2702_v42 = vld [vmem:[#allocation2 + $0x6f] sm:$0xff] }
 0x17c   : > { %8580 = vmatprep.subr.bf16.mxu0 %v9786_v39 }
 0x17e   : > { %8549 = vmatmul.mubr.msk.bf16.gmra.mrb[8].mxu0 %vm11940_vm4, %v10422_v29  ;;  %vm11943_vm4 = vnez %v11899_v62  ;;  %v11947_v29 = vld [vmem:[#allocation48_spill] sm:$0xff] }
 0x17f   : > { %8552 = vmatprep.mubr.msk.bf16.mxu0 %vm11941_vm7, %v10443_v24  ;;  %8581 = vmatpush3.bf16.msra.mxu0 %v9786_v39  ;;  %v9790_v24 = vld [vmem:[%s11659_s1 + $0x1c0] sm:$0xff]   ;;  %vm11946_vm7 = vnez %v11945_v48  ;;  %vm11948_vm12 = vnez %v11947_v29  ;;  %v9792_v39 = vld [vmem:[%s11659_s1 + $0x1d0] sm:$0xff]  }
 0x180   : > { %8582 = vmatprep.subr.bf16.mxu0 %v9787_v56 }
 0x183   : > { %8583 = vmatpush3.bf16.msra.mxu0 %v9787_v56  ;;  %v7208_v56 = vpack.c.bf16 %v2700_v22, %v2699_v23  ;;  %v9797_v22 = vld [vmem:[%s11659_s1 + $0x1f8] sm:$0xff]  }
 0x184   : > { %8584 = vmatprep.subr.bf16.mxu0 %v9788_v28 }
 0x186   : > { %8553 = vmatmul.mubr.msk.bf16.gmra.mrb[12].mxu0 %vm11942_vm3, %v10450_v25  ;;  %vm11949_vm3 = vnez %v11908_v16  ;;  %v2385_v25 = vld [vmem:[#allocation2 + $0x109] sm:$0xff] }
 0x187   : > { %8556 = vmatprep.mubr.msk.bf16.mxu0 %vm11943_vm4, %v10471_v19  ;;  %8585 = vmatpush3.bf16.msra.mxu0 %v9788_v28  ;;  %v11950_v19 = vld [vmem:[#allocation49_spill] sm:$0xff]  ;;  %v10749_v63 = vpack.c.bf16 %v2386_v27, %v2385_v25  ;;  %v7211_v28 = vpack.c.bf16 %v2702_v42, %v2701_v58  ;;  %v2706_v27 = vld [vmem:[#allocation2 + $0x8f] sm:$0xff]  ;;  %v2711_v58 = vld [vmem:[#allocation2 + $0xb7] sm:$0xff] }
 0x188   : > { %8586 = vmatprep.subr.bf16.mxu0 %v9789_v36  ;;  %vm11951_vm4 = vnez %v11950_v19  ;;  %v2705_v25 = vld [vmem:[#allocation2 + $0x87] sm:$0xff]  ;;  %v2712_v42 = vld [vmem:[#allocation2 + $0xbf] sm:$0xff] }
 0x18b   : > { %8587 = vmatpush3.bf16.msra.mxu0 %v9789_v36  ;;  %v9793_v36 = vld [vmem:[%s11659_s1 + $0x1d8] sm:$0xff]  }
 0x18c   : > { %8620 = vmatprep.subr.bf16.mxu0 %v9790_v24 }
 0x18e   : > { %8557 = vmatmul.mubr.msk.bf16.gmra.mrb[16].mxu0 %vm11946_vm7, %v11944_v1  ;;  %v2704_v1 = vld [vmem:[#allocation2 + $0x7f] sm:$0xff] }
 0x18f   : > { %8560 = vmatprep.mubr.msk.bf16.mxu0 %vm11948_vm12, %v10493_v12  ;;  %v2694_v12 = vld [vmem:[#allocation2 + $0x2f] sm:$0xff] }
 0x190   : > { %v7199_v8 = vpack.c.bf16 %v2694_v12, %v2693_v47  ;;  %v9794_v47 = vld [vmem:[%s11659_s1 + $0x1e0] sm:$0xff]  }
 0x196   : > { %8561 = vmatmul.mubr.msk.bf16.gmra.mrb[20].mxu0 %vm11949_vm3, %v10500_v14  ;;  %v2695_v14 = vld [vmem:[#allocation2 + $0x37] sm:$0xff] }
 0x197   : > { %8564 = vmatprep.mubr.msk.bf16.mxu0 %vm11951_vm4, %v10514_v20  ;;  %v2696_v20 = vld [vmem:[#allocation2 + $0x3f] sm:$0xff] }
 0x198   : > { %v7202_v2 = vpack.c.bf16 %v2696_v20, %v2695_v14  ;;  %v9795_v14 = vld [vmem:[%s11659_s1 + $0x1e8] sm:$0xff]   ;;  %v2707_v20 = vld [vmem:[#allocation2 + $0x97] sm:$0xff] }
 0x19e   : > { %8565 = vmatmul.mubr.msk.bf16.gmra.mrb[24].mxu0 %vm10517_vm8, %v10521_v57  ;;  %v2697_v57 = vld [vmem:[#allocation2 + $0x47] sm:$0xff] }
 0x19f   : > { %8568 = vmatprep.mubr.msk.bf16.mxu0 %vm10524_vm0, %v10534_v38  ;;  %v7205_v38 = vpack.c.bf16 %v2698_v40, %v2697_v57  ;;  %v2708_v57 = vld [vmem:[#allocation2 + $0x9f] sm:$0xff]  ;;  %v2709_v40 = vld [vmem:[#allocation2 + $0xa7] sm:$0xff] }
 0x1a6   : > { %8569 = vmatmul.mubr.msk.bf16.gmra.mrb[28].mxu0 %vm10537_vm15, %v10749_v63 }
 0x1a7   : > { %8588 = vmatprep.mubr.msk.bf16.mxu0 %vm9939_vm2, %v7199_v8  ;;  %v7217_v8 = vpack.c.bf16 %v2706_v27, %v2705_v25  ;;  %v2716_v25 = vld [vmem:[#allocation2 + $0xdf] sm:$0xff]  ;;  %v2717_v27 = vld [vmem:[#allocation2 + $0xe7] sm:$0xff] }
 0x1ae   : > { %8589 = vmatmul.mubr.msk.bf16.vlgmr.msra.gmra.mrb[0].mxu0 %vm10062_vm5, %v7202_v2  ;;  %v2710_v2 = vld [vmem:[#allocation2 + $0xaf] sm:$0xff] }
 0x1af   : > { %8621 = vmatpush3.bf16.msra.mxu0 %v9790_v24  ;;  %8592 = vmatprep.mubr.msk.bf16.mxu0 %vm10075_vm6, %v7205_v38  ;;  %v2703_v24 = vld [vmem:[#allocation2 + $0x77] sm:$0xff]  ;;  %v7223_v23 = vpack.c.bf16 %v2710_v2, %v2709_v40  ;;  %v2724_v2 = vld [vmem:[#allocation2 + $0x11f] sm:$0xff] }
 0x1b0   : > { %8622 = vmatprep.subr.bf16.mxu0 %v9791_v52  ;;  %v7214_v12 = vpack.c.bf16 %v2704_v1, %v2703_v24  ;;  %v9796_v38 = vld [vmem:[%s11659_s1 + $0x1f0] sm:$0xff]  }
 0x1b1   : > { %v2715_v1 = vld [vmem:[#allocation2 + $0xd7] sm:$0xff] }
 0x1b2   : > { %v2723_v40 = vld [vmem:[#allocation2 + $0x117] sm:$0xff] }
 0x1b3   : > { %8623 = vmatpush3.bf16.msra.mxu0 %v9791_v52  ;;  %v7220_v52 = vpack.c.bf16 %v2708_v57, %v2707_v20  ;;  %v2720_v20 = vld [vmem:[#allocation2 + $0xff] sm:$0xff] }
 0x1b4   : > { %8624 = vmatprep.subr.bf16.mxu0 %v9792_v39 }
 0x1b6   : > { %8593 = vmatmul.mubr.msk.bf16.gmra.mrb[4].mxu0 %vm10115_vm9, %v7208_v56  ;;  %v2714_v56 = vld [vmem:[#allocation2 + $0xcf] sm:$0xff] }
 0x1b7   : > { %8596 = vmatprep.mubr.msk.bf16.mxu0 %vm10126_vm10, %v7211_v28  ;;  %8625 = vmatpush3.bf16.msra.mxu0 %v9792_v39  ;;  %v2713_v39 = vld [vmem:[#allocation2 + $0xc7] sm:$0xff]  ;;  %vm11958_vm10 = vnez %v11880_v32 }
 0x1b8   : > { %8626 = vmatprep.subr.bf16.mxu0 %v9793_v36  ;;  %v9798_v28 = vld [vmem:[%s11659_s1 + $0x200] sm:$0xff]   ;;  %v7229_v24 = vpack.c.bf16 %v2714_v56, %v2713_v39  ;;  %v11961_v56 = vld [vmem:[#allocation50_spill] sm:$0xff] }
 0x1b9   : > { %v11960_v39 = vld [vmem:[#allocation41_spill] sm:$0xff] }
 0x1bb   : > { %8627 = vmatpush3.bf16.msra.mxu0 %v9793_v36  ;;  %v7226_v36 = vpack.c.bf16 %v2712_v42, %v2711_v58  ;;  %v9809_v58 = vld [vmem:[%s11659_s1 + $0x258] sm:$0xff]   ;;  %v9800_v42 = vld [vmem:[%s11659_s1 + $0x210] sm:$0xff]  }
 0x1bc   : > { %8628 = vmatprep.subr.bf16.mxu0 %v9794_v47 }
 0x1be   : > { %8597 = vmatmul.mubr.msk.bf16.gmra.mrb[8].mxu0 %vm10148_vm13, %v7214_v12  ;;  %vm11953_vm13 = vnez %v11857_v30  ;;  %v7232_v12 = vpack.c.bf16 %v2716_v25, %v2715_v1  ;;  %v9804_v1 = vld [vmem:[%s11659_s1 + $0x230] sm:$0xff]   ;;  %v9805_v25 = vld [vmem:[%s11659_s1 + $0x238] sm:$0xff]  }
 0x1bf   : > { %8600 = vmatprep.mubr.msk.bf16.mxu0 %vm10155_vm14, %v7217_v8  ;;  %8629 = vmatpush3.bf16.msra.mxu0 %v9794_v47  ;;  %vm11952_vm14 = vnez %v11854_v26  ;;  %v2718_v47 = vld [vmem:[#allocation2 + $0xef] sm:$0xff] }
 0x1c0   : > { %8630 = vmatprep.subr.bf16.mxu0 %v9795_v14  ;;  %v7235_v8 = vpack.c.bf16 %v2718_v47, %v2717_v27  ;;  %v3051_v27 = vld [vmem:[#allocation2 + $0xc8] sm:$0xff]  ;;  %v3052_v47 = vld [vmem:[#allocation2 + $0xd0] sm:$0xff] }
 0x1c3   : > { %8631 = vmatpush3.bf16.msra.mxu0 %v9795_v14  ;;  %v2719_v14 = vld [vmem:[#allocation2 + $0xf7] sm:$0xff] }
 0x1c4   : > { %8632 = vmatprep.subr.bf16.mxu0 %v9796_v38  ;;  %v7238_v57 = vpack.c.bf16 %v2720_v20, %v2719_v14  ;;  %v3055_v14 = vld [vmem:[#allocation2 + $0xe8] sm:$0xff]  ;;  %v3056_v20 = vld [vmem:[#allocation2 + $0xf0] sm:$0xff] }
 0x1c6   : > { %8601 = vmatmul.mubr.msk.bf16.gmra.mrb[12].mxu0 %vm11952_vm14, %v7220_v52  ;;  %vm11955_vm14 = vnez %v11925_v61  ;;  %v9806_v52 = vld [vmem:[%s11659_s1 + $0x240] sm:$0xff]  }
 0x1c7   : > { %8604 = vmatprep.mubr.msk.bf16.mxu0 %vm11953_vm13, %v7223_v23  ;;  %8633 = vmatpush3.bf16.msra.mxu0 %v9796_v38  ;;  %vm11954_vm13 = vnez %v11923_v15  ;;  %v7244_v38 = vpack.c.bf16 %v2724_v2, %v2723_v40  ;;  %v9807_v23 = vld [vmem:[%s11659_s1 + $0x248] sm:$0xff]   ;;  %v3075_v40 = vpack.c.bf16 %v3056_v20, %v3055_v14  ;;  %v3058_v2 = vld [vmem:[#allocation2 + $0x100] sm:$0xff]  ;;  %v3350_v14 = vld [vmem:[#allocation2 + $0x91] sm:$0xff] }
 0x1c8   : > { %8634 = vmatprep.subr.bf16.mxu0 %v9797_v22  ;;  %8716 = vmatprep.subr.bf16.mxu1 %v9806_v52 }
 0x1c9   : > { %8717 = vmatpush3.bf16.msra.mxu1 %v9806_v52 }
 0x1ca   : > { %8718 = vmatprep.subr.bf16.mxu1 %v9807_v23 }
 0x1cb   : > { %8635 = vmatpush3.bf16.msra.mxu0 %v9797_v22  ;;  %v9799_v22 = vld [vmem:[%s11659_s1 + $0x208] sm:$0xff]  }
 0x1cc   : > { %8668 = vmatprep.subr.bf16.mxu0 %v9798_v28 }
 0x1cd   : > { %8719 = vmatpush3.bf16.msra.mxu1 %v9807_v23  ;;  %v3337_v23 = vld [vmem:[#allocation2 + $0x29] sm:$0xff] }
 0x1ce   : > { %8605 = vmatmul.mubr.msk.bf16.gmra.mrb[16].mxu0 %vm10206_vm11, %v7226_v36  ;;  %vm11956_vm11 = vnez %v11874_v33  ;;  %v9803_v36 = vld [vmem:[%s11659_s1 + $0x228] sm:$0xff]  }
 0x1cf   : > { %8608 = vmatprep.mubr.msk.bf16.mxu0 %vm11921_vm1, %v7229_v24  ;;  %vm11957_vm1 = vnez %v11877_v0  ;;  %v11962_v24 = vld [vmem:[#allocation51_spill] sm:$0xff] }
 0x1d6   : > { %8609 = vmatmul.mubr.msk.bf16.gmra.mrb[20].mxu0 %vm11954_vm13, %v7232_v12  ;;  %v3053_v12 = vld [vmem:[#allocation2 + $0xd8] sm:$0xff] }
 0x1d7   : > { %8612 = vmatprep.mubr.msk.bf16.mxu0 %vm11955_vm14, %v7235_v8  ;;  %v3054_v8 = vld [vmem:[#allocation2 + $0xe0] sm:$0xff]  ;;  %vm11967_vm14 = vnez %v11891_v41 }
 0x1de   : > { %8613 = vmatmul.mubr.msk.bf16.gmra.mrb[24].mxu0 %vm11956_vm11, %v7238_v57  ;;  %v3074_v57 = vpack.c.bf16 %v3054_v8, %v3053_v12  ;;  %vm11965_vm11 = vnez %v11887_v3  ;;  %v3348_v12 = vld [vmem:[#allocation2 + $0x81] sm:$0xff]  ;;  %v3349_v8 = vld [vmem:[#allocation2 + $0x89] sm:$0xff] }
 0x1df   : > { %8616 = vmatprep.mubr.msk.bf16.mxu0 %vm11957_vm1, %v10613_v54  ;;  %v9808_v54 = vld [vmem:[%s11659_s1 + $0x250] sm:$0xff]   ;;  %vm11964_vm1 = vnez %v11885_v59 }
 0x1e0   : > { %8720 = vmatprep.subr.bf16.mxu1 %v9808_v54 }
 0x1e1   : > { %8721 = vmatpush3.bf16.msra.mxu1 %v9808_v54  ;;  %v3338_v54 = vld [vmem:[#allocation2 + $0x31] sm:$0xff] }
 0x1e2   : > { %8722 = vmatprep.subr.bf16.mxu1 %v9809_v58 }
 0x1e5   : > { %8723 = vmatpush3.bf16.msra.mxu1 %v9809_v58  ;;  %v7295_v58 = vpack.c.bf16 %v3338_v54, %v3337_v23  ;;  %v3355_v23 = vld [vmem:[#allocation2 + $0xb9] sm:$0xff]  ;;  %v3356_v54 = vld [vmem:[#allocation2 + $0xc1] sm:$0xff] }
 0x1e6   : > { %8617 = vmatmul.mubr.msk.bf16.gmra.mrb[28].mxu0 %vm11958_vm10, %v7244_v38  ;;  %vm11963_vm10 = vnez %v11883_v5 }
 0x1e7   : > { %8636 = vmatprep.mubr.bf16.mxu0 %v10618_v18  ;;  %v11959_v18 = vld [vmem:[#allocation38_spill] sm:$0xff] }
 0x1ee   : > { %8637 = vmatmul.mubr.bf16.vlgmr.msra.gmra.mrb[0].mxu0 %v10620_v44  ;;  %v9801_v44 = vld [vmem:[%s11659_s1 + $0x218] sm:$0xff]  }
 0x1ef   : > { %8669 = vmatpush3.bf16.msra.mxu0 %v9798_v28  ;;  %8640 = vmatprep.mubr.bf16.mxu0 %v11959_v18  ;;  %v9802_v28 = vld [vmem:[%s11659_s1 + $0x220] sm:$0xff]  }
 0x1f0   : > { %8670 = vmatprep.subr.bf16.mxu0 %v9799_v22  ;;  %v3339_v18 = vld [vmem:[#allocation2 + $0x39] sm:$0xff] }
 0x1f3   : > { %8671 = vmatpush3.bf16.msra.mxu0 %v9799_v22 }
 0x1f4   : > { %8672 = vmatprep.subr.bf16.mxu0 %v9800_v42 }
 0x1f6   : > { %8641 = vmatmul.mubr.bf16.gmra.mrb[4].mxu0 %v11960_v39  ;;  %v3342_v39 = vld [vmem:[#allocation2 + $0x51] sm:$0xff] }
 0x1f7   : > { %8644 = vmatprep.mubr.bf16.mxu0 %v11961_v56  ;;  %8673 = vmatpush3.bf16.msra.mxu0 %v9800_v42  ;;  %v3340_v42 = vld [vmem:[#allocation2 + $0x41] sm:$0xff] }
 0x1f8   : > { %8674 = vmatprep.subr.bf16.mxu0 %v9801_v44  ;;  %v7298_v56 = vpack.c.bf16 %v3340_v42, %v3339_v18  ;;  %v7322_v18 = vpack.c.bf16 %v3356_v54, %v3355_v23 }
 0x1fb   : > { %8675 = vmatpush3.bf16.msra.mxu0 %v9801_v44  ;;  %v3341_v44 = vld [vmem:[#allocation2 + $0x49] sm:$0xff] }
 0x1fc   : > { %8676 = vmatprep.subr.bf16.mxu0 %v9802_v28 }
 0x1fe   : > { %8645 = vmatmul.mubr.bf16.gmra.mrb[8].mxu0 %v11962_v24  ;;  %v3344_v24 = vld [vmem:[#allocation2 + $0x61] sm:$0xff] }
 0x1ff   : > { %8648 = vmatprep.mubr.bf16.mxu0 %v10654_v46  ;;  %8677 = vmatpush3.bf16.msra.mxu0 %v9802_v28  ;;  %v3073_v46 = vpack.c.bf16 %v3052_v47, %v3051_v27  ;;  %v7301_v28 = vpack.c.bf16 %v3342_v39, %v3341_v44  ;;  %v3359_v44 = vld [vmem:[#allocation2 + $0xd9] sm:$0xff]  ;;  %v3360_v39 = vld [vmem:[#allocation2 + $0xe1] sm:$0xff] }
 0x200   : > { %8678 = vmatprep.subr.bf16.mxu0 %v9803_v36 }
 0x203   : > { %8679 = vmatpush3.bf16.msra.mxu0 %v9803_v36  ;;  %v3343_v36 = vld [vmem:[#allocation2 + $0x59] sm:$0xff] }
 0x204   : > { %8680 = vmatprep.subr.bf16.mxu0 %v9804_v1  ;;  %v7304_v27 = vpack.c.bf16 %v3344_v24, %v3343_v36  ;;  %v7328_v36 = vpack.c.bf16 %v3360_v39, %v3359_v44 }
 0x206   : > { %8649 = vmatmul.mubr.bf16.gmra.mrb[12].mxu0 %v10656_v51  ;;  %v3057_v51 = vld [vmem:[#allocation2 + $0xf8] sm:$0xff] }
 0x207   : > { %8652 = vmatprep.mubr.bf16.mxu0 %v10666_v49  ;;  %8681 = vmatpush3.bf16.msra.mxu0 %v9804_v1  ;;  %v3059_v49 = vld [vmem:[#allocation2 + $0x108] sm:$0xff]  ;;  %v3076_v38 = vpack.c.bf16 %v3058_v2, %v3057_v51 }
 0x208   : > { %8682 = vmatprep.subr.bf16.mxu0 %v9805_v25  ;;  %v3077_v52 = vpack.c.bf16 %v10339_v60, %v3059_v49  ;;  %v3345_v1 = vld [vmem:[#allocation2 + $0x69] sm:$0xff]  ;;  %v3352_v51 = vld [vmem:[#allocation2 + $0xa1] sm:$0xff]  ;;  %v3354_v49 = vld [vmem:[#allocation2 + $0xb1] sm:$0xff] }
 0x209   : > { %v3353_v2 = vld [vmem:[#allocation2 + $0xa9] sm:$0xff] }
 0x20b   : > { %8683 = vmatpush3.bf16.msra.mxu0 %v9805_v25  ;;  %v3346_v25 = vld [vmem:[#allocation2 + $0x71] sm:$0xff] }
 0x20c   : > { %v7307_v47 = vpack.c.bf16 %v3346_v25, %v3345_v1  ;;  %v3363_v1 = vld [vmem:[#allocation2 + $0xf9] sm:$0xff]  ;;  %v3364_v25 = vld [vmem:[#allocation2 + $0x101] sm:$0xff] }
 0x20e   : > { %8653 = vmatmul.mubr.bf16.gmra.mrb[16].mxu0 %v10668_v4  ;;  %v9879_v4 = vld [vmem:[#allocation2] sm:$0xff] }
 0x20f   : > { %8656 = vmatprep.mubr.bf16.mxu0 %v3073_v46  ;;  %v10855_v22 = vpack.c.bf16 %v9879_v4, %v9879_v4  ;;  %v3347_v46 = vld [vmem:[#allocation2 + $0x79] sm:$0xff]  ;;  %v3357_v4 = vld [vmem:[#allocation2 + $0xc9] sm:$0xff] }
 0x210   : > { %v7310_v20 = vpack.c.bf16 %v3348_v12, %v3347_v46  ;;  %v3368_v46 = vld [vmem:[#allocation2 + $0x121] sm:$0xff] }
 0x216   : > { %8657 = vmatmul.mubr.bf16.gmra.mrb[20].mxu0 %v3074_v57  ;;  %v7313_v57 = vpack.c.bf16 %v3350_v14, %v3349_v8  ;;  %v9810_v8 = vld [vmem:[%s11659_s1 + $0x260] sm:$0xff]   ;;  %v9811_v14 = vld [vmem:[%s11659_s1 + $0x268] sm:$0xff]  }
 0x217   : > { %8660 = vmatprep.mubr.bf16.mxu0 %v3075_v40  ;;  %v3351_v40 = vld [vmem:[#allocation2 + $0x99] sm:$0xff]  ;;  %8724 = vmatprep.subr.bf16.mxu1 %v9810_v8 }
 0x218   : > { %8725 = vmatpush3.bf16.msra.mxu1 %v9810_v8 }
 0x219   : > { %8726 = vmatprep.subr.bf16.mxu1 %v9811_v14 }
 0x21c   : > { %8727 = vmatpush3.bf16.msra.mxu1 %v9811_v14 }
 0x21e   : > { %8661 = vmatmul.mubr.bf16.gmra.mrb[24].mxu0 %v3076_v38  ;;  %v7316_v38 = vpack.c.bf16 %v3352_v51, %v3351_v40  ;;  %v3748_v40 = vld [vmem:[#allocation2 + $0xf] sm:$0xff] }
 0x21f   : > { %8664 = vmatprep.mubr.bf16.mxu0 %v3077_v52  ;;  %v7319_v52 = vpack.c.bf16 %v3354_v49, %v3353_v2  ;;  %v9814_v2 = vld [vmem:[%s11659_s1 + $0x280] sm:$0xff]  }
 0x220   : > { %v10911_v49 = vld [vmem:[%s11660_s2] ss:$0 sm:$0xff] }
 0x226   : > { %8665 = vmatmul.mubr.bf16.gmra.mrb[28].mxu0 %v10855_v22 }
 0x227   : > { %8684 = vmatprep.mubr.msk.bf16.mxu0 %vm11963_vm10, %v7295_v58  ;;  %vm11966_vm10 = vnez %v11889_v35  ;;  %v3358_v58 = vld [vmem:[#allocation2 + $0xd1] sm:$0xff] }
 0x228   : > { %v7325_v42 = vpack.c.bf16 %v3358_v58, %v3357_v4 }
 0x22e   : > { %8685 = vmatmul.mubr.msk.bf16.vlgmr.msra.gmra.mrb[0].mxu0 %vm11964_vm1, %v7298_v56  ;;  %vm11969_vm1 = vnez %v11895_v6  ;;  %v3361_v56 = vld [vmem:[#allocation2 + $0xe9] sm:$0xff] }
 0x22f   : > { %8688 = vmatprep.mubr.msk.bf16.mxu0 %vm11965_vm11, %v7301_v28  ;;  %vm11968_vm11 = vnez %v11893_v31  ;;  %v3362_v28 = vld [vmem:[#allocation2 + $0xf1] sm:$0xff] }
 0x230   : > { %v7331_v24 = vpack.c.bf16 %v3362_v28, %v3361_v56 }
 0x236   : > { %8689 = vmatmul.mubr.msk.bf16.gmra.mrb[4].mxu0 %vm11966_vm10, %v7304_v27  ;;  %vm11971_vm10 = vnez %v11899_v62  ;;  %v7334_v27 = vpack.c.bf16 %v3364_v25, %v3363_v1 }
 0x237   : > { %8692 = vmatprep.mubr.msk.bf16.mxu0 %vm11967_vm14, %v7307_v47  ;;  %vm11970_vm14 = vnez %v11897_v17  ;;  %v3367_v47 = vld [vmem:[#allocation2 + $0x119] sm:$0xff] }
 0x238   : > { %v7340_v12 = vpack.c.bf16 %v3368_v46, %v3367_v47 }
 0x23e   : > { %8693 = vmatmul.mubr.msk.bf16.gmra.mrb[8].mxu0 %vm11968_vm11, %v7310_v20  ;;  %v9813_v20 = vld [vmem:[%s11659_s1 + $0x278] sm:$0xff]  }
 0x23f   : > { %8696 = vmatprep.mubr.msk.bf16.mxu0 %vm11969_vm1, %v7313_v57  ;;  %v3747_v57 = vld [vmem:[#allocation2 + $0x7] sm:$0xff] }
 0x240   : > { %v7369_v51 = vpack.c.bf16 %v3748_v40, %v3747_v57 }
 0x242   : > { %8732 = vmatprep.mubr.msk.bf16.mxu1 %vm9939_vm2, %v7369_v51 }
 0x246   : > { %8697 = vmatmul.mubr.msk.bf16.gmra.mrb[12].mxu0 %vm11970_vm14, %v7316_v38 }
 0x247   : > { %8700 = vmatprep.mubr.msk.bf16.mxu0 %vm11971_vm10, %v7319_v52 }
 0x24e   : > { %8701 = vmatmul.mubr.msk.bf16.gmra.mrb[16].mxu0 %vm11946_vm7, %v7322_v18 }
 0x24f   : > { %8704 = vmatprep.mubr.msk.bf16.mxu0 %vm11948_vm12, %v7325_v42 }
 0x256   : > { %8705 = vmatmul.mubr.msk.bf16.gmra.mrb[20].mxu0 %vm11949_vm3, %v7328_v36 }
 0x257   : > { %8708 = vmatprep.mubr.msk.bf16.mxu0 %vm11951_vm4, %v7331_v24 }
 0x25e   : > { %8709 = vmatmul.mubr.msk.bf16.gmra.mrb[24].mxu0 %vm10517_vm8, %v7334_v27 }
 0x25f   : > { %8712 = vmatprep.mubr.msk.bf16.mxu0 %vm10524_vm0, %v10749_v63  ;;  %v9812_v63 = vld [vmem:[%s11659_s1 + $0x270] sm:$0xff]  }
 0x260   : > { %8728 = vmatprep.subr.bf16.mxu1 %v9812_v63 }
 0x261   : > { %8729 = vmatpush3.bf16.msra.mxu1 %v9812_v63 }
 0x262   : > { %8730 = vmatprep.subr.bf16.mxu1 %v9813_v20 }
 0x265   : > { %8731 = vmatpush3.bf16.msra.mxu1 %v9813_v20 }
 0x266   : > { %8713 = vmatmul.mubr.msk.bf16.gmra.mrb[28].mxu0 %vm10537_vm15, %v7340_v12  ;;  %8764 = vmatprep.subr.bf16.mxu1 %v9814_v2 }
 0x301   : > { %v8686_v38 = vpop.f32.mrb[0].mxu0 }
 0x302   : > { %v9148_v52 = vadd.f32 %v8686_v38, %v10911_v49  ;;  %v3516_v23 = vpop.f32.mrb[1].mxu0 }
 0x303   : > { %v9149_v54 = vadd.f32 %v10911_v49, %v3516_v23  ;;  %v8687_v4 = vpop.f32.mrb[2].mxu0 }
 0x304   : > { %v3677_v58 = vmax.f32 %v9148_v52, 0.0  ;;  %v9150_v18 = vadd.f32 %v8687_v4, %v10911_v49  ;;  %v3519_v42 = vpop.f32.mrb[3].mxu0 }
 0x305   : > { %v3675_v44 = vmax.f32 %v9149_v54, 0.0  ;;  %v9151_v39 = vadd.f32 %v10911_v49, %v3519_v42  ;;  %v9815_v42 = vld [vmem:[%s11659_s1 + $0x288] sm:$0xff]  }
 0x306   : > { %3709 = vst [vmem:[#allocation2 + $0x28] sm:$0xff] %v3677_v58  ;;  %v3678_v56 = vmax.f32 %v9150_v18, 0.0 }
 0x307   : > { %3707 = vst [vmem:[#allocation2 + $0x18] sm:$0xff] %v3675_v44  ;;  %v3676_v28 = vmax.f32 %v9151_v39, 0.0 }
 0x308   : > { %3710 = vst [vmem:[#allocation2 + $0x30] sm:$0xff] %v3678_v56  ;;  %v10917_v36 = vpack.c.bf16 %v3678_v56, %v3677_v58 }
 0x309   : > { %3708 = vst [vmem:[#allocation2 + $0x20] sm:$0xff] %v3676_v28  ;;  %v8690_v24 = vpop.f32.mrb[4].mxu0  ;;  %v10919_v1 = vpack.c.bf16 %v3676_v28, %v3675_v44 }
 0x30a   : > { %v9152_v25 = vadd.f32 %v8690_v24, %v10911_v49  ;;  %v3532_v27 = vpop.f32.mrb[5].mxu0 }
 0x30b   : > { %v9153_v47 = vadd.f32 %v10911_v49, %v3532_v27  ;;  %v8691_v46 = vpop.f32.mrb[6].mxu0 }
 0x30c   : > { %v3681_v12 = vmax.f32 %v9152_v25, 0.0  ;;  %v9154_v8 = vadd.f32 %v8691_v46, %v10911_v49  ;;  %v3535_v14 = vpop.f32.mrb[7].mxu0 }
 0x30d   : > { %v3679_v63 = vmax.f32 %v9153_v47, 0.0  ;;  %v9155_v20 = vadd.f32 %v10911_v49, %v3535_v14 }
 0x30e   : > { %3713 = vst [vmem:[#allocation2 + $0x48] sm:$0xff] %v3681_v12  ;;  %v3682_v57 = vmax.f32 %v9154_v8, 0.0  ;;  %v3749_v38 = vld [vmem:[#allocation2 + $0x17] sm:$0xff] }
 0x30f   : > { %3711 = vst [vmem:[#allocation2 + $0x38] sm:$0xff] %v3679_v63  ;;  %v3680_v40 = vmax.f32 %v9155_v20, 0.0  ;;  %v3752_v51 = vld [vmem:[#allocation2 + $0x2f] sm:$0xff] }
 0x310   : > { %3714 = vst [vmem:[#allocation2 + $0x50] sm:$0xff] %v3682_v57  ;;  %v3750_v52 = vld [vmem:[#allocation2 + $0x1f] sm:$0xff]  ;;  %v3751_v23 = vld [vmem:[#allocation2 + $0x27] sm:$0xff]  ;;  %v10925_v54 = vpack.c.bf16 %v3682_v57, %v3681_v12  ;;  %v9816_v8 = vld [vmem:[%s11659_s1 + $0x290] sm:$0xff]  }
 0x311   : > { %3712 = vst [vmem:[#allocation2 + $0x40] sm:$0xff] %v3680_v40  ;;  %v8694_v4 = vpop.f32.mrb[8].mxu0  ;;  %v10927_v58 = vpack.c.bf16 %v3750_v52, %v3749_v38  ;;  %v10929_v18 = vpack.c.bf16 %v3752_v51, %v3751_v23  ;;  %v10934_v44 = vpack.c.bf16 %v3680_v40, %v3679_v63 }
 0x312   : > { %v9156_v39 = vadd.f32 %v8694_v4, %v10911_v49  ;;  %v3548_v56 = vpop.f32.mrb[9].mxu0  ;;  %v9817_v4 = vld [vmem:[%s11659_s1 + $0x298] sm:$0xff]  }
 0x313   : > { %v9157_v28 = vadd.f32 %v10911_v49, %v3548_v56  ;;  %v8695_v24 = vpop.f32.mrb[10].mxu0  ;;  %8733 = vmatmul.mubr.msk.bf16.vlgmr.msra.gmra.mrb[0].mxu1 %vm10062_vm5, %v10927_v58 }
 0x314   : > { %v3685_v25 = vmax.f32 %v9156_v39, 0.0  ;;  %v9158_v27 = vadd.f32 %v8695_v24, %v10911_v49  ;;  %v3551_v47 = vpop.f32.mrb[11].mxu0  ;;  %8736 = vmatprep.mubr.msk.bf16.mxu1 %vm10075_vm6, %v10929_v18  ;;  %8765 = vmatpush3.bf16.msra.mxu1 %v9814_v2  ;;  %vm11973_vm6 = vnez %v11846_v11 }
 0x315   : > { %v3683_v46 = vmax.f32 %v9157_v28, 0.0  ;;  %v9159_v12 = vadd.f32 %v10911_v49, %v3551_v47  ;;  %8766 = vmatprep.subr.bf16.mxu1 %v9815_v42 }
 0x316   : > { %3717 = vst [vmem:[#allocation2 + $0x68] sm:$0xff] %v3685_v25  ;;  %v3686_v14 = vmax.f32 %v9158_v27, 0.0  ;;  %v3753_v57 = vld [vmem:[#allocation2 + $0x37] sm:$0xff] }
 0x317   : > { %3715 = vst [vmem:[#allocation2 + $0x58] sm:$0xff] %v3683_v46  ;;  %v10949_v63 = vmax.f32 %v9159_v12, 0.0  ;;  %v3756_v20 = vld [vmem:[#allocation2 + $0x4f] sm:$0xff] }
 0x318   : > { %3718 = vst [vmem:[#allocation2 + $0x70] sm:$0xff] %v3686_v14  ;;  %v3754_v40 = vld [vmem:[#allocation2 + $0x3f] sm:$0xff]  ;;  %v3755_v51 = vld [vmem:[#allocation2 + $0x47] sm:$0xff]  ;;  %8767 = vmatpush3.bf16.msra.mxu1 %v9815_v42  ;;  %v10951_v2 = vpack.c.bf16 %v3686_v14, %v3685_v25 }
 0x319   : > { %11972 = vst [vmem:[#allocation47_spill] sm:$0xff] %v10949_v63  ;;  %3716 = vst [vmem:[#allocation2 + $0x60] sm:$0xff] %v10949_v63  ;;  %v8698_v38 = vpop.f32.mrb[12].mxu0  ;;  %v10954_v52 = vpack.c.bf16 %v3754_v40, %v3753_v57  ;;  %v10956_v23 = vpack.c.bf16 %v3756_v20, %v3755_v51  ;;  %8768 = vmatprep.subr.bf16.mxu1 %v9816_v8  ;;  %v10962_v39 = vpack.c.bf16 %v10949_v63, %v3683_v46  ;;  %v9818_v14 = vld [vmem:[%s11659_s1 + $0x2a0] sm:$0xff]  }
 0x31a   : > { %v9160_v56 = vadd.f32 %v8698_v38, %v10911_v49  ;;  %v3564_v42 = vpop.f32.mrb[13].mxu0 }
 0x31b   : > { %v9161_v28 = vadd.f32 %v10911_v49, %v3564_v42  ;;  %v8699_v24 = vpop.f32.mrb[14].mxu0  ;;  %8737 = vmatmul.mubr.msk.bf16.gmra.mrb[4].mxu1 %vm10115_vm9, %v10954_v52  ;;  %vm11977_vm9 = vnez %v11851_v45 }
 0x31c   : > { %v3689_v25 = vmax.f32 %v9160_v56, 0.0  ;;  %v9162_v27 = vadd.f32 %v8699_v24, %v10911_v49  ;;  %v3567_v47 = vpop.f32.mrb[15].mxu0  ;;  %8740 = vmatprep.mubr.msk.bf16.mxu1 %vm11973_vm6, %v10956_v23  ;;  %8769 = vmatpush3.bf16.msra.mxu1 %v9816_v8  ;;  %vm11976_vm6 = vnez %v11848_v43 }
 0x31d   : > { %v3687_v46 = vmax.f32 %v9161_v28, 0.0  ;;  %v9163_v12 = vadd.f32 %v10911_v49, %v3567_v47  ;;  %8770 = vmatprep.subr.bf16.mxu1 %v9817_v4 }
 0x31e   : > { %3721 = vst [vmem:[#allocation2 + $0x88] sm:$0xff] %v3689_v25  ;;  %v10977_v20 = vmax.f32 %v9162_v27, 0.0  ;;  %v3757_v51 = vld [vmem:[#allocation2 + $0x57] sm:$0xff]  ;;  %v9819_v27 = vld [vmem:[%s11659_s1 + $0x2a8] sm:$0xff]  }
 0x31f   : > { %3719 = vst [vmem:[#allocation2 + $0x78] sm:$0xff] %v3687_v46  ;;  %v3688_v57 = vmax.f32 %v9163_v12, 0.0  ;;  %v3760_v40 = vld [vmem:[#allocation2 + $0x6f] sm:$0xff] }
 0x320   : > { %11974 = vst [vmem:[#allocation49_spill] sm:$0xff] %v10977_v20  ;;  %3722 = vst [vmem:[#allocation2 + $0x90] sm:$0xff] %v10977_v20  ;;  %v3758_v38 = vld [vmem:[#allocation2 + $0x5f] sm:$0xff]  ;;  %v3759_v56 = vld [vmem:[#allocation2 + $0x67] sm:$0xff]  ;;  %8771 = vmatpush3.bf16.msra.mxu1 %v9817_v4  ;;  %v10981_v8 = vpack.c.bf16 %v10977_v20, %v3689_v25 }
 0x321   : > { %3720 = vst [vmem:[#allocation2 + $0x80] sm:$0xff] %v3688_v57  ;;  %v8702_v42 = vpop.f32.mrb[16].mxu0  ;;  %v10983_v28 = vpack.c.bf16 %v3758_v38, %v3757_v51  ;;  %v10985_v24 = vpack.c.bf16 %v3760_v40, %v3759_v56  ;;  %8772 = vmatprep.subr.bf16.mxu1 %v9818_v14  ;;  %v10990_v47 = vpack.c.bf16 %v3688_v57, %v3687_v46 }
 0x322   : > { %v9164_v12 = vadd.f32 %v8702_v42, %v10911_v49  ;;  %v3580_v60 = vpop.f32.mrb[17].mxu0 }
 0x323   : > { %11975 = vst [vmem:[#allocation38_spill] sm:$0xff] %v10985_v24  ;;  %v9165_v4 = vadd.f32 %v10911_v49, %v3580_v60  ;;  %v8703_v25 = vpop.f32.mrb[18].mxu0  ;;  %8741 = vmatmul.mubr.msk.bf16.gmra.mrb[8].mxu1 %vm11976_vm6, %v10983_v28  ;;  %v9820_v60 = vld [vmem:[%s11659_s1 + $0x2b0] sm:$0xff]   ;;  %vm11981_vm6 = vnez %v11857_v30 }
 0x324   : > { %v3693_v51 = vmax.f32 %v9164_v12, 0.0  ;;  %v9166_v40 = vadd.f32 %v8703_v25, %v10911_v49  ;;  %v3583_v38 = vpop.f32.mrb[19].mxu0  ;;  %8744 = vmatprep.mubr.msk.bf16.mxu1 %vm11977_vm9, %v10985_v24  ;;  %8773 = vmatpush3.bf16.msra.mxu1 %v9818_v14  ;;  %vm11980_vm9 = vnez %v11854_v26 }
 0x325   : > { %v3691_v46 = vmax.f32 %v9165_v4, 0.0  ;;  %v9167_v57 = vadd.f32 %v10911_v49, %v3583_v38  ;;  %8774 = vmatprep.subr.bf16.mxu1 %v9819_v27 }
 0x326   : > { %3725 = vst [vmem:[#allocation2 + $0xa8] sm:$0xff] %v3693_v51  ;;  %v3694_v56 = vmax.f32 %v9166_v40, 0.0  ;;  %v3761_v25 = vld [vmem:[#allocation2 + $0x77] sm:$0xff] }
 0x327   : > { %3723 = vst [vmem:[#allocation2 + $0x98] sm:$0xff] %v3691_v46  ;;  %v3692_v42 = vmax.f32 %v9167_v57, 0.0  ;;  %v3764_v12 = vld [vmem:[#allocation2 + $0x8f] sm:$0xff]  ;;  %v9821_v40 = vld [vmem:[%s11659_s1 + $0x2b8] sm:$0xff]  }
 0x328   : > { %3726 = vst [vmem:[#allocation2 + $0xb0] sm:$0xff] %v3694_v56  ;;  %v3762_v13 = vld [vmem:[#allocation2 + $0x7f] sm:$0xff]  ;;  %v3763_v20 = vld [vmem:[#allocation2 + $0x87] sm:$0xff]  ;;  %8775 = vmatpush3.bf16.msra.mxu1 %v9819_v27  ;;  %v11005_v63 = vpack.c.bf16 %v3694_v56, %v3693_v51 }
 0x329   : > { %3724 = vst [vmem:[#allocation2 + $0xa0] sm:$0xff] %v3692_v42  ;;  %v8706_v14 = vpop.f32.mrb[20].mxu0  ;;  %v11007_v4 = vpack.c.bf16 %v3762_v13, %v3761_v25  ;;  %v11009_v38 = vpack.c.bf16 %v3764_v12, %v3763_v20  ;;  %8776 = vmatprep.subr.bf16.mxu1 %v9820_v60  ;;  %v11014_v57 = vpack.c.bf16 %v3692_v42, %v3691_v46 }
 0x32a   : > { %v9168_v45 = vadd.f32 %v8706_v14, %v10911_v49  ;;  %v3596_v43 = vpop.f32.mrb[21].mxu0 }
 0x32b   : > { %11978 = vst [vmem:[#allocation41_spill] sm:$0xff] %v11007_v4  ;;  %11979 = vst [vmem:[#allocation50_spill] sm:$0xff] %v11009_v38  ;;  %v9169_v27 = vadd.f32 %v10911_v49, %v3596_v43  ;;  %v8707_v51 = vpop.f32.mrb[22].mxu0  ;;  %8745 = vmatmul.mubr.msk.bf16.gmra.mrb[12].mxu1 %vm11980_vm9, %v11007_v4  ;;  %v11029_v43 = vld [vmem:[%s11659_s1 + $0x2c0] sm:$0xff]   ;;  %vm11985_vm9 = vnez %v11920_v53 }
 0x32c   : > { %v3697_v13 = vmax.f32 %v9168_v45, 0.0  ;;  %v9170_v20 = vadd.f32 %v8707_v51, %v10911_v49  ;;  %v3599_v56 = vpop.f32.mrb[23].mxu0  ;;  %8748 = vmatprep.mubr.msk.bf16.mxu1 %vm11981_vm6, %v11009_v38  ;;  %8777 = vmatpush3.bf16.msra.mxu1 %v9820_v60  ;;  %vm11984_vm6 = vnez %v11919_v21 }
 0x32d   : > { %v3695_v46 = vmax.f32 %v9169_v27, 0.0  ;;  %v9171_v42 = vadd.f32 %v10911_v49, %v3599_v56  ;;  %8778 = vmatprep.subr.bf16.mxu1 %v9821_v40 }
 0x32e   : > { %3729 = vst [vmem:[#allocation2 + $0xc8] sm:$0xff] %v3697_v13  ;;  %v3698_v12 = vmax.f32 %v9170_v20, 0.0  ;;  %v3765_v14 = vld [vmem:[#allocation2 + $0x97] sm:$0xff] }
 0x32f   : > { %3727 = vst [vmem:[#allocation2 + $0xb8] sm:$0xff] %v3695_v46  ;;  %v3696_v45 = vmax.f32 %v9171_v42, 0.0  ;;  %v3768_v25 = vld [vmem:[#allocation2 + $0xaf] sm:$0xff] }
 0x330   : > { %3730 = vst [vmem:[#allocation2 + $0xd0] sm:$0xff] %v3698_v12  ;;  %v3766_v51 = vld [vmem:[#allocation2 + $0x9f] sm:$0xff]  ;;  %v3767_v30 = vld [vmem:[#allocation2 + $0xa7] sm:$0xff]  ;;  %8779 = vmatpush3.bf16.msra.mxu1 %v9821_v40  ;;  %v11031_v60 = vpack.c.bf16 %v3698_v12, %v3697_v13 }
 0x331   : > { %3728 = vst [vmem:[#allocation2 + $0xc0] sm:$0xff] %v3696_v45  ;;  %v8710_v27 = vpop.f32.mrb[24].mxu0  ;;  %v11033_v56 = vpack.c.bf16 %v3766_v51, %v3765_v14  ;;  %v11035_v26 = vpack.c.bf16 %v3768_v25, %v3767_v30  ;;  %8812 = vmatprep.subr.bf16.mxu1 %v11029_v43  ;;  %v11038_v38 = vpack.c.bf16 %v3696_v45, %v3695_v46 }
 0x332   : > { %v9172_v20 = vadd.f32 %v8710_v27, %v10911_v49  ;;  %v3612_v42 = vpop.f32.mrb[25].mxu0 }
 0x333   : > { %11982 = vst [vmem:[#allocation51_spill] sm:$0xff] %v11033_v56  ;;  %11983 = vst [vmem:[#allocation53_spill] sm:$0xff] %v11035_v26  ;;  %v9173_v4 = vadd.f32 %v10911_v49, %v3612_v42  ;;  %v8711_v24 = vpop.f32.mrb[26].mxu0  ;;  %8749 = vmatmul.mubr.msk.bf16.gmra.mrb[16].mxu1 %vm11984_vm6, %v11033_v56  ;;  %vm11989_vm6 = vnez %v11880_v32 }
 0x334   : > { %v3701_v40 = vmax.f32 %v9172_v20, 0.0  ;;  %v9174_v13 = vadd.f32 %v8711_v24, %v10911_v49  ;;  %v3615_v12 = vpop.f32.mrb[27].mxu0  ;;  %8752 = vmatprep.mubr.msk.bf16.mxu1 %vm11985_vm9, %v11035_v26  ;;  %vm11986_vm9 = vnez %v11925_v61 }
 0x335   : > { %v3699_v30 = vmax.f32 %v9173_v4, 0.0  ;;  %v9175_v46 = vadd.f32 %v10911_v49, %v3615_v12 }
 0x336   : > { %3733 = vst [vmem:[#allocation2 + $0xe8] sm:$0xff] %v3701_v40  ;;  %v3702_v45 = vmax.f32 %v9174_v13, 0.0  ;;  %v3769_v51 = vld [vmem:[#allocation2 + $0xb7] sm:$0xff] }
 0x337   : > { %3731 = vst [vmem:[#allocation2 + $0xd8] sm:$0xff] %v3699_v30  ;;  %v3700_v25 = vmax.f32 %v9175_v46, 0.0  ;;  %v3772_v14 = vld [vmem:[#allocation2 + $0xcf] sm:$0xff] }
 0x338   : > { %3734 = vst [vmem:[#allocation2 + $0xf0] sm:$0xff] %v3702_v45  ;;  %v3770_v27 = vld [vmem:[#allocation2 + $0xbf] sm:$0xff]  ;;  %v3771_v42 = vld [vmem:[#allocation2 + $0xc7] sm:$0xff]  ;;  %v11050_v20 = vpack.c.bf16 %v3702_v45, %v3701_v40 }
 0x339   : > { %3732 = vst [vmem:[#allocation2 + $0xe0] sm:$0xff] %v3700_v25  ;;  %v8714_v24 = vpop.f32.mrb[28].mxu0  ;;  %v11052_v21 = vpack.c.bf16 %v3770_v27, %v3769_v51  ;;  %v11054_v53 = vpack.c.bf16 %v3772_v14, %v3771_v42  ;;  %v11056_v4 = vpack.c.bf16 %v3700_v25, %v3699_v30 }
 0x33a   : > { %v9176_v12 = vadd.f32 %v8714_v24, %v10911_v49  ;;  %v3628_v13 = vpop.f32.mrb[29].mxu0 }
 0x33b   : > { %v9177_v46 = vadd.f32 %v10911_v49, %v3628_v13  ;;  %v8715_v26 = vpop.f32.mrb[30].mxu0  ;;  %8753 = vmatmul.mubr.msk.bf16.gmra.mrb[20].mxu1 %vm11954_vm13, %v11052_v21  ;;  %vm11988_vm13 = vnez %v11877_v0 }
 0x33c   : > { %v3705_v40 = vmax.f32 %v9176_v12, 0.0  ;;  %v9178_v45 = vadd.f32 %v8715_v26, %v10911_v49  ;;  %v3631_v56 = vpop.f32.mrb[31].mxu0  ;;  %8756 = vmatprep.mubr.msk.bf16.mxu1 %vm11986_vm9, %v11054_v53  ;;  %vm11987_vm9 = vnez %v11874_v33 }
 0x33d   : > { %v3703_v30 = vmax.f32 %v9177_v46, 0.0  ;;  %v9179_v25 = vadd.f32 %v10911_v49, %v3631_v56 }
 0x33e   : > { %3737 = vst [vmem:[#allocation2 + $0x108] sm:$0xff] %v3705_v40  ;;  %v3706_v14 = vmax.f32 %v9178_v45, 0.0  ;;  %v3773_v42 = vld [vmem:[#allocation2 + $0xd7] sm:$0xff] }
 0x33f   : > { %3735 = vst [vmem:[#allocation2 + $0xf8] sm:$0xff] %v3703_v30  ;;  %v3704_v51 = vmax.f32 %v9179_v25, 0.0  ;;  %v3776_v27 = vld [vmem:[#allocation2 + $0xef] sm:$0xff]  ;;  %v4394_v25 = vld [vmem:[#allocation2 + $0x21] sm:$0xff] }
 0x340   : > { %3738 = vst [vmem:[#allocation2 + $0x110] sm:$0xff] %v3706_v14  ;;  %v3774_v24 = vld [vmem:[#allocation2 + $0xdf] sm:$0xff]  ;;  %v3775_v13 = vld [vmem:[#allocation2 + $0xe7] sm:$0xff]  ;;  %v11068_v12 = vpack.c.bf16 %v3706_v14, %v3705_v40  ;;  %v9824_v45 = vld [vmem:[%s11659_s1 + $0x2d0] sm:$0xff]  }
 0x341   : > { %3736 = vst [vmem:[#allocation2 + $0x100] sm:$0xff] %v3704_v51  ;;  %v11070_v26 = vpack.c.bf16 %v3774_v24, %v3773_v42  ;;  %v11072_v15 = vpack.c.bf16 %v3776_v27, %v3775_v13  ;;  %v11074_v61 = vpack.c.bf16 %v3704_v51, %v3703_v30  ;;  %v9823_v40 = vld [vmem:[%s11659_s1 + $0x2c8] sm:$0xff]   ;;  %v4393_v30 = vld [vmem:[#allocation2 + $0x19] sm:$0xff]  ;;  %v4396_v14 = vld [vmem:[#allocation2 + $0x31] sm:$0xff] }
 0x342   : > { %v11130_v51 = vpack.c.bf16 %v4394_v25, %v4393_v30  ;;  %v4395_v27 = vld [vmem:[#allocation2 + $0x29] sm:$0xff] }
 0x343   : > { %8757 = vmatmul.mubr.msk.bf16.gmra.mrb[24].mxu1 %vm11987_vm9, %v11070_v26  ;;  %v9831_v42 = vld [vmem:[%s11659_s1 + $0x308] sm:$0xff]   ;;  %v11135_v24 = vpack.c.bf16 %v4396_v14, %v4395_v27  ;;  %vm11992_vm9 = vnez %v11887_v3  ;;  %v9832_v13 = vld [vmem:[%s11659_s1 + $0x310] sm:$0xff]   ;;  %v4405_v27 = vld [vmem:[#allocation2 + $0x79] sm:$0xff] }
 0x344   : > { %8760 = vmatprep.mubr.msk.bf16.mxu1 %vm11988_vm13, %v11072_v15  ;;  %vm11991_vm13 = vnez %v11885_v59  ;;  %v9835_v30 = vld [vmem:[%s11659_s1 + $0x328] sm:$0xff]   ;;  %v9836_v14 = vld [vmem:[%s11659_s1 + $0x330] sm:$0xff]  }
 0x345   : > { %v4419_v29 = vld [vmem:[#allocation2 + $0xe9] sm:$0xff] }
 0x346   : > { %v3777_v49 = vld [vmem:[#allocation2 + $0xf7] sm:$0xff] }
 0x348   : > { %v3778_v56 = vld [vmem:[#allocation2 + $0xff] sm:$0xff] }
 0x349   : > { %v11082_v46 = vpack.c.bf16 %v3778_v56, %v3777_v49  ;;  %v4397_v49 = vld [vmem:[#allocation2 + $0x39] sm:$0xff]  ;;  %v4398_v56 = vld [vmem:[#allocation2 + $0x41] sm:$0xff] }
 0x34b   : > { %8761 = vmatmul.mubr.msk.bf16.gmra.mrb[28].mxu1 %vm11989_vm6, %v11082_v46  ;;  %vm11990_vm6 = vnez %v11883_v5  ;;  %v6365_v5 = vld [vmem:[#allocation2 + $0x79] sm:$0xff] }
 0x34c   : > { %8780 = vmatprep.mubr.bf16.mxu1 %v10855_v22  ;;  %v9825_v22 = vld [vmem:[%s11659_s1 + $0x2d8] sm:$0xff]  }
 0x353   : > { %8781 = vmatmul.mubr.bf16.vlgmr.msra.gmra.mrb[0].mxu1 %v10919_v1  ;;  %v9827_v1 = vld [vmem:[%s11659_s1 + $0x2e8] sm:$0xff]  }
 0x354   : > { %8784 = vmatprep.mubr.bf16.mxu1 %v10917_v36  ;;  %8813 = vmatpush3.bf16.msra.mxu1 %v11029_v43  ;;  %v9826_v36 = vld [vmem:[%s11659_s1 + $0x2e0] sm:$0xff]  }
 0x355   : > { %8814 = vmatprep.subr.bf16.mxu1 %v9823_v40 }
 0x358   : > { %8815 = vmatpush3.bf16.msra.mxu1 %v9823_v40  ;;  %v4400_v40 = vld [vmem:[#allocation2 + $0x51] sm:$0xff] }
 0x359   : > { %8816 = vmatprep.subr.bf16.mxu1 %v9824_v45 }
 0x35b   : > { %8785 = vmatmul.mubr.bf16.gmra.mrb[4].mxu1 %v10934_v44  ;;  %v9829_v44 = vld [vmem:[%s11659_s1 + $0x2f8] sm:$0xff]  }
 0x35c   : > { %8788 = vmatprep.mubr.bf16.mxu1 %v10925_v54  ;;  %8817 = vmatpush3.bf16.msra.mxu1 %v9824_v45  ;;  %v9828_v54 = vld [vmem:[%s11659_s1 + $0x2f0] sm:$0xff]   ;;  %v11146_v45 = vpack.c.bf16 %v4398_v56, %v4397_v49 }
 0x35d   : > { %8818 = vmatprep.subr.bf16.mxu1 %v9825_v22  ;;  %v4407_v56 = vld [vmem:[#allocation2 + $0x89] sm:$0xff] }
 0x360   : > { %8819 = vmatpush3.bf16.msra.mxu1 %v9825_v22  ;;  %v4399_v22 = vld [vmem:[#allocation2 + $0x49] sm:$0xff] }
 0x361   : > { %8820 = vmatprep.subr.bf16.mxu1 %v9826_v36 }
 0x363   : > { %8789 = vmatmul.mubr.bf16.gmra.mrb[8].mxu1 %v10962_v39  ;;  %v4391_v39 = vld [vmem:[#allocation2 + $0x9] sm:$0xff] }
 0x364   : > { %8792 = vmatprep.mubr.bf16.mxu1 %v10951_v2  ;;  %8821 = vmatpush3.bf16.msra.mxu1 %v9826_v36  ;;  %v9830_v2 = vld [vmem:[%s11659_s1 + $0x300] sm:$0xff]   ;;  %v9833_v36 = vld [vmem:[%s11659_s1 + $0x318] sm:$0xff]  }
 0x365   : > { %8822 = vmatprep.subr.bf16.mxu1 %v9827_v1 }
 0x368   : > { %8823 = vmatpush3.bf16.msra.mxu1 %v9827_v1  ;;  %v11151_v1 = vpack.c.bf16 %v4400_v40, %v4399_v22  ;;  %v9837_v40 = vld [vmem:[%s11659_s1 + $0x338] sm:$0xff]  }
 0x369   : > { %8824 = vmatprep.subr.bf16.mxu1 %v9828_v54 }
 0x36b   : > { %8793 = vmatmul.mubr.bf16.gmra.mrb[12].mxu1 %v10990_v47 }
 0x36c   : > { %8796 = vmatprep.mubr.bf16.mxu1 %v10981_v8  ;;  %8825 = vmatpush3.bf16.msra.mxu1 %v9828_v54  ;;  %v4392_v8 = vld [vmem:[#allocation2 + $0x11] sm:$0xff]  ;;  %v9834_v54 = vld [vmem:[%s11659_s1 + $0x320] sm:$0xff]  }
 0x36d   : > { %8826 = vmatprep.subr.bf16.mxu1 %v9829_v44  ;;  %v7465_v43 = vpack.c.bf16 %v4392_v8, %v4391_v39  ;;  %v4404_v39 = vld [vmem:[#allocation2 + $0x71] sm:$0xff] }
 0x370   : > { %8827 = vmatpush3.bf16.msra.mxu1 %v9829_v44  ;;  %v4401_v44 = vld [vmem:[#allocation2 + $0x59] sm:$0xff] }
 0x371   : > { %8860 = vmatprep.subr.bf16.mxu1 %v9830_v2 }
 0x373   : > { %8797 = vmatmul.mubr.bf16.gmra.mrb[16].mxu1 %v11014_v57 }
 0x374   : > { %8800 = vmatprep.mubr.bf16.mxu1 %v11005_v63 }
 0x37b   : > { %8801 = vmatmul.mubr.bf16.gmra.mrb[20].mxu1 %v11038_v38 }
 0x37c   : > { %8804 = vmatprep.mubr.bf16.mxu1 %v11031_v60 }
 0x383   : > { %8805 = vmatmul.mubr.bf16.gmra.mrb[24].mxu1 %v11056_v4 }
 0x384   : > { %8808 = vmatprep.mubr.bf16.mxu1 %v11050_v20 }
 0x38b   : > { %8809 = vmatmul.mubr.bf16.gmra.mrb[28].mxu1 %v11074_v61 }
 0x38c   : > { %8828 = vmatprep.mubr.msk.bf16.mxu1 %vm11990_vm6, %v7465_v43  ;;  %v4403_v43 = vld [vmem:[#allocation2 + $0x69] sm:$0xff] }
 0x38d   : > { %v11167_v25 = vpack.c.bf16 %v4404_v39, %v4403_v43  ;;  %v4411_v43 = vld [vmem:[#allocation2 + $0xa9] sm:$0xff] }
 0x393   : > { %8829 = vmatmul.mubr.msk.bf16.vlgmr.msra.gmra.mrb[0].mxu1 %vm11991_vm13, %v11130_v51  ;;  %vm11994_vm13 = vnez %v11891_v41  ;;  %v6373_v41 = vld [vmem:[#allocation2 + $0xb9] sm:$0xff] }
 0x394   : > { %8832 = vmatprep.mubr.msk.bf16.mxu1 %vm11992_vm9, %v11135_v24  ;;  %8861 = vmatpush3.bf16.msra.mxu1 %v9830_v2  ;;  %vm11993_vm9 = vnez %v11889_v35  ;;  %v4402_v2 = vld [vmem:[#allocation2 + $0x61] sm:$0xff] }
 0x395   : > { %8862 = vmatprep.subr.bf16.mxu1 %v9831_v42  ;;  %v11162_v8 = vpack.c.bf16 %v4402_v2, %v4401_v44  ;;  %v4410_v44 = vld [vmem:[#allocation2 + $0xa1] sm:$0xff]  ;;  %v4412_v2 = vld [vmem:[#allocation2 + $0xb1] sm:$0xff] }
 0x398   : > { %8863 = vmatpush3.bf16.msra.mxu1 %v9831_v42  ;;  %v4406_v42 = vld [vmem:[#allocation2 + $0x81] sm:$0xff] }
 0x399   : > { %8864 = vmatprep.subr.bf16.mxu1 %v9832_v13  ;;  %v11178_v49 = vpack.c.bf16 %v4406_v42, %v4405_v27  ;;  %v4414_v27 = vld [vmem:[#allocation2 + $0xc1] sm:$0xff]  ;;  %v4416_v42 = vld [vmem:[#allocation2 + $0xd1] sm:$0xff] }
 0x39b   : > { %8833 = vmatmul.mubr.msk.bf16.gmra.mrb[4].mxu1 %vm11993_vm9, %v11146_v45 }
 0x39c   : > { %8836 = vmatprep.mubr.msk.bf16.mxu1 %vm11994_vm13, %v11151_v1  ;;  %8865 = vmatpush3.bf16.msra.mxu1 %v9832_v13  ;;  %v4408_v13 = vld [vmem:[#allocation2 + $0x91] sm:$0xff] }
 0x39d   : > { %8866 = vmatprep.subr.bf16.mxu1 %v9833_v36  ;;  %v11183_v22 = vpack.c.bf16 %v4408_v13, %v4407_v56  ;;  %v4415_v56 = vld [vmem:[#allocation2 + $0xc9] sm:$0xff] }
 0x3a0   : > { %8867 = vmatpush3.bf16.msra.mxu1 %v9833_v36  ;;  %v9838_v36 = vld [vmem:[%s11659_s1 + $0x340] sm:$0xff]  }
 0x3a1   : > { %8868 = vmatprep.subr.bf16.mxu1 %v9834_v54 }
 0x3a3   : > { %8837 = vmatmul.mubr.msk.bf16.gmra.mrb[8].mxu1 %vm11968_vm11, %v11162_v8 }
 0x3a4   : > { %8840 = vmatprep.mubr.msk.bf16.mxu1 %vm11969_vm1, %v11167_v25  ;;  %8869 = vmatpush3.bf16.msra.mxu1 %v9834_v54  ;;  %v4409_v54 = vld [vmem:[#allocation2 + $0x99] sm:$0xff] }
 0x3a5   : > { %8870 = vmatprep.subr.bf16.mxu1 %v9835_v30  ;;  %v11194_v39 = vpack.c.bf16 %v4410_v44, %v4409_v54  ;;  %v4417_v54 = vld [vmem:[#allocation2 + $0xd9] sm:$0xff]  ;;  %v4418_v44 = vld [vmem:[#allocation2 + $0xe1] sm:$0xff] }
 0x3a8   : > { %8871 = vmatpush3.bf16.msra.mxu1 %v9835_v30  ;;  %v11196_v30 = vpack.c.bf16 %v4412_v2, %v4411_v43  ;;  %v4420_v2 = vld [vmem:[#allocation2 + $0xf1] sm:$0xff]  ;;  %v11214_v43 = vpack.c.bf16 %v4418_v44, %v4417_v54  ;;  %v11999_v54 = vld [vmem:[#allocation33_spill] sm:$0xff]  ;;  %v12002_v44 = vld [vmem:[#allocation34_spill] sm:$0xff] }
 0x3a9   : > { %8872 = vmatprep.subr.bf16.mxu1 %v9836_v14  ;;  %v11216_v48 = vpack.c.bf16 %v4420_v2, %v4419_v29  ;;  %v9839_v29 = vld [vmem:[%s11659_s1 + $0x348] sm:$0xff]   ;;  %v9845_v2 = vld [vmem:[%s11659_s1 + $0x378] sm:$0xff]  }
 0x3ab   : > { %8841 = vmatmul.mubr.msk.bf16.gmra.mrb[12].mxu1 %vm11970_vm14, %v11178_v49 }
 0x3ac   : > { %8844 = vmatprep.mubr.msk.bf16.mxu1 %vm11971_vm10, %v11183_v22  ;;  %8873 = vmatpush3.bf16.msra.mxu1 %v9836_v14  ;;  %v4413_v14 = vld [vmem:[#allocation2 + $0xb9] sm:$0xff] }
 0x3ad   : > { %8874 = vmatprep.subr.bf16.mxu1 %v9837_v40  ;;  %v11204_v13 = vpack.c.bf16 %v4414_v27, %v4413_v14  ;;  %v4421_v14 = vld [vmem:[#allocation2 + $0xf9] sm:$0xff]  ;;  %v4422_v27 = vld [vmem:[#allocation2 + $0x101] sm:$0xff] }
 0x3b0   : > { %8875 = vmatpush3.bf16.msra.mxu1 %v9837_v40  ;;  %v11206_v40 = vpack.c.bf16 %v4416_v42, %v4415_v56  ;;  %v11224_v42 = vpack.c.bf16 %v4422_v27, %v4421_v14  ;;  %v9840_v56 = vld [vmem:[%s11659_s1 + $0x350] sm:$0xff]   ;;  %v12004_v14 = vld [vmem:[#allocation50_spill] sm:$0xff] }
 0x3b1   : > { %8908 = vmatprep.subr.bf16.mxu1 %v9838_v36  ;;  %v12005_v27 = vld [vmem:[#allocation35_spill] sm:$0xff] }
 0x3b3   : > { %8845 = vmatmul.mubr.msk.bf16.gmra.mrb[16].mxu1 %vm11946_vm7, %v11194_v39 }
 0x3b4   : > { %8848 = vmatprep.mubr.msk.bf16.mxu1 %vm11948_vm12, %v11196_v30 }
 0x3bb   : > { %8849 = vmatmul.mubr.msk.bf16.gmra.mrb[20].mxu1 %vm11949_vm3, %v11204_v13 }
 0x3bc   : > { %8852 = vmatprep.mubr.msk.bf16.mxu1 %vm11951_vm4, %v11206_v40  ;;  %vm12020_vm4 = vnez %v11877_v0 }
 0x3c3   : > { %8853 = vmatmul.mubr.msk.bf16.gmra.mrb[24].mxu1 %vm10517_vm8, %v11214_v43  ;;  %vm12019_vm8 = vnez %v11874_v33  ;;  %v5069_v33 = vld [vmem:[#allocation2 + $0x28] sm:$0xff] }
 0x3c4   : > { %8856 = vmatprep.mubr.msk.bf16.mxu1 %vm10524_vm0, %v11216_v48  ;;  %vm11995_vm0 = vnez %v11836_v55 }
 0x3cb   : > { %8857 = vmatmul.mubr.msk.bf16.gmra.mrb[28].mxu1 %vm10537_vm15, %v11224_v42 }
 0x3cc   : > { %8876 = vmatprep.mubr.msk.bf16.mxu1 %vm9939_vm2, %v10927_v58  ;;  %v9841_v58 = vld [vmem:[%s11659_s1 + $0x358] sm:$0xff]   ;;  %vm11996_vm2 = vnez %v11843_v7 }
 0x3d3   : > { %8877 = vmatmul.mubr.msk.bf16.vlgmr.msra.gmra.mrb[0].mxu1 %vm10062_vm5, %v10929_v18  ;;  %vm11997_vm5 = vnez %v11846_v11  ;;  %v9842_v18 = vld [vmem:[%s11659_s1 + $0x360] sm:$0xff]  }
 0x3d4   : > { %8880 = vmatprep.mubr.msk.bf16.mxu1 %vm11995_vm0, %v10954_v52  ;;  %8909 = vmatpush3.bf16.msra.mxu1 %v9838_v36  ;;  %v9843_v52 = vld [vmem:[%s11659_s1 + $0x368] sm:$0xff]   ;;  %vm12000_vm0 = vnez %v11999_v54 }
 0x3d5   : > { %8910 = vmatprep.subr.bf16.mxu1 %v9839_v29  ;;  %v11998_v36 = vld [vmem:[#allocation38_spill] sm:$0xff] }
 0x3d8   : > { %8911 = vmatpush3.bf16.msra.mxu1 %v9839_v29  ;;  %v12007_v29 = vld [vmem:[#allocation51_spill] sm:$0xff] }
 0x3d9   : > { %8912 = vmatprep.subr.bf16.mxu1 %v9840_v56 }
 0x3db   : > { %8881 = vmatmul.mubr.msk.bf16.gmra.mrb[4].mxu1 %vm11996_vm2, %v10956_v23  ;;  %v12001_v23 = vld [vmem:[#allocation41_spill] sm:$0xff]  ;;  %vm12003_vm2 = vnez %v12002_v44 }
 0x3dc   : > { %8884 = vmatprep.mubr.msk.bf16.mxu1 %vm11997_vm5, %v10983_v28  ;;  %8913 = vmatpush3.bf16.msra.mxu1 %v9840_v56  ;;  %v9844_v28 = vld [vmem:[%s11659_s1 + $0x370] sm:$0xff]   ;;  %vm12006_vm5 = vnez %v12005_v27  ;;  %v12008_v56 = vld [vmem:[#allocation36_spill] sm:$0xff] }
 0x3dd   : > { %8914 = vmatprep.subr.bf16.mxu1 %v9841_v58 }
 0x3e0   : > { %8915 = vmatpush3.bf16.msra.mxu1 %v9841_v58  ;;  %v9846_v58 = vld [vmem:[%s11659_s1 + $0x380] sm:$0xff]  }
 0x3e1   : > { %8916 = vmatprep.subr.bf16.mxu1 %v9842_v18 }
 0x3e3   : > { %8885 = vmatmul.mubr.msk.bf16.gmra.mrb[8].mxu1 %vm12000_vm0, %v11998_v36  ;;  %vm12009_vm0 = vnez %v12008_v56  ;;  %v12013_v36 = vld [vmem:[#allocation39_spill] sm:$0xff] }
 0x3e4   : > { %8888 = vmatprep.mubr.msk.bf16.mxu1 %vm12003_vm2, %v12001_v23  ;;  %8917 = vmatpush3.bf16.msra.mxu1 %v9842_v18  ;;  %v12010_v18 = vld [vmem:[#allocation53_spill] sm:$0xff]  ;;  %vm12014_vm15 = vnez %v12013_v36  ;;  %v12015_v23 = vld [vmem:[#allocation40_spill] sm:$0xff] }
 0x3e5   : > { %8918 = vmatprep.subr.bf16.mxu1 %v9843_v52  ;;  %v12045_v36 = vld [vmem:[#allocation44_spill] sm:$0xff] }
 0x3e8   : > { %8919 = vmatpush3.bf16.msra.mxu1 %v9843_v52  ;;  %v12011_v52 = vld [vmem:[#allocation37_spill] sm:$0xff] }
 0x3e9   : > { %8920 = vmatprep.subr.bf16.mxu1 %v9844_v28  ;;  %vm12012_vm2 = vnez %v12011_v52 }
 0x3eb   : > { %8889 = vmatmul.mubr.msk.bf16.gmra.mrb[12].mxu1 %vm12006_vm5, %v12004_v14  ;;  %vm12016_vm5 = vnez %v12015_v23  ;;  %v4760_v14 = vld [vmem:[#allocation2 + $0x10f] sm:$0xff] }
 0x3ec   : > { %8892 = vmatprep.mubr.msk.bf16.mxu1 %vm12009_vm0, %v12007_v29  ;;  %8921 = vmatpush3.bf16.msra.mxu1 %v9844_v28  ;;  %v12017_v28 = vld [vmem:[#allocation42_spill] sm:$0xff]  ;;  %v5068_v29 = vld [vmem:[#allocation2 + $0x20] sm:$0xff] }
 0x3ed   : > { %8922 = vmatprep.subr.bf16.mxu1 %v9845_v2  ;;  %vm12018_vm0 = vnez %v12017_v28  ;;  %v5071_v28 = vld [vmem:[#allocation2 + $0x38] sm:$0xff] }
 0x3f0   : > { %8923 = vmatpush3.bf16.msra.mxu1 %v9845_v2  ;;  %v4759_v2 = vld [vmem:[#allocation2 + $0x107] sm:$0xff] }
 0x3f1   : > { %8956 = vmatprep.subr.bf16.mxu1 %v9846_v58 }
 0x3f3   : > { %8893 = vmatmul.mubr.msk.bf16.gmra.mrb[16].mxu1 %vm12012_vm2, %v12010_v18  ;;  %v5067_v18 = vld [vmem:[#allocation2 + $0x18] sm:$0xff] }
 0x3f4   : > { %8896 = vmatprep.mubr.msk.bf16.mxu1 %vm12014_vm15, %v11052_v21  ;;  %v11298_v21 = vpack.c.bf16 %v4760_v14, %v4759_v2  ;;  %v5099_v23 = vpack.c.bf16 %v5068_v29, %v5067_v18  ;;  %v5074_v2 = vld [vmem:[#allocation2 + $0x50] sm:$0xff]  ;;  %v5073_v14 = vld [vmem:[#allocation2 + $0x48] sm:$0xff] }
 0x3f5   : > { %v11317_v29 = vpack.c.bf16 %v5074_v2, %v5073_v14  ;;  %v12022_v18 = vld [vmem:[#allocation47_spill] sm:$0xff]  ;;  %v9851_v14 = vld [vmem:[%s11659_s1 + $0x3a8] sm:$0xff]  }
 0x3fb   : > { %8897 = vmatmul.mubr.msk.bf16.gmra.mrb[20].mxu1 %vm12016_vm5, %v11054_v53  ;;  %vm12021_vm5 = vnez %v11880_v32  ;;  %v5070_v53 = vld [vmem:[#allocation2 + $0x30] sm:$0xff] }
 0x3fc   : > { %8900 = vmatprep.mubr.msk.bf16.mxu1 %vm12018_vm0, %v11070_v26  ;;  %v5072_v26 = vld [vmem:[#allocation2 + $0x40] sm:$0xff] }
 0x3fd   : > { %v11308_v0 = vpack.c.bf16 %v5072_v26, %v5071_v28  ;;  %v9849_v28 = vld [vmem:[%s11659_s1 + $0x398] sm:$0xff]   ;;  %v5078_v26 = vld [vmem:[#allocation2 + $0x70] sm:$0xff] }
 0x403   : > { %8901 = vmatmul.mubr.msk.bf16.gmra.mrb[24].mxu1 %vm12019_vm8, %v11072_v15  ;;  %v11303_v15 = vpack.c.bf16 %v5070_v53, %v5069_v33  ;;  %v11315_v33 = vld [vmem:[#allocation2 + $0x58] sm:$0xff]  ;;  %v9850_v53 = vld [vmem:[%s11659_s1 + $0x3a0] sm:$0xff]  }
 0x404   : > { %8904 = vmatprep.mubr.msk.bf16.mxu1 %vm12020_vm4, %v11082_v46  ;;  %v9847_v46 = vld [vmem:[%s11659_s1 + $0x388] sm:$0xff]   ;;  %vm12025_vm4 = vnez %v11887_v3  ;;  %v6369_v3 = vld [vmem:[#allocation2 + $0x99] sm:$0xff] }
 0x40b   : > { %8905 = vmatmul.mubr.msk.bf16.gmra.mrb[28].mxu1 %vm12021_vm5, %v11298_v21  ;;  %vm12024_vm5 = vnez %v11885_v59 }
 0x40c   : > { %8924 = vmatprep.mubr.bf16.mxu1 %v5099_v23  ;;  %v9848_v23 = vld [vmem:[%s11659_s1 + $0x390] sm:$0xff]  }
 0x413   : > { %8925 = vmatmul.mubr.bf16.vlgmr.msra.gmra.mrb[0].mxu1 %v11303_v15 }
 0x414   : > { %8928 = vmatprep.mubr.bf16.mxu1 %v11308_v0  ;;  %8957 = vmatpush3.bf16.msra.mxu1 %v9846_v58  ;;  %v5103_v58 = vpack.c.bf16 %v12022_v18, %v11315_v33  ;;  %v11338_v18 = vld [vmem:[#allocation2 + $0x88] sm:$0xff] }
 0x415   : > { %8958 = vmatprep.subr.bf16.mxu1 %v9847_v46 }
 0x418   : > { %8959 = vmatpush3.bf16.msra.mxu1 %v9847_v46  ;;  %v5077_v46 = vld [vmem:[#allocation2 + $0x68] sm:$0xff] }
 0x419   : > { %8960 = vmatprep.subr.bf16.mxu1 %v9848_v23  ;;  %v11328_v2 = vpack.c.bf16 %v5078_v26, %v5077_v46  ;;  %v9853_v26 = vld [vmem:[%s11659_s1 + $0x3b8] sm:$0xff]   ;;  %v5719_v46 = vld [vmem:[#allocation2 + $0x67] sm:$0xff] }
 0x41b   : > { %8929 = vmatmul.mubr.bf16.gmra.mrb[4].mxu1 %v11317_v29 }
 0x41c   : > { %8932 = vmatprep.mubr.bf16.mxu1 %v5103_v58  ;;  %8961 = vmatpush3.bf16.msra.mxu1 %v9848_v23  ;;  %v9852_v23 = vld [vmem:[%s11659_s1 + $0x3b0] sm:$0xff]  }
 0x41d   : > { %8962 = vmatprep.subr.bf16.mxu1 %v9849_v28 }
 0x420   : > { %8963 = vmatpush3.bf16.msra.mxu1 %v9849_v28  ;;  %v12023_v28 = vld [vmem:[#allocation49_spill] sm:$0xff] }
 0x421   : > { %8964 = vmatprep.subr.bf16.mxu1 %v9850_v53  ;;  %v5106_v58 = vpack.c.bf16 %v12023_v28, %v11338_v18 }
 0x423   : > { %8933 = vmatmul.mubr.bf16.gmra.mrb[8].mxu1 %v11328_v2 }
 0x424   : > { %8936 = vmatprep.mubr.bf16.mxu1 %v10990_v47  ;;  %8965 = vmatpush3.bf16.msra.mxu1 %v9850_v53  ;;  %v9854_v47 = vld [vmem:[%s11659_s1 + $0x3c0] sm:$0xff]  }
 0x425   : > { %8966 = vmatprep.subr.bf16.mxu1 %v9851_v14  ;;  %v5718_v53 = vld [vmem:[#allocation2 + $0x5f] sm:$0xff] }
 0x428   : > { %8967 = vmatpush3.bf16.msra.mxu1 %v9851_v14  ;;  %v5720_v14 = vld [vmem:[#allocation2 + $0x6f] sm:$0xff] }
 0x429   : > { %8968 = vmatprep.subr.bf16.mxu1 %v9852_v23 }
 0x42b   : > { %8937 = vmatmul.mubr.bf16.gmra.mrb[12].mxu1 %v5106_v58  ;;  %v7717_v58 = vpack.c.bf16 %v5720_v14, %v5719_v46  ;;  %v5738_v46 = vld [vmem:[#allocation2 + $0xff] sm:$0xff]  ;;  %v5737_v14 = vld [vmem:[#allocation2 + $0xf7] sm:$0xff] }
 0x42c   : > { %8940 = vmatprep.mubr.bf16.mxu1 %v11014_v57  ;;  %8969 = vmatpush3.bf16.msra.mxu1 %v9852_v23  ;;  %v9858_v57 = vld [vmem:[%s11659_s1 + $0x3e0] sm:$0xff]   ;;  %v5717_v23 = vld [vmem:[#allocation2 + $0x57] sm:$0xff] }
 0x42d   : > { %8970 = vmatprep.subr.bf16.mxu1 %v9853_v26  ;;  %v7714_v28 = vpack.c.bf16 %v5718_v53, %v5717_v23  ;;  %v7744_v23 = vpack.c.bf16 %v5738_v46, %v5737_v14  ;;  %v9880_v53 = vld [vmem:[#allocation2] sm:$0xff]  ;;  %v6356_v14 = vld [vmem:[#allocation2 + $0x31] sm:$0xff] }
 0x42e   : > { %v6096_v46 = vpack.c.bf16 %v9880_v53, %v9880_v53  ;;  %v12057_v53 = vld [vmem:[#allocation6_spill] sm:$0xff] }
 0x430   : > { %8971 = vmatpush3.bf16.msra.mxu1 %v9853_v26  ;;  %v5722_v26 = vld [vmem:[#allocation2 + $0x7f] sm:$0xff] }
 0x431   : > { %9004 = vmatprep.subr.bf16.mxu1 %v9854_v47 }
 0x433   : > { %8941 = vmatmul.mubr.bf16.gmra.mrb[16].mxu1 %v11005_v63  ;;  %v9855_v63 = vld [vmem:[%s11659_s1 + $0x3c8] sm:$0xff]  }
 0x434   : > { %8944 = vmatprep.mubr.bf16.mxu1 %v11038_v38  ;;  %v9857_v38 = vld [vmem:[%s11659_s1 + $0x3d8] sm:$0xff]  }
 0x43b   : > { %8945 = vmatmul.mubr.bf16.gmra.mrb[20].mxu1 %v11031_v60  ;;  %v9859_v60 = vld [vmem:[%s11659_s1 + $0x3e8] sm:$0xff]  }
 0x43c   : > { %8948 = vmatprep.mubr.bf16.mxu1 %v11056_v4  ;;  %v9861_v4 = vld [vmem:[%s11659_s1 + $0x3f8] sm:$0xff]  }
 0x443   : > { %8949 = vmatmul.mubr.bf16.gmra.mrb[24].mxu1 %v11050_v20  ;;  %v9860_v20 = vld [vmem:[%s11659_s1 + $0x3f0] sm:$0xff]  }
 0x444   : > { %8952 = vmatprep.mubr.bf16.mxu1 %v11074_v61  ;;  %v9856_v61 = vld [vmem:[%s11659_s1 + $0x3d0] sm:$0xff]  }
 0x44b   : > { %8953 = vmatmul.mubr.bf16.gmra.mrb[28].mxu1 %v11068_v12  ;;  %v9862_v12 = vld [vmem:[%s11659_s1 + $0x400] sm:$0xff]  }
 0x44c   : > { %8972 = vmatprep.mubr.msk.bf16.mxu1 %vm11990_vm6, %v11130_v51  ;;  %v6385_v51 = vld [vmem:[#allocation2 + $0x119] sm:$0xff] }
 0x453   : > { %8973 = vmatmul.mubr.msk.bf16.vlgmr.msra.gmra.mrb[0].mxu1 %vm12024_vm5, %v11135_v24  ;;  %v6386_v24 = vld [vmem:[#allocation2 + $0x121] sm:$0xff] }
 0x454   : > { %8976 = vmatprep.mubr.msk.bf16.mxu1 %vm12025_vm4, %v11146_v45  ;;  %9005 = vmatpush3.bf16.msra.mxu1 %v9854_v47  ;;  %v5403_v45 = vld [vmem:[#allocation2 + $0x109] sm:$0xff] }
 0x455   : > { %9006 = vmatprep.subr.bf16.mxu1 %v9855_v63  ;;  %v5723_v47 = vld [vmem:[#allocation2 + $0x87] sm:$0xff] }
 0x458   : > { %9007 = vmatpush3.bf16.msra.mxu1 %v9855_v63  ;;  %v5724_v63 = vld [vmem:[#allocation2 + $0x8f] sm:$0xff] }
 0x459   : > { %9008 = vmatprep.subr.bf16.mxu1 %v9856_v61 }
 0x45b   : > { %8977 = vmatmul.mubr.msk.bf16.gmra.mrb[4].mxu1 %vm11993_vm9, %v11151_v1  ;;  %v5404_v1 = vld [vmem:[#allocation2 + $0x111] sm:$0xff] }
 0x45c   : > { %8980 = vmatprep.mubr.msk.bf16.mxu1 %vm11994_vm13, %v11162_v8  ;;  %9009 = vmatpush3.bf16.msra.mxu1 %v9856_v61  ;;  %v5711_v8 = vld [vmem:[#allocation2 + $0x27] sm:$0xff]  ;;  %v5721_v61 = vld [vmem:[#allocation2 + $0x77] sm:$0xff] }
 0x45d   : > { %9010 = vmatprep.subr.bf16.mxu1 %v9857_v38 }
 0x460   : > { %9011 = vmatpush3.bf16.msra.mxu1 %v9857_v38  ;;  %v7720_v38 = vpack.c.bf16 %v5722_v26, %v5721_v61  ;;  %v6056_v26 = vld [vmem:[#allocation2 + $0x60] sm:$0xff] }
 0x461   : > { %9012 = vmatprep.subr.bf16.mxu1 %v9858_v57 }
 0x463   : > { %8981 = vmatmul.mubr.msk.bf16.gmra.mrb[8].mxu1 %vm11968_vm11, %v11167_v25  ;;  %v5712_v25 = vld [vmem:[#allocation2 + $0x2f] sm:$0xff] }
 0x464   : > { %8984 = vmatprep.mubr.msk.bf16.mxu1 %vm11969_vm1, %v11178_v49  ;;  %9013 = vmatpush3.bf16.msra.mxu1 %v9858_v57  ;;  %vm12030_vm1 = vnez %v11915_v34  ;;  %v11425_v49 = vpack.c.bf16 %v5404_v1, %v5403_v45  ;;  %v7723_v57 = vpack.c.bf16 %v5724_v63, %v5723_v47  ;;  %v6062_v47 = vld [vmem:[#allocation2 + $0x90] sm:$0xff]  ;;  %v6059_v63 = vld [vmem:[#allocation2 + $0x78] sm:$0xff] }
 0x465   : > { %9014 = vmatprep.subr.bf16.mxu1 %v9859_v60 }
 0x468   : > { %9015 = vmatpush3.bf16.msra.mxu1 %v9859_v60  ;;  %v5726_v60 = vld [vmem:[#allocation2 + $0x9f] sm:$0xff] }
 0x469   : > { %9016 = vmatprep.subr.bf16.mxu1 %v9860_v20 }
 0x46b   : > { %8985 = vmatmul.mubr.msk.bf16.gmra.mrb[12].mxu1 %vm11970_vm14, %v11183_v22  ;;  %vm12029_vm14 = vnez %v11913_v9  ;;  %v7705_v22 = vpack.c.bf16 %v5712_v25, %v5711_v8  ;;  %v5730_v8 = vld [vmem:[#allocation2 + $0xbf] sm:$0xff]  ;;  %v5731_v25 = vld [vmem:[#allocation2 + $0xc7] sm:$0xff] }
 0x46c   : > { %8988 = vmatprep.mubr.msk.bf16.mxu1 %vm11971_vm10, %v11194_v39  ;;  %9017 = vmatpush3.bf16.msra.mxu1 %v9860_v20  ;;  %vm12028_vm10 = vnez %v11950_v19  ;;  %v5714_v39 = vld [vmem:[#allocation2 + $0x3f] sm:$0xff]  ;;  %v5727_v20 = vld [vmem:[#allocation2 + $0xa7] sm:$0xff] }
 0x46d   : > { %9018 = vmatprep.subr.bf16.mxu1 %v9861_v4 }
 0x470   : > { %9019 = vmatpush3.bf16.msra.mxu1 %v9861_v4  ;;  %v5728_v4 = vld [vmem:[#allocation2 + $0xaf] sm:$0xff] }
 0x471   : > { %9052 = vmatprep.subr.bf16.mxu1 %v9862_v12  ;;  %v7729_v1 = vpack.c.bf16 %v5728_v4, %v5727_v20  ;;  %v6065_v20 = vld [vmem:[#allocation2 + $0xa8] sm:$0xff]  ;;  %v9877_v4 = vld [vmem:[%s11659_s1 + $0x478] sm:$0xff]  }
 0x473   : > { %8989 = vmatmul.mubr.msk.bf16.gmra.mrb[16].mxu1 %vm11946_vm7, %v11196_v30  ;;  %v5716_v30 = vld [vmem:[#allocation2 + $0x4f] sm:$0xff] }
 0x474   : > { %8992 = vmatprep.mubr.msk.bf16.mxu1 %vm11948_vm12, %v11204_v13  ;;  %v5713_v13 = vld [vmem:[#allocation2 + $0x37] sm:$0xff] }
 0x47b   : > { %8993 = vmatmul.mubr.msk.bf16.gmra.mrb[20].mxu1 %vm11949_vm3, %v11206_v40  ;;  %vm12031_vm3 = vnez %v11917_v37  ;;  %v7708_v40 = vpack.c.bf16 %v5714_v39, %v5713_v13  ;;  %v5729_v39 = vld [vmem:[#allocation2 + $0xb7] sm:$0xff]  ;;  %v5736_v13 = vld [vmem:[#allocation2 + $0xef] sm:$0xff] }
 0x47c   : > { %8996 = vmatprep.mubr.msk.bf16.mxu1 %vm12028_vm10, %v11214_v43  ;;  %vm12032_vm10 = vnez %v11808_v10  ;;  %v9863_v43 = vld [vmem:[%s11659_s1 + $0x408] sm:$0xff]   ;;  %v9864_v10 = vld [vmem:[%s11659_s1 + $0x410] sm:$0xff]  }
 0x483   : > { %8997 = vmatmul.mubr.msk.bf16.gmra.mrb[24].mxu1 %vm12029_vm14, %v11216_v48  ;;  %v5715_v48 = vld [vmem:[#allocation2 + $0x47] sm:$0xff]  ;;  %vm12034_vm14 = vnez %v11836_v55 }
 0x484   : > { %9000 = vmatprep.mubr.msk.bf16.mxu1 %vm12030_vm1, %v11224_v42  ;;  %v7711_v42 = vpack.c.bf16 %v5716_v30, %v5715_v48  ;;  %vm12033_vm1 = vnez %v11832_v50  ;;  %v9865_v50 = vld [vmem:[%s11659_s1 + $0x418] sm:$0xff]   ;;  %v9866_v55 = vld [vmem:[%s11659_s1 + $0x420] sm:$0xff]   ;;  %v7732_v48 = vpack.c.bf16 %v5730_v8, %v5729_v39 }
 0x485   : > { %v6071_v39 = vld [vmem:[#allocation2 + $0xd8] sm:$0xff] }
 0x48b   : > { %9001 = vmatmul.mubr.msk.bf16.gmra.mrb[28].mxu1 %vm12031_vm3, %v11425_v49 }
 0x48c   : > { %9020 = vmatprep.mubr.msk.bf16.mxu1 %vm12032_vm10, %v7705_v22  ;;  %vm12035_vm10 = vnez %v11843_v7  ;;  %v9867_v7 = vld [vmem:[%s11659_s1 + $0x428] sm:$0xff]  }
 0x48d   : > { %v5732_v22 = vld [vmem:[#allocation2 + $0xcf] sm:$0xff] }
 0x48e   : > { %v7735_v30 = vpack.c.bf16 %v5732_v22, %v5731_v25  ;;  %v6072_v25 = vld [vmem:[#allocation2 + $0xe0] sm:$0xff]  ;;  %v6074_v22 = vld [vmem:[#allocation2 + $0xf0] sm:$0xff] }
 0x493   : > { %9021 = vmatmul.mubr.msk.bf16.vlgmr.msra.gmra.mrb[0].mxu1 %vm12033_vm1, %v7708_v40  ;;  %vm12037_vm1 = vnez %v11999_v54  ;;  %v9869_v54 = vld [vmem:[%s11659_s1 + $0x438] sm:$0xff]  }
 0x494   : > { %9024 = vmatprep.mubr.msk.bf16.mxu1 %vm12034_vm14, %v7711_v42  ;;  %9053 = vmatpush3.bf16.msra.mxu1 %v9862_v12  ;;  %vm12036_vm14 = vnez %v11846_v11  ;;  %v9868_v11 = vld [vmem:[%s11659_s1 + $0x430] sm:$0xff]  }
 0x495   : > { %9054 = vmatprep.subr.bf16.mxu1 %v9863_v43  ;;  %v5725_v12 = vld [vmem:[#allocation2 + $0x97] sm:$0xff] }
 0x496   : > { %v7726_v45 = vpack.c.bf16 %v5726_v60, %v5725_v12  ;;  %v5733_v40 = vld [vmem:[#allocation2 + $0xd7] sm:$0xff]  ;;  %v6068_v12 = vld [vmem:[#allocation2 + $0xc0] sm:$0xff] }
 0x498   : > { %9055 = vmatpush3.bf16.msra.mxu1 %v9863_v43 }
 0x499   : > { %9056 = vmatprep.subr.bf16.mxu1 %v9864_v10 }
 0x49b   : > { %9025 = vmatmul.mubr.msk.bf16.gmra.mrb[4].mxu1 %vm12035_vm10, %v7714_v28  ;;  %vm12038_vm10 = vnez %v12002_v44  ;;  %v9870_v44 = vld [vmem:[%s11659_s1 + $0x440] sm:$0xff]   ;;  %v5741_v28 = vld [vmem:[#allocation2 + $0x117] sm:$0xff] }
 0x49c   : > { %9028 = vmatprep.mubr.msk.bf16.mxu1 %vm12036_vm14, %v7717_v58  ;;  %9057 = vmatpush3.bf16.msra.mxu1 %v9864_v10  ;;  %vm12039_vm14 = vnez %v12005_v27  ;;  %v5734_v27 = vld [vmem:[#allocation2 + $0xdf] sm:$0xff] }
 0x49d   : > { %9058 = vmatprep.subr.bf16.mxu1 %v9865_v50  ;;  %v7738_v43 = vpack.c.bf16 %v5734_v27, %v5733_v40  ;;  %v12041_v10 = vld [vmem:[#allocation40_spill] sm:$0xff] }
 0x49e   : > { %v6075_v40 = vld [vmem:[#allocation2 + $0xf8] sm:$0xff] }
 0x4a0   : > { %9059 = vmatpush3.bf16.msra.mxu1 %v9865_v50  ;;  %v5742_v50 = vld [vmem:[#allocation2 + $0x11f] sm:$0xff] }
 0x4a1   : > { %9060 = vmatprep.subr.bf16.mxu1 %v9866_v55  ;;  %v7750_v58 = vpack.c.bf16 %v5742_v50, %v5741_v28  ;;  %v6358_v28 = vld [vmem:[#allocation2 + $0x41] sm:$0xff]  ;;  %v6360_v50 = vld [vmem:[#allocation2 + $0x51] sm:$0xff] }
 0x4a3   : > { %9029 = vmatmul.mubr.msk.bf16.gmra.mrb[8].mxu1 %vm12037_vm1, %v7720_v38  ;;  %vm12040_vm1 = vnez %v12008_v56  ;;  %v5735_v56 = vld [vmem:[#allocation2 + $0xe7] sm:$0xff]  ;;  %v6087_v38 = vpack.c.bf16 %v6062_v47, %v11338_v18 }
 0x4a4   : > { %9032 = vmatprep.mubr.msk.bf16.mxu1 %vm12038_vm10, %v7723_v57  ;;  %9061 = vmatpush3.bf16.msra.mxu1 %v9866_v55  ;;  %v7741_v42 = vpack.c.bf16 %v5736_v13, %v5735_v56  ;;  %vm12042_vm10 = vnez %v12041_v10  ;;  %v9871_v55 = vld [vmem:[%s11659_s1 + $0x448] sm:$0xff]   ;;  %v6066_v57 = vld [vmem:[#allocation2 + $0xb0] sm:$0xff]  ;;  %v6076_v56 = vld [vmem:[#allocation2 + $0x100] sm:$0xff] }
 0x4a5   : > { %9062 = vmatprep.subr.bf16.mxu1 %v9867_v7  ;;  %v6089_v18 = vpack.c.bf16 %v6066_v57, %v6065_v20  ;;  %v6078_v13 = vld [vmem:[#allocation2 + $0x110] sm:$0xff] }
 0x4a6   : > { %v6371_v57 = vld [vmem:[#allocation2 + $0xa9] sm:$0xff]  ;;  %v6376_v20 = vld [vmem:[#allocation2 + $0xd1] sm:$0xff] }
 0x4a8   : > { %9063 = vmatpush3.bf16.msra.mxu1 %v9867_v7  ;;  %v6064_v7 = vld [vmem:[#allocation2 + $0xa0] sm:$0xff] }
 0x4a9   : > { %9064 = vmatprep.subr.bf16.mxu1 %v9868_v11 }
 0x4ab   : > { %9033 = vmatmul.mubr.msk.bf16.gmra.mrb[12].mxu1 %vm12039_vm14, %v7726_v45  ;;  %v6070_v45 = vld [vmem:[#allocation2 + $0xd0] sm:$0xff] }
 0x4ac   : > { %9036 = vmatprep.mubr.msk.bf16.mxu1 %vm12040_vm1, %v7729_v1  ;;  %9065 = vmatpush3.bf16.msra.mxu1 %v9868_v11  ;;  %v6063_v11 = vld [vmem:[#allocation2 + $0x98] sm:$0xff] }
 0x4ad   : > { %9066 = vmatprep.subr.bf16.mxu1 %v9869_v54  ;;  %v6088_v60 = vpack.c.bf16 %v6064_v7, %v6063_v11  ;;  %v6372_v7 = vld [vmem:[#allocation2 + $0xb1] sm:$0xff] }
 0x4ae   : > { %v7825_v11 = vpack.c.bf16 %v6372_v7, %v6371_v57 }
 0x4b0   : > { %9067 = vmatpush3.bf16.msra.mxu1 %v9869_v54  ;;  %v6067_v54 = vld [vmem:[#allocation2 + $0xb8] sm:$0xff] }
 0x4b1   : > { %9100 = vmatprep.subr.bf16.mxu1 %v9870_v44  ;;  %v6090_v1 = vpack.c.bf16 %v6068_v12, %v6067_v54  ;;  %v6378_v12 = vld [vmem:[#allocation2 + $0xe1] sm:$0xff]  ;;  %v6379_v54 = vld [vmem:[#allocation2 + $0xe9] sm:$0xff] }
 0x4b3   : > { %9037 = vmatmul.mubr.msk.bf16.gmra.mrb[16].mxu1 %vm12012_vm2, %v7732_v48  ;;  %vm12046_vm2 = vnez %v12045_v36  ;;  %v6092_v48 = vpack.c.bf16 %v6072_v25, %v6071_v39  ;;  %v6357_v36 = vld [vmem:[#allocation2 + $0x39] sm:$0xff]  ;;  %v7846_v25 = vpack.c.bf16 %v6386_v24, %v6385_v51 }
 0x4b4   : > { %9040 = vmatprep.mubr.msk.bf16.mxu1 %vm12014_vm15, %v7735_v30  ;;  %vm12047_vm15 = vnez %v11880_v32  ;;  %v6084_v32 = vpack.c.bf16 %v6056_v26, %v11315_v33  ;;  %v9875_v33 = vld [vmem:[%s11659_s1 + $0x468] sm:$0xff]   ;;  %v6361_v26 = vld [vmem:[#allocation2 + $0x59] sm:$0xff] }
 0x4b5   : > { %v6073_v30 = vld [vmem:[#allocation2 + $0xe8] sm:$0xff] }
 0x4b6   : > { %v6093_v27 = vpack.c.bf16 %v6074_v22, %v6073_v30 }
 0x4bb   : > { %9041 = vmatmul.mubr.msk.bf16.gmra.mrb[20].mxu1 %vm12042_vm10, %v7738_v43  ;;  %v6094_v43 = vpack.c.bf16 %v6076_v56, %v6075_v40  ;;  %v12055_v56 = vld [vmem:[#allocation5_spill] sm:$0xff] }
 0x4bc   : > { %9044 = vmatprep.mubr.msk.bf16.mxu1 %vm12018_vm0, %v7741_v42  ;;  %v6077_v42 = vld [vmem:[#allocation2 + $0x108] sm:$0xff] }
 0x4bd   : > { %v6095_v10 = vpack.c.bf16 %v6078_v13, %v6077_v42 }
 0x4c3   : > { %9045 = vmatmul.mubr.msk.bf16.gmra.mrb[24].mxu1 %vm12019_vm8, %v7744_v23  ;;  %v6355_v23 = vld [vmem:[#allocation2 + $0x29] sm:$0xff]  ;;  %vm12054_vm8 = vnez %v11915_v34 }
 0x4c4   : > { %9048 = vmatprep.mubr.msk.bf16.mxu1 %vm12046_vm2, %v11298_v21  ;;  %v9872_v21 = vld [vmem:[%s11659_s1 + $0x450] sm:$0xff]   ;;  %v7801_v52 = vpack.c.bf16 %v6356_v14, %v6355_v23  ;;  %v12058_v14 = vld [vmem:[#allocation4_spill] sm:$0xff] }
 0x4cb   : > { %9049 = vmatmul.mubr.msk.bf16.gmra.mrb[28].mxu1 %vm12047_vm15, %v7750_v58  ;;  %v7804_v58 = vpack.c.bf16 %v6358_v28, %v6357_v36 }
 0x4cc   : > { %9068 = vmatprep.mubr.bf16.mxu1 %v11303_v15  ;;  %v9873_v15 = vld [vmem:[%s11659_s1 + $0x458] sm:$0xff]  }
 0x4d3   : > { %9069 = vmatmul.mubr.bf16.vlgmr.msra.gmra.mrb[0].mxu1 %v11308_v0  ;;  %v9874_v0 = vld [vmem:[%s11659_s1 + $0x460] sm:$0xff]  }
 0x4d4   : > { %9072 = vmatprep.mubr.bf16.mxu1 %v11317_v29  ;;  %9101 = vmatpush3.bf16.msra.mxu1 %v9870_v44  ;;  %v6060_v29 = vld [vmem:[#allocation2 + $0x80] sm:$0xff]  ;;  %v6069_v44 = vld [vmem:[#allocation2 + $0xc8] sm:$0xff] }
 0x4d5   : > { %9102 = vmatprep.subr.bf16.mxu1 %v9871_v55  ;;  %v6086_v61 = vpack.c.bf16 %v6060_v29, %v6059_v63  ;;  %v6091_v8 = vpack.c.bf16 %v6070_v45, %v6069_v44  ;;  %v6363_v29 = vld [vmem:[#allocation2 + $0x69] sm:$0xff]  ;;  %v6366_v63 = vld [vmem:[#allocation2 + $0x81] sm:$0xff]  ;;  %v6380_v45 = vld [vmem:[#allocation2 + $0xf1] sm:$0xff] }
 0x4d6   : > { %v7816_v59 = vpack.c.bf16 %v6366_v63, %v6365_v5  ;;  %v6382_v44 = vld [vmem:[#allocation2 + $0x101] sm:$0xff]  ;;  %v12060_v5 = vld [vmem:[#allocation7_spill] sm:$0xff] }
 0x4d8   : > { %9103 = vmatpush3.bf16.msra.mxu1 %v9871_v55  ;;  %v6359_v55 = vld [vmem:[#allocation2 + $0x49] sm:$0xff] }
 0x4d9   : > { %9104 = vmatprep.subr.bf16.mxu1 %v9872_v21 }
 0x4db   : > { %9073 = vmatmul.mubr.bf16.gmra.mrb[4].mxu1 %v6084_v32  ;;  %v6362_v32 = vld [vmem:[#allocation2 + $0x61] sm:$0xff] }
 0x4dc   : > { %9076 = vmatprep.mubr.bf16.mxu1 %v11328_v2  ;;  %9105 = vmatpush3.bf16.msra.mxu1 %v9872_v21  ;;  %v9876_v2 = vld [vmem:[%s11659_s1 + $0x470] sm:$0xff]   ;;  %v7807_v21 = vpack.c.bf16 %v6360_v50, %v6359_v55 }
 0x4dd   : > { %9106 = vmatprep.subr.bf16.mxu1 %v9873_v15 }
 0x4e0   : > { %9107 = vmatpush3.bf16.msra.mxu1 %v9873_v15  ;;  %v6364_v15 = vld [vmem:[#allocation2 + $0x71] sm:$0xff] }
 0x4e1   : > { %9108 = vmatprep.subr.bf16.mxu1 %v9874_v0  ;;  %v7813_v47 = vpack.c.bf16 %v6364_v15, %v6363_v29 }
 0x4e3   : > { %9077 = vmatmul.mubr.bf16.gmra.mrb[8].mxu1 %v6086_v61  ;;  %v6368_v61 = vld [vmem:[#allocation2 + $0x91] sm:$0xff] }
 0x4e4   : > { %9080 = vmatprep.mubr.bf16.mxu1 %v6087_v38  ;;  %9109 = vmatpush3.bf16.msra.mxu1 %v9874_v0  ;;  %v7810_v0 = vpack.c.bf16 %v6362_v32, %v6361_v26 }
 0x4e5   : > { %9110 = vmatprep.subr.bf16.mxu1 %v9875_v33 }
 0x4e8   : > { %9111 = vmatpush3.bf16.msra.mxu1 %v9875_v33  ;;  %v6367_v33 = vld [vmem:[#allocation2 + $0x89] sm:$0xff] }
 0x4e9   : > { %9112 = vmatprep.subr.bf16.mxu1 %v9876_v2  ;;  %v7819_v38 = vpack.c.bf16 %v6368_v61, %v6367_v33 }
 0x4eb   : > { %9081 = vmatmul.mubr.bf16.gmra.mrb[12].mxu1 %v6088_v60  ;;  %v6374_v60 = vld [vmem:[#allocation2 + $0xc1] sm:$0xff] }
 0x4ec   : > { %9084 = vmatprep.mubr.bf16.mxu1 %v6089_v18  ;;  %9113 = vmatpush3.bf16.msra.mxu1 %v9876_v2  ;;  %v6370_v2 = vld [vmem:[#allocation2 + $0xa1] sm:$0xff]  ;;  %v7828_v31 = vpack.c.bf16 %v6374_v60, %v6373_v41 }
 0x4ed   : > { %9114 = vmatprep.subr.bf16.mxu1 %v9877_v4  ;;  %v7822_v35 = vpack.c.bf16 %v6370_v2, %v6369_v3 }
 0x4f0   : > { %9115 = vmatpush3.bf16.msra.mxu1 %v9877_v4  ;;  %v6375_v4 = vld [vmem:[#allocation2 + $0xc9] sm:$0xff] }
 0x4f1   : > { %v7831_v18 = vpack.c.bf16 %v6376_v20, %v6375_v4 }
 0x4f3   : > { %9085 = vmatmul.mubr.bf16.gmra.mrb[16].mxu1 %v6090_v1  ;;  %v7837_v1 = vpack.c.bf16 %v6380_v45, %v6379_v54  ;;  %v12064_v45 = vld [vmem:[#allocation11_spill] sm:$0xff] }
 0x4f4   : > { %9088 = vmatprep.mubr.bf16.mxu1 %v6091_v8 }
 0x4fb   : > { %9089 = vmatmul.mubr.bf16.gmra.mrb[20].mxu1 %v6092_v48 }
 0x4fc   : > { %9092 = vmatprep.mubr.bf16.mxu1 %v6093_v27 }
 0x503   : > { %9093 = vmatmul.mubr.bf16.gmra.mrb[24].mxu1 %v6094_v43  ;;  %v12056_v43 = vld [vmem:[#allocation3_spill] sm:$0xff] }
 0x504   : > { %9096 = vmatprep.mubr.bf16.mxu1 %v6095_v10 }
 0x50b   : > { %9097 = vmatmul.mubr.bf16.gmra.mrb[28].mxu1 %v6096_v46 }
 0x50c   : > { %9116 = vmatprep.mubr.msk.bf16.mxu1 %vm11990_vm6, %v7801_v52  ;;  %vm12049_vm6 = vnez %v11897_v17 }
 0x513   : > { %9117 = vmatmul.mubr.msk.bf16.vlgmr.msra.gmra.mrb[0].mxu1 %vm12024_vm5, %v7804_v58  ;;  %vm12048_vm5 = vnez %v11895_v6  ;;  %v6377_v6 = vld [vmem:[#allocation2 + $0xd9] sm:$0xff] }
 0x514   : > { %9120 = vmatprep.mubr.msk.bf16.mxu1 %vm12025_vm4, %v7807_v21  ;;  %v7834_v17 = vpack.c.bf16 %v6378_v12, %v6377_v6  ;;  %vm12052_vm4 = vnez %v11950_v19 }
 0x51b   : > { %9121 = vmatmul.mubr.msk.bf16.gmra.mrb[4].mxu1 %vm11993_vm9, %v7810_v0  ;;  %vm12050_vm9 = vnez %v11899_v62  ;;  %v6381_v62 = vld [vmem:[#allocation2 + $0xf9] sm:$0xff] }
 0x51c   : > { %9124 = vmatprep.mubr.msk.bf16.mxu1 %vm11994_vm13, %v7813_v47  ;;  %vm12051_vm13 = vnez %v11908_v16  ;;  %v7840_v8 = vpack.c.bf16 %v6382_v44, %v6381_v62  ;;  %v11550_v16 = vld [vmem:[%s11660_s2 + $0x1] ss:$0 sm:$0xff]  ;;  %v12066_v44 = vld [vmem:[#allocation12_spill] sm:$0xff] }
 0x51d   : > { %v12059_v0 = vld [vmem:[#allocation9_spill] sm:$0xff] }
 0x523   : > { %9125 = vmatmul.mubr.msk.bf16.gmra.mrb[8].mxu1 %vm11968_vm11, %v7816_v59  ;;  %vm12053_vm11 = vnez %v11913_v9  ;;  %v12061_v59 = vld [vmem:[#allocation10_spill] sm:$0xff] }
 0x524   : > { %9128 = vmatprep.mubr.msk.bf16.mxu1 %vm12048_vm5, %v7819_v38  ;;  %v12062_v38 = vld [vmem:[#allocation8_spill] sm:$0xff] }
 0x52b   : > { %9129 = vmatmul.mubr.msk.bf16.gmra.mrb[12].mxu1 %vm12049_vm6, %v7822_v35 }
 0x52c   : > { %9132 = vmatprep.mubr.msk.bf16.mxu1 %vm12050_vm9, %v7825_v11 }
 0x533   : > { %9133 = vmatmul.mubr.msk.bf16.gmra.mrb[16].mxu1 %vm11946_vm7, %v7828_v31 }
 0x534   : > { %9136 = vmatprep.mubr.msk.bf16.mxu1 %vm11948_vm12, %v7831_v18  ;;  %v12063_v18 = vld [vmem:[#allocation13_spill] sm:$0xff] }
 0x53b   : > { %9137 = vmatmul.mubr.msk.bf16.gmra.mrb[20].mxu1 %vm12051_vm13, %v7834_v17 }
 0x53c   : > { %9140 = vmatprep.mubr.msk.bf16.mxu1 %vm12052_vm4, %v7837_v1  ;;  %v12065_v1 = vld [vmem:[#allocation14_spill] sm:$0xff] }
 0x543   : > { %9141 = vmatmul.mubr.msk.bf16.gmra.mrb[24].mxu1 %vm12053_vm11, %v7840_v8 }
 0x544   : > { %9144 = vmatprep.mubr.msk.bf16.mxu1 %vm12054_vm8, %v11425_v49 }
 0x54b   : > { %9145 = vmatmul.mubr.msk.bf16.gmra.mrb[28].mxu1 %vm12031_vm3, %v7846_v25 }
 0x5e6   : > { %v9118_v19 = vpop.f32.mrb[0].mxu1 }
 0x5e7   : > { %v9180_v9 = vadd.f32 %v9118_v19, %v11550_v16  ;;  %v6534_v22 = vpop.f32.mrb[1].mxu1 }
 0x5e8   : > { %v9181_v39 = vadd.f32 %v11550_v16, %v6534_v22  ;;  %v9119_v48 = vpop.f32.mrb[2].mxu1 }
 0x5e9   : > { %v6695_v34 = vmax.f32 %v9180_v9, 0.0  ;;  %v9182_v49 = vadd.f32 %v9119_v48, %v11550_v16  ;;  %v6537_v30 = vpop.f32.mrb[3].mxu1 }
 0x5ea   : > { %v6693_v37 = vmax.f32 %v9181_v39, 0.0  ;;  %v9183_v27 = vadd.f32 %v11550_v16, %v6537_v30  ;;  %v12067_v30 = vld [vmem:[#allocation17_spill] sm:$0xff] }
 0x5eb   : > { %v6727_v13 = vadd.f32 %v6695_v34, %v12055_v56  ;;  %v6696_v40 = vmax.f32 %v9182_v49, 0.0  ;;  %v12068_v56 = vld [vmem:[#allocation15_spill] sm:$0xff] }
 0x5ec   : > { %v6725_v42 = vadd.f32 %v6693_v37, %v12056_v43  ;;  %v6694_v10 = vmax.f32 %v9183_v27, 0.0  ;;  %v12069_v43 = vld [vmem:[#allocation18_spill] sm:$0xff] }
 0x5ed   : > { %6759 = vst [vmem:[%s11560_s24 + $0x10] sm:$0xff] %v6727_v13  ;;  %v6728_v46 = vadd.f32 %v6696_v40, %v12057_v53 }
 0x5ee   : > { %6757 = vst [vmem:[%s11560_s24] sm:$0xff] %v6725_v42  ;;  %v6726_v23 = vadd.f32 %v6694_v10, %v12058_v14  ;;  %v9122_v52 = vpop.f32.mrb[4].mxu1  ;;  %v12070_v10 = vld [vmem:[#allocation16_spill] sm:$0xff] }
 0x5ef   : > { %6760 = vst [vmem:[%s11560_s24 + $0x18] sm:$0xff] %v6728_v46  ;;  %v9184_v36 = vadd.f32 %v9122_v52, %v11550_v16  ;;  %v6550_v28 = vpop.f32.mrb[5].mxu1 }
 0x5f0   : > { %6758 = vst [vmem:[%s11560_s24 + $0x8] sm:$0xff] %v6726_v23  ;;  %v9185_v50 = vadd.f32 %v11550_v16, %v6550_v28  ;;  %v9123_v58 = vpop.f32.mrb[6].mxu1 }
 0x5f1   : > { %v6699_v55 = vmax.f32 %v9184_v36, 0.0  ;;  %v9186_v21 = vadd.f32 %v9123_v58, %v11550_v16  ;;  %v6553_v26 = vpop.f32.mrb[7].mxu1 }
 0x5f2   : > { %v6697_v32 = vmax.f32 %v9185_v50, 0.0  ;;  %v9187_v15 = vadd.f32 %v11550_v16, %v6553_v26  ;;  %v12071_v26 = vld [vmem:[#allocation21_spill] sm:$0xff] }
 0x5f3   : > { %v6731_v29 = vadd.f32 %v6699_v55, %v12059_v0  ;;  %v6700_v47 = vmax.f32 %v9186_v21, 0.0  ;;  %v12072_v0 = vld [vmem:[#allocation19_spill] sm:$0xff] }
 0x5f4   : > { %v6729_v63 = vadd.f32 %v6697_v32, %v12060_v5  ;;  %v6698_v61 = vmax.f32 %v9187_v15, 0.0  ;;  %v12073_v5 = vld [vmem:[#allocation22_spill] sm:$0xff] }
 0x5f5   : > { %6763 = vst [vmem:[%s11560_s24 + $0x30] sm:$0xff] %v6731_v29  ;;  %v6732_v33 = vadd.f32 %v6700_v47, %v12061_v59 }
 0x5f6   : > { %6761 = vst [vmem:[%s11560_s24 + $0x20] sm:$0xff] %v6729_v63  ;;  %v6730_v3 = vadd.f32 %v6698_v61, %v12062_v38  ;;  %v9126_v2 = vpop.f32.mrb[8].mxu1  ;;  %v12074_v61 = vld [vmem:[#allocation20_spill] sm:$0xff] }
 0x5f7   : > { %6764 = vst [vmem:[%s11560_s24 + $0x38] sm:$0xff] %v6732_v33  ;;  %v9188_v7 = vadd.f32 %v9126_v2, %v11550_v16  ;;  %v6566_v35 = vpop.f32.mrb[9].mxu1 }
 0x5f8   : > { %6762 = vst [vmem:[%s11560_s24 + $0x28] sm:$0xff] %v6730_v3  ;;  %v9189_v57 = vadd.f32 %v11550_v16, %v6566_v35  ;;  %v9127_v11 = vpop.f32.mrb[10].mxu1 }
 0x5f9   : > { %v6703_v41 = vmax.f32 %v9188_v7, 0.0  ;;  %v9190_v60 = vadd.f32 %v9127_v11, %v11550_v16  ;;  %v6569_v20 = vpop.f32.mrb[11].mxu1 }
 0x5fa   : > { %v6701_v31 = vmax.f32 %v9189_v57, 0.0  ;;  %v9191_v4 = vadd.f32 %v11550_v16, %v6569_v20  ;;  %v12075_v20 = vld [vmem:[#allocation25_spill] sm:$0xff] }
 0x5fb   : > { %v6735_v6 = vadd.f32 %v6703_v41, %v12063_v18  ;;  %v6704_v12 = vmax.f32 %v9190_v60, 0.0  ;;  %v12076_v18 = vld [vmem:[#allocation23_spill] sm:$0xff] }
 0x5fc   : > { %v6733_v17 = vadd.f32 %v6701_v31, %v12064_v45  ;;  %v6702_v54 = vmax.f32 %v9191_v4, 0.0  ;;  %v12077_v45 = vld [vmem:[#allocation26_spill] sm:$0xff] }
 0x5fd   : > { %6767 = vst [vmem:[%s11560_s24 + $0x50] sm:$0xff] %v6735_v6  ;;  %v6736_v62 = vadd.f32 %v6704_v12, %v12065_v1 }
 0x5fe   : > { %6765 = vst [vmem:[%s11560_s24 + $0x40] sm:$0xff] %v6733_v17  ;;  %v6734_v8 = vadd.f32 %v6702_v54, %v12066_v44  ;;  %v9130_v51 = vpop.f32.mrb[12].mxu1  ;;  %v12078_v54 = vld [vmem:[#allocation24_spill] sm:$0xff] }
 0x5ff   : > { %6768 = vst [vmem:[%s11560_s24 + $0x58] sm:$0xff] %v6736_v62  ;;  %v9192_v24 = vadd.f32 %v9130_v51, %v11550_v16  ;;  %v6582_v25 = vpop.f32.mrb[13].mxu1 }
 0x600   : > { %6766 = vst [vmem:[%s11560_s24 + $0x48] sm:$0xff] %v6734_v8  ;;  %v9193_v19 = vadd.f32 %v11550_v16, %v6582_v25  ;;  %v9131_v9 = vpop.f32.mrb[14].mxu1 }
 0x601   : > { %v6707_v22 = vmax.f32 %v9192_v24, 0.0  ;;  %v9194_v39 = vadd.f32 %v9131_v9, %v11550_v16  ;;  %v6585_v48 = vpop.f32.mrb[15].mxu1 }
 0x602   : > { %v6705_v34 = vmax.f32 %v9193_v19, 0.0  ;;  %v9195_v49 = vadd.f32 %v11550_v16, %v6585_v48  ;;  %v12079_v48 = vld [vmem:[#allocation29_spill] sm:$0xff] }
 0x603   : > { %v6739_v37 = vadd.f32 %v6707_v22, %v12067_v30  ;;  %v6708_v27 = vmax.f32 %v9194_v39, 0.0  ;;  %v12080_v30 = vld [vmem:[#allocation27_spill] sm:$0xff] }
 0x604   : > { %v6737_v13 = vadd.f32 %v6705_v34, %v12068_v56  ;;  %v6706_v40 = vmax.f32 %v9195_v49, 0.0  ;;  %v12081_v56 = vld [vmem:[#allocation30_spill] sm:$0xff] }
 0x605   : > { %6771 = vst [vmem:[%s11560_s24 + $0x70] sm:$0xff] %v6739_v37  ;;  %v6740_v42 = vadd.f32 %v6708_v27, %v12069_v43 }
 0x606   : > { %6769 = vst [vmem:[%s11560_s24 + $0x60] sm:$0xff] %v6737_v13  ;;  %v6738_v53 = vadd.f32 %v6706_v40, %v12070_v10  ;;  %v9134_v46 = vpop.f32.mrb[16].mxu1  ;;  %v12082_v40 = vld [vmem:[#allocation28_spill] sm:$0xff] }
 0x607   : > { %6772 = vst [vmem:[%s11560_s24 + $0x78] sm:$0xff] %v6740_v42  ;;  %v9196_v14 = vadd.f32 %v9134_v46, %v11550_v16  ;;  %v6598_v23 = vpop.f32.mrb[17].mxu1 }
 0x608   : > { %6770 = vst [vmem:[%s11560_s24 + $0x68] sm:$0xff] %v6738_v53  ;;  %v9197_v52 = vadd.f32 %v11550_v16, %v6598_v23  ;;  %v9135_v36 = vpop.f32.mrb[18].mxu1 }
 0x609   : > { %v6711_v28 = vmax.f32 %v9196_v14, 0.0  ;;  %v9198_v50 = vadd.f32 %v9135_v36, %v11550_v16  ;;  %v6601_v58 = vpop.f32.mrb[19].mxu1 }
 0x60a   : > { %v6709_v55 = vmax.f32 %v9197_v52, 0.0  ;;  %v9199_v21 = vadd.f32 %v11550_v16, %v6601_v58  ;;  %v12083_v58 = vld [vmem:[#allocation52_spill] sm:$0xff] }
 0x60b   : > { %v6743_v32 = vadd.f32 %v6711_v28, %v12071_v26  ;;  %v6712_v15 = vmax.f32 %v9198_v50, 0.0  ;;  %v12084_v26 = vld [vmem:[#allocation31_spill] sm:$0xff] }
 0x60c   : > { %v6741_v29 = vadd.f32 %v6709_v55, %v12072_v0  ;;  %v6710_v47 = vmax.f32 %v9199_v21, 0.0  ;;  %v12085_v0 = vld [vmem:[#allocation45_spill] sm:$0xff] }
 0x60d   : > { %6775 = vst [vmem:[%s11560_s24 + $0x90] sm:$0xff] %v6743_v32  ;;  %v6744_v63 = vadd.f32 %v6712_v15, %v12073_v5 }
 0x60e   : > { %6773 = vst [vmem:[%s11560_s24 + $0x80] sm:$0xff] %v6741_v29  ;;  %v6742_v59 = vadd.f32 %v6710_v47, %v12074_v61  ;;  %v9138_v33 = vpop.f32.mrb[20].mxu1  ;;  %v12086_v47 = vld [vmem:[#allocation32_spill] sm:$0xff] }
 0x60f   : > { %6776 = vst [vmem:[%s11560_s24 + $0x98] sm:$0xff] %v6744_v63  ;;  %v9200_v38 = vadd.f32 %v9138_v33, %v11550_v16  ;;  %v6614_v3 = vpop.f32.mrb[21].mxu1 }
 0x610   : > { %6774 = vst [vmem:[%s11560_s24 + $0x88] sm:$0xff] %v6742_v59  ;;  %v9201_v2 = vadd.f32 %v11550_v16, %v6614_v3  ;;  %v9139_v7 = vpop.f32.mrb[22].mxu1 }
 0x611   : > { %v6715_v35 = vmax.f32 %v9200_v38, 0.0  ;;  %v9202_v57 = vadd.f32 %v9139_v7, %v11550_v16  ;;  %v6617_v11 = vpop.f32.mrb[23].mxu1 }
 0x612   : > { %v6713_v41 = vmax.f32 %v9201_v2, 0.0  ;;  %v9203_v60 = vadd.f32 %v11550_v16, %v6617_v11 }
 0x613   : > { %v6747_v31 = vadd.f32 %v6715_v35, %v12075_v20  ;;  %v6716_v4 = vmax.f32 %v9202_v57, 0.0 }
 0x614   : > { %v6745_v6 = vadd.f32 %v6713_v41, %v12076_v18  ;;  %v6714_v12 = vmax.f32 %v9203_v60, 0.0 }
 0x615   : > { %6779 = vst [vmem:[%s11560_s24 + $0xb0] sm:$0xff] %v6747_v31  ;;  %v6748_v17 = vadd.f32 %v6716_v4, %v12077_v45 }
 0x616   : > { %6777 = vst [vmem:[%s11560_s24 + $0xa0] sm:$0xff] %v6745_v6  ;;  %v6746_v1 = vadd.f32 %v6714_v12, %v12078_v54  ;;  %v9142_v62 = vpop.f32.mrb[24].mxu1 }
 0x617   : > { %6780 = vst [vmem:[%s11560_s24 + $0xb8] sm:$0xff] %v6748_v17  ;;  %v9204_v44 = vadd.f32 %v9142_v62, %v11550_v16  ;;  %v6630_v8 = vpop.f32.mrb[25].mxu1 }
 0x618   : > { %6778 = vst [vmem:[%s11560_s24 + $0xa8] sm:$0xff] %v6746_v1  ;;  %v9205_v51 = vadd.f32 %v11550_v16, %v6630_v8  ;;  %v9143_v24 = vpop.f32.mrb[26].mxu1 }
 0x619   : > { %v6719_v25 = vmax.f32 %v9204_v44, 0.0  ;;  %v9206_v19 = vadd.f32 %v9143_v24, %v11550_v16  ;;  %v6633_v9 = vpop.f32.mrb[27].mxu1 }
 0x61a   : > { %v6717_v22 = vmax.f32 %v9205_v51, 0.0  ;;  %v9207_v39 = vadd.f32 %v11550_v16, %v6633_v9 }
 0x61b   : > { %v6751_v34 = vadd.f32 %v6719_v25, %v12079_v48  ;;  %v6720_v49 = vmax.f32 %v9206_v19, 0.0 }
 0x61c   : > { %v6749_v37 = vadd.f32 %v6717_v22, %v12080_v30  ;;  %v6718_v27 = vmax.f32 %v9207_v39, 0.0 }
 0x61d   : > { %6783 = vst [vmem:[%s11560_s24 + $0xd0] sm:$0xff] %v6751_v34  ;;  %v6752_v13 = vadd.f32 %v6720_v49, %v12081_v56 }
 0x61e   : > { %6781 = vst [vmem:[%s11560_s24 + $0xc0] sm:$0xff] %v6749_v37  ;;  %v6750_v43 = vadd.f32 %v6718_v27, %v12082_v40  ;;  %v9146_v42 = vpop.f32.mrb[28].mxu1 }
 0x61f   : > { %6784 = vst [vmem:[%s11560_s24 + $0xd8] sm:$0xff] %v6752_v13  ;;  %v9208_v10 = vadd.f32 %v9146_v42, %v11550_v16  ;;  %v6646_v53 = vpop.f32.mrb[29].mxu1 }
 0x620   : > { %6782 = vst [vmem:[%s11560_s24 + $0xc8] sm:$0xff] %v6750_v43  ;;  %v9209_v46 = vadd.f32 %v11550_v16, %v6646_v53  ;;  %v9147_v14 = vpop.f32.mrb[30].mxu1 }
 0x621   : > { %v6723_v23 = vmax.f32 %v9208_v10, 0.0  ;;  %v9210_v52 = vadd.f32 %v9147_v14, %v11550_v16  ;;  %v6649_v36 = vpop.f32.mrb[31].mxu1 }
 0x622   : > { %v6721_v28 = vmax.f32 %v9209_v46, 0.0  ;;  %v9211_v50 = vadd.f32 %v11550_v16, %v6649_v36 }
 0x623   : > { %v6755_v55 = vadd.f32 %v12083_v58, %v6723_v23  ;;  %v6724_v21 = vmax.f32 %v9210_v52, 0.0 }
 0x624   : > { %v6753_v32 = vadd.f32 %v6721_v28, %v12084_v26  ;;  %v6722_v15 = vmax.f32 %v9211_v50, 0.0 }
 0x625   : > { %6787 = vst [vmem:[%s11560_s24 + $0xf0] sm:$0xff] %v6755_v55  ;;  %v6756_v29 = vadd.f32 %v6724_v21, %v12085_v0 }
 0x626   : > { %6785 = vst [vmem:[%s11560_s24 + $0xe0] sm:$0xff] %v6753_v32  ;;  %v6754_v5 = vadd.f32 %v6722_v15, %v12086_v47 }
 0x627   : > { %6788 = vst [vmem:[%s11560_s24 + $0xf8] sm:$0xff] %v6756_v29 }
 0x628   : > { %6786 = vst [vmem:[%s11560_s24 + $0xe8] sm:$0xff] %v6754_v5 }
 0x629 PF: > { %s13_s12 = sadd.s32 1, %s9887_s12  }
 0x62a   : > { %p10_p4 = scmp.ge.s32.totalorder %s13_s12, 4  }
 0x62c   :  { %12 = sbr.rel (!%p10_p4) target bundleno = 1 (0x1), region = 80 }

</bundles_post_ra>
